<compile_context>
chip_gen: v5e
topology: v5e:2x2
jax: 0.10.0
libtpu: 0.0.40
codegen_flags: <defaults>
</compile_context>

<pallas_src>
import math

import jax
import jax.numpy as jnp
from jax.experimental import pallas as pl
from jax.experimental.pallas import tpu as pltpu

# ---------------- model config (synthetic tiny BERT) ----------------
VOCAB = 64
SEQ = 8            # padded phrase length (from tokenizer(..., padding=True))
HIDDEN = 32
NHEADS = 4
DHEAD = HIDDEN // NHEADS
FFN = 64
NLAYERS = 2
NPHRASES = 16      # number of registered phrases (rows of all_ids / all_masks)
LN_EPS = 1e-12

assert SEQ & (SEQ - 1) == 0, "in-kernel block-diagonal mask assumes power-of-two SEQ"

# ---------------- parameter-blob row layouts ----------------
W_LANES = 3 * HIDDEN                 # lane width (96) of both parameter blobs
# bf16 weight blob: per layer [wqkv | wo | w1 | w2] stacked along sublanes.
R_WQKV = 0                           # [H, 3H]
R_WO = HIDDEN                        # [H, H]
R_W1 = 2 * HIDDEN                    # [H, F]
R_W2 = 3 * HIDDEN                    # [F, H]
WROWS_PER_LAYER = 3 * HIDDEN + FFN   # 160 (multiple of 16 -> bf16-aligned bases)
R_POOLW = NLAYERS * WROWS_PER_LAYER  # pooler weight [H, H]
WROWS = R_POOLW + HIDDEN             # 352

# f32 small-parameter blob: one parameter vector per row.
S_EMB_G, S_EMB_B = 0, 1
S_BQKV, S_BO, S_LN1G, S_LN1B, S_B1, S_B2, S_LN2G, S_LN2B = range(8)
S_PER_LAYER = 8
S_LAYER0 = 2
S_POOLB = S_LAYER0 + NLAYERS * S_PER_LAYER    # 18
SROWS = S_POOLB + 1                           # 19


def _gelu(x):
    # tanh-approx GELU; HF default BERT uses exact erf-GELU.
    # TODO(synk): switch to erf-based GELU if bit-matching HF BERT is required.
    c = 0.7978845608028654  # sqrt(2/pi)
    return 0.5 * x * (1.0 + jnp.tanh(c * (x + 0.044715 * x * x * x)))


# ---------------- fused BERT forward kernel (whole encoder + pooler) ----------------
def _bert_kernel(x_ref, mask_ref, wblob_ref, smalls_ref, out_ref):
    mc, H = x_ref.shape            # flattened tokens of this chunk, hidden size
    bc = out_ref.shape[0]          # phrases in this chunk
    F = FFN

    def mm(a_bf, b_bf):            # bf16 operands, f32 accumulate (MXU-native)
        return jnp.dot(a_bf, b_bf, preferred_element_type=jnp.float32)

    def layernorm(v, g, b):
        mu = jnp.mean(v, axis=-1, keepdims=True)
        var = jnp.mean((v - mu) ** 2, axis=-1, keepdims=True)
        return (v - mu) * jax.lax.rsqrt(var + LN_EPS) * g + b

    def srow(r, w):                # one f32 parameter row, shape (1, w)
        return smalls_ref[r:r + 1, :w]

    # Block-diagonal additive attention bias, built in-kernel from the key mask.
    # SEQ is a power of two -> "same phrase" == equal high bits of the position.
    hi = ~(SEQ - 1)
    qpos = jax.lax.broadcasted_iota(jnp.int32, (mc, mc), 0)
    kpos = jax.lax.broadcasted_iota(jnp.int32, (mc, mc), 1)
    same_phrase = (qpos & hi) == (kpos & hi)
    key_ok = mask_ref[...] > 0.5                                   # (1, mc)
    bias = jnp.where(same_phrase & key_ok, 0.0, -1e9)              # (mc, mc) f32

    # embedding LayerNorm
    x = layernorm(x_ref[...], srow(S_EMB_G, H), srow(S_EMB_B, H))  # (mc, H) f32

    for lyr in range(NLAYERS):         # unrolled (NLAYERS = 2)
        wb = lyr * WROWS_PER_LAYER
        sb = S_LAYER0 + lyr * S_PER_LAYER

        x_bf = x.astype(jnp.bfloat16)
        # fused QKV projection (Q columns pre-scaled by 1/sqrt(DHEAD) at init time)
        qkv = mm(x_bf, wblob_ref[wb + R_WQKV:wb + R_WQKV + H, :3 * H]) \
            + srow(sb + S_BQKV, 3 * H)                             # (mc, 3H) f32
        qkv_bf = qkv.astype(jnp.bfloat16)                          # cast once

        wo = wblob_ref[wb + R_WO:wb + R_WO + H, :H]                # (H, H) bf16
        attn = srow(sb + S_BO, H)                                  # starts as bo
        for h in range(NHEADS):        # unrolled (NHEADS = 4)
            q = qkv_bf[:, h * DHEAD:(h + 1) * DHEAD]
            k = qkv_bf[:, H + h * DHEAD:H + (h + 1) * DHEAD]
            v = qkv_bf[:, 2 * H + h * DHEAD:2 * H + (h + 1) * DHEAD]
            s = jax.lax.dot_general(q, k, (((1,), (1,)), ((), ())),
                                    preferred_element_type=jnp.float32) + bias
            s = s - jnp.max(s, axis=-1, keepdims=True)
            p = jnp.exp(s)
            p = p * pl.reciprocal(jnp.sum(p, axis=-1, keepdims=True), approx=True)
            head = mm(p.astype(jnp.bfloat16), v)                   # (mc, DHEAD) f32
            # per-head output projection: no lane-concat of the head outputs
            attn = attn + mm(head.astype(jnp.bfloat16),
                             wo[h * DHEAD:(h + 1) * DHEAD, :])
        x = layernorm(attn + x, srow(sb + S_LN1G, H), srow(sb + S_LN1B, H))

        x_bf = x.astype(jnp.bfloat16)
        hmid = _gelu(mm(x_bf, wblob_ref[wb + R_W1:wb + R_W1 + H, :F])
                     + srow(sb + S_B1, F))                         # (mc, F) f32
        ffn = mm(hmid.astype(jnp.bfloat16),
                 wblob_ref[wb + R_W2:wb + R_W2 + F, :H]) + srow(sb + S_B2, H)
        x = layernorm(ffn + x, srow(sb + S_LN2G, H), srow(sb + S_LN2B, H))

    # CLS-row selection as a 0/1 matmul built from iota (no strided row gather)
    ri = jax.lax.broadcasted_iota(jnp.int32, (bc, mc), 0)
    ci = jax.lax.broadcasted_iota(jnp.int32, (bc, mc), 1)
    sel = (ci == ri * SEQ).astype(jnp.bfloat16)                    # (bc, mc)
    cls = mm(sel, x.astype(jnp.bfloat16))                          # (bc, H) f32
    pooled = mm(cls.astype(jnp.bfloat16),
                wblob_ref[R_POOLW:R_POOLW + H, :H]) + srow(S_POOLB, H)
    out_ref[...] = jnp.tanh(pooled)


# ---------------- chunking policy ----------------
def _num_chunks(num_phrases, seq):
    """1 grid step on single-TC chips (v5e/v6e); 2 chunks on v7x (two TensorCores).
    Also caps phrases-per-program so the per-program [mc, mc] score/bias tiles stay
    ~1 MiB even if the sz=512 chunking path of the original module is exercised."""
    try:
        kind = jax.devices()[0].device_kind.lower()
    except Exception:
        kind = ""
    two_tc = ("v7" in kind) or ("7x" in kind)
    # TODO(synk): benchmark nc=1 vs nc=2 on v7x; plain "parallel" may not shard.
    nc = 2 if (two_tc and num_phrases % 2 == 0) else 1
    mc_cap = 512
    while num_phrases % nc != 0 or (num_phrases // nc) * seq > mc_cap:
        nc += 1
        if nc >= num_phrases:
            nc = num_phrases
            break
    return nc


# ---------------- wrapper: tiny BERT forward (pooler_output) ----------------
def bert_forward(params, ids, mask):
    B, S = ids.shape
    H = HIDDEN
    nc = _num_chunks(B, S)
    bc = B // nc
    mc = bc * S

    # embeddings (gather + add is plain-JAX glue)
    x = (params["word_emb"][ids]
         + params["pos_emb"][None, :S, :]
         + params["type_emb"][0][None, None, :]).astype(jnp.float32)
    x = x.reshape(nc, mc, H)
    key_mask = mask.astype(jnp.float32).reshape(nc, 1, mc)   # per-chunk key mask

    wblob, smalls = params["wblob"], params["smalls"]

    out = pl.pallas_call(
        _bert_kernel,
        out_shape=jax.ShapeDtypeStruct((nc, bc, H), jnp.float32),
        grid=(nc,),
        in_specs=[
            pl.BlockSpec((None, mc, H), lambda c: (c, 0, 0)),   # chunk activations
            pl.BlockSpec((None, 1, mc), lambda c: (c, 0, 0)),   # chunk key mask
            pl.BlockSpec(wblob.shape, lambda c: (0, 0)),        # bf16 weight blob
            pl.BlockSpec(smalls.shape, lambda c: (0, 0)),       # f32 bias/LN blob
        ],
        out_specs=pl.BlockSpec((None, bc, H), lambda c: (c, 0, 0)),
        compiler_params=pltpu.CompilerParams(dimension_semantics=("parallel",)),
    )(x, key_mask, wblob, smalls)

    return out.reshape(B, H)            # (B, H) == pooler_output


# ---------------- BertEmb.forward ----------------
def bert_emb_forward(params, all_ids, all_masks, batch):
    # torch.unique(return_inverse=True) with static output size (padded with 0).
    uniq_idx, reverse_idx = jnp.unique(
        batch, return_inverse=True, size=batch.shape[0], fill_value=0)
    # NOTE: the sz=512 chunking loop collapses to a single chunk at these sizes
    # (semantics identical: outputs are concatenated along dim 0 anyway).
    ids = all_ids[uniq_idx]
    mask = all_masks[uniq_idx]
    uniq_emb = bert_forward(params, ids, mask)
    return uniq_emb[reverse_idx]                       # (len(batch), HIDDEN)


# ---------------- deterministic parameter init (builds the coalesced blobs) -------
def init_params(key):
    def nrm(k, shape, scale=0.02):
        return scale * jax.random.normal(k, shape, dtype=jnp.float32)

    keys = iter(jax.random.split(key, 32))
    L, H, F = NLAYERS, HIDDEN, FFN
    attn_scale = 1.0 / math.sqrt(DHEAD)

    wblob = jnp.zeros((WROWS, W_LANES), jnp.float32)
    smalls = jnp.zeros((SROWS, W_LANES), jnp.float32)
    smalls = smalls.at[S_EMB_G, :H].set(1.0)            # embedding LN gamma

    for l in range(L):
        wb = l * WROWS_PER_LAYER
        sb = S_LAYER0 + l * S_PER_LAYER

        wqkv = nrm(next(keys), (H, 3 * H))
        wqkv = wqkv.at[:, :H].multiply(attn_scale)      # fold softmax scale into Q
        bqkv = nrm(next(keys), (3 * H,))
        bqkv = bqkv.at[:H].multiply(attn_scale)

        wblob = wblob.at[wb + R_WQKV:wb + R_WQKV + H, :3 * H].set(wqkv)
        wblob = wblob.at[wb + R_WO:wb + R_WO + H, :H].set(nrm(next(keys), (H, H)))
        wblob = wblob.at[wb + R_W1:wb + R_W1 + H, :F].set(nrm(next(keys), (H, F)))
        wblob = wblob.at[wb + R_W2:wb + R_W2 + F, :H].set(nrm(next(keys), (F, H)))

        smalls = smalls.at[sb + S_BQKV, :3 * H].set(bqkv)
        smalls = smalls.at[sb + S_BO, :H].set(nrm(next(keys), (H,)))
        smalls = smalls.at[sb + S_LN1G, :H].set(1.0)
        smalls = smalls.at[sb + S_B1, :F].set(nrm(next(keys), (F,)))
        smalls = smalls.at[sb + S_B2, :H].set(nrm(next(keys), (H,)))
        smalls = smalls.at[sb + S_LN2G, :H].set(1.0)

    wblob = wblob.at[R_POOLW:R_POOLW + H, :H].set(nrm(next(keys), (H, H)))
    smalls = smalls.at[S_POOLB, :H].set(nrm(next(keys), (H,)))

    return {
        "word_emb": nrm(next(keys), (VOCAB, H)),
        "pos_emb": nrm(next(keys), (SEQ, H)),
        "type_emb": nrm(next(keys), (2, H)),
        "wblob": wblob.astype(jnp.bfloat16),   # MXU-native matmul weights
        "smalls": smalls,                      # biases / LayerNorm params (f32)
    }


if __name__ == "__main__":
    root = jax.random.PRNGKey(0)
    k_par, k_ids, k_len, k_batch = jax.random.split(root, 4)

    params = init_params(k_par)

    # synthetic "tokenizer(phrases, padding=True)" buffers
    all_ids = jax.random.randint(k_ids, (NPHRASES, SEQ), 1, VOCAB, dtype=jnp.int32)
    lengths = jax.random.randint(k_len, (NPHRASES,), 3, SEQ + 1, dtype=jnp.int32)
    pos = jnp.arange(SEQ, dtype=jnp.int32)[None, :]
    all_masks = (pos < lengths[:, None]).astype(jnp.int32)
    all_ids = jnp.where(all_masks == 1, all_ids, 0)   # pad token = 0

    # batch of phrase indices (with duplicates, like the torch module expects)
    batch = jax.random.randint(k_batch, (8,), 0, NPHRASES, dtype=jnp.int32)

    out = bert_emb_forward(params, all_ids, all_masks, batch)
    out = jax.block_until_ready(out)

    assert out.shape == (batch.shape[0], HIDDEN)
    assert bool(jnp.all(jnp.isfinite(out)))
    # duplicated phrase indices must map to identical embeddings
    same = batch[:, None] == batch[None, :]
    diff = jnp.max(jnp.abs(out[:, None, :] - out[None, :, :]), axis=-1)
    assert bool(jnp.all(jnp.where(same, diff, 0.0) < 1e-6))
    print("KERNEL_OK")
</pallas_src>

<mosaic_0001>
module attributes {stable_mosaic.version = 11 : i64} {
  func.func @_bert_kernel(%arg0: i32, %arg1: memref<1x64x32xf32, #tpu.memory_space<vmem>>, %arg2: memref<1x1x64xf32, #tpu.memory_space<vmem>>, %arg3: memref<352x96xbf16, #tpu.memory_space<vmem>>, %arg4: memref<19x96xf32, #tpu.memory_space<vmem>>, %arg5: memref<1x8x32xf32, #tpu.memory_space<vmem>>) attributes {dimension_semantics = [#tpu.dimension_semantics<parallel>], iteration_bounds = array<i64: 1>, scalar_prefetch = 0 : i64, scratch_operands = 0 : i64, tpu.core_type = #tpu.core_type<tc>, window_params = [{transform_indices = @transform_0, window_bounds = array<i64: 1, 64, 32>}, {transform_indices = @transform_1, window_bounds = array<i64: 1, 1, 64>}, {pipeline_mode = #tpu.pipeline_mode<synchronous>, transform_indices = @transform_2, window_bounds = array<i64: 352, 96>}, {pipeline_mode = #tpu.pipeline_mode<synchronous>, transform_indices = @transform_3, window_bounds = array<i64: 19, 96>}, {transform_indices = @transform_4, window_bounds = array<i64: 1, 8, 32>}]} {
    %0 = tpu.iota {dimensions = array<i32: 0>} : vector<64x64xi32>
    %1 = tpu.iota {dimensions = array<i32: 1>} : vector<64x64xi32>
    %c-8_i32 = arith.constant -8 : i32
    %2 = vector.broadcast %c-8_i32 : i32 to vector<64x64xi32>
    %3 = arith.andi %0, %2 : vector<64x64xi32>
    %c-8_i32_0 = arith.constant -8 : i32
    %4 = vector.broadcast %c-8_i32_0 : i32 to vector<64x64xi32>
    %5 = arith.andi %1, %4 : vector<64x64xi32>
    %6 = arith.cmpi eq, %3, %5 : vector<64x64xi32>
    %c0 = arith.constant 0 : index
    %c0_1 = arith.constant 0 : index
    %c0_2 = arith.constant 0 : index
    %7 = vector.load %arg2[%c0, %c0_1, %c0_2] : memref<1x1x64xf32, #tpu.memory_space<vmem>>, vector<1x1x64xf32>
    %8 = vector.shape_cast %7 : vector<1x1x64xf32> to vector<1x64xf32>
    %cst = arith.constant 5.000000e-01 : f32
    %9 = vector.broadcast %cst : f32 to vector<1x64xf32>
    %10 = arith.cmpf ogt, %8, %9 : vector<1x64xf32>
    %11 = vector.broadcast %10 : vector<1x64xi1> to vector<64x64xi1>
    %12 = arith.andi %6, %11 : vector<64x64xi1>
    %cst_3 = arith.constant 0.000000e+00 : f32
    %cst_4 = arith.constant -1.000000e+09 : f32
    %13 = vector.broadcast %cst_3 : f32 to vector<64x64xf32>
    %14 = vector.broadcast %cst_4 : f32 to vector<64x64xf32>
    %15 = arith.select %12, %13, %14 : vector<64x64xi1>, vector<64x64xf32>
    %c0_5 = arith.constant 0 : index
    %c0_6 = arith.constant 0 : index
    %c0_7 = arith.constant 0 : index
    %16 = vector.load %arg1[%c0_5, %c0_6, %c0_7] : memref<1x64x32xf32, #tpu.memory_space<vmem>>, vector<1x64x32xf32>
    %17 = vector.shape_cast %16 : vector<1x64x32xf32> to vector<64x32xf32>
    %c0_8 = arith.constant 0 : index
    %c0_9 = arith.constant 0 : index
    %18 = vector.load %arg4[%c0_8, %c0_9] : memref<19x96xf32, #tpu.memory_space<vmem>>, vector<1x32xf32>
    %c1 = arith.constant 1 : index
    %c0_10 = arith.constant 0 : index
    %19 = vector.load %arg4[%c1, %c0_10] : memref<19x96xf32, #tpu.memory_space<vmem>>, vector<1x32xf32>
    %cst_11 = arith.constant dense<0.000000e+00> : vector<64xf32>
    %20 = vector.multi_reduction <add>, %17, %cst_11 [1] : vector<64x32xf32> to vector<64xf32>
    %21 = vector.shape_cast %20 : vector<64xf32> to vector<64x1xf32>
    %cst_12 = arith.constant 3.200000e+01 : f32
    %22 = vector.broadcast %cst_12 : f32 to vector<64x1xf32>
    %23 = arith.divf %21, %22 : vector<64x1xf32>
    %24 = vector.broadcast %23 : vector<64x1xf32> to vector<64x32xf32>
    %25 = arith.subf %17, %24 : vector<64x32xf32>
    %26 = arith.mulf %25, %25 : vector<64x32xf32>
    %cst_13 = arith.constant dense<0.000000e+00> : vector<64xf32>
    %27 = vector.multi_reduction <add>, %26, %cst_13 [1] : vector<64x32xf32> to vector<64xf32>
    %28 = vector.shape_cast %27 : vector<64xf32> to vector<64x1xf32>
    %cst_14 = arith.constant 3.200000e+01 : f32
    %29 = vector.broadcast %cst_14 : f32 to vector<64x1xf32>
    %30 = arith.divf %28, %29 : vector<64x1xf32>
    %31 = vector.broadcast %23 : vector<64x1xf32> to vector<64x32xf32>
    %32 = arith.subf %17, %31 : vector<64x32xf32>
    %cst_15 = arith.constant 9.99999996E-13 : f32
    %33 = vector.broadcast %cst_15 : f32 to vector<64x1xf32>
    %34 = arith.addf %30, %33 : vector<64x1xf32>
    %35 = math.rsqrt %34 : vector<64x1xf32>
    %36 = vector.broadcast %35 : vector<64x1xf32> to vector<64x32xf32>
    %37 = arith.mulf %32, %36 : vector<64x32xf32>
    %38 = vector.broadcast %18 : vector<1x32xf32> to vector<64x32xf32>
    %39 = arith.mulf %37, %38 : vector<64x32xf32>
    %40 = vector.broadcast %19 : vector<1x32xf32> to vector<64x32xf32>
    %41 = arith.addf %39, %40 : vector<64x32xf32>
    %42 = arith.truncf %41 : vector<64x32xf32> to vector<64x32xbf16>
    %c0_16 = arith.constant 0 : index
    %c0_17 = arith.constant 0 : index
    %43 = vector.load %arg3[%c0_16, %c0_17] : memref<352x96xbf16, #tpu.memory_space<vmem>>, vector<32x96xbf16>
    %cst_18 = arith.constant dense<0.000000e+00> : vector<64x96xf32>
    %44 = tpu.matmul %42, %43, %cst_18 {dimension_numbers = #tpu.dot_dimension_numbers<[1], [0], [0], [1], [0, 0, 1, 1], [], []>} : vector<64x32xbf16>, vector<32x96xbf16>, vector<64x96xf32> -> vector<64x96xf32>
    %c2 = arith.constant 2 : index
    %c0_19 = arith.constant 0 : index
    %45 = vector.load %arg4[%c2, %c0_19] : memref<19x96xf32, #tpu.memory_space<vmem>>, vector<1x96xf32>
    %46 = vector.broadcast %45 : vector<1x96xf32> to vector<64x96xf32>
    %47 = arith.addf %44, %46 : vector<64x96xf32>
    %48 = arith.truncf %47 : vector<64x96xf32> to vector<64x96xbf16>
    %c32 = arith.constant 32 : index
    %c0_20 = arith.constant 0 : index
    %49 = vector.load %arg3[%c32, %c0_20] : memref<352x96xbf16, #tpu.memory_space<vmem>>, vector<32x32xbf16>
    %c3 = arith.constant 3 : index
    %c0_21 = arith.constant 0 : index
    %50 = vector.load %arg4[%c3, %c0_21] : memref<19x96xf32, #tpu.memory_space<vmem>>, vector<1x32xf32>
    %51 = vector.extract_strided_slice %48 {offsets = [0, 0], sizes = [64, 8], strides = [1, 1]} : vector<64x96xbf16> to vector<64x8xbf16>
    %52 = vector.extract_strided_slice %48 {offsets = [0, 32], sizes = [64, 8], strides = [1, 1]} : vector<64x96xbf16> to vector<64x8xbf16>
    %53 = vector.extract_strided_slice %48 {offsets = [0, 64], sizes = [64, 8], strides = [1, 1]} : vector<64x96xbf16> to vector<64x8xbf16>
    %cst_22 = arith.constant dense<0.000000e+00> : vector<64x64xf32>
    %54 = tpu.matmul %51, %52, %cst_22 {dimension_numbers = #tpu.dot_dimension_numbers<[1], [1], [0], [0], [0, 0, 1, 0], [], []>} : vector<64x8xbf16>, vector<64x8xbf16>, vector<64x64xf32> -> vector<64x64xf32>
    %55 = arith.addf %54, %15 : vector<64x64xf32>
    %cst_23 = arith.constant dense<0xFF800000> : vector<64xf32>
    %56 = vector.multi_reduction <maximumf>, %55, %cst_23 [1] : vector<64x64xf32> to vector<64xf32>
    %57 = vector.shape_cast %56 : vector<64xf32> to vector<64x1xf32>
    %58 = vector.broadcast %57 : vector<64x1xf32> to vector<64x64xf32>
    %59 = arith.subf %55, %58 : vector<64x64xf32>
    %60 = math.exp %59 : vector<64x64xf32>
    %cst_24 = arith.constant dense<0.000000e+00> : vector<64xf32>
    %61 = vector.multi_reduction <add>, %60, %cst_24 [1] : vector<64x64xf32> to vector<64xf32>
    %62 = vector.shape_cast %61 : vector<64xf32> to vector<64x1xf32>
    %63 = tpu.reciprocal %62 {approx = true} : vector<64x1xf32> -> vector<64x1xf32>
    %64 = vector.broadcast %63 : vector<64x1xf32> to vector<64x64xf32>
    %65 = arith.mulf %60, %64 : vector<64x64xf32>
    %66 = arith.truncf %65 : vector<64x64xf32> to vector<64x64xbf16>
    %cst_25 = arith.constant dense<0.000000e+00> : vector<64x8xf32>
    %67 = tpu.matmul %66, %53, %cst_25 {dimension_numbers = #tpu.dot_dimension_numbers<[1], [0], [0], [1], [0, 0, 1, 1], [], []>} : vector<64x64xbf16>, vector<64x8xbf16>, vector<64x8xf32> -> vector<64x8xf32>
    %68 = arith.truncf %67 : vector<64x8xf32> to vector<64x8xbf16>
    %69 = vector.extract_strided_slice %49 {offsets = [0, 0], sizes = [8, 32], strides = [1, 1]} : vector<32x32xbf16> to vector<8x32xbf16>
    %cst_26 = arith.constant dense<0.000000e+00> : vector<64x32xf32>
    %70 = tpu.matmul %68, %69, %cst_26 {dimension_numbers = #tpu.dot_dimension_numbers<[1], [0], [0], [1], [0, 0, 1, 1], [], []>} : vector<64x8xbf16>, vector<8x32xbf16>, vector<64x32xf32> -> vector<64x32xf32>
    %71 = vector.broadcast %50 : vector<1x32xf32> to vector<64x32xf32>
    %72 = arith.addf %71, %70 : vector<64x32xf32>
    %73 = vector.extract_strided_slice %48 {offsets = [0, 8], sizes = [64, 8], strides = [1, 1]} : vector<64x96xbf16> to vector<64x8xbf16>
    %74 = vector.extract_strided_slice %48 {offsets = [0, 40], sizes = [64, 8], strides = [1, 1]} : vector<64x96xbf16> to vector<64x8xbf16>
    %75 = vector.extract_strided_slice %48 {offsets = [0, 72], sizes = [64, 8], strides = [1, 1]} : vector<64x96xbf16> to vector<64x8xbf16>
    %cst_27 = arith.constant dense<0.000000e+00> : vector<64x64xf32>
    %76 = tpu.matmul %73, %74, %cst_27 {dimension_numbers = #tpu.dot_dimension_numbers<[1], [1], [0], [0], [0, 0, 1, 0], [], []>} : vector<64x8xbf16>, vector<64x8xbf16>, vector<64x64xf32> -> vector<64x64xf32>
    %77 = arith.addf %76, %15 : vector<64x64xf32>
    %cst_28 = arith.constant dense<0xFF800000> : vector<64xf32>
    %78 = vector.multi_reduction <maximumf>, %77, %cst_28 [1] : vector<64x64xf32> to vector<64xf32>
    %79 = vector.shape_cast %78 : vector<64xf32> to vector<64x1xf32>
    %80 = vector.broadcast %79 : vector<64x1xf32> to vector<64x64xf32>
    %81 = arith.subf %77, %80 : vector<64x64xf32>
    %82 = math.exp %81 : vector<64x64xf32>
    %cst_29 = arith.constant dense<0.000000e+00> : vector<64xf32>
    %83 = vector.multi_reduction <add>, %82, %cst_29 [1] : vector<64x64xf32> to vector<64xf32>
    %84 = vector.shape_cast %83 : vector<64xf32> to vector<64x1xf32>
    %85 = tpu.reciprocal %84 {approx = true} : vector<64x1xf32> -> vector<64x1xf32>
    %86 = vector.broadcast %85 : vector<64x1xf32> to vector<64x64xf32>
    %87 = arith.mulf %82, %86 : vector<64x64xf32>
    %88 = arith.truncf %87 : vector<64x64xf32> to vector<64x64xbf16>
    %cst_30 = arith.constant dense<0.000000e+00> : vector<64x8xf32>
    %89 = tpu.matmul %88, %75, %cst_30 {dimension_numbers = #tpu.dot_dimension_numbers<[1], [0], [0], [1], [0, 0, 1, 1], [], []>} : vector<64x64xbf16>, vector<64x8xbf16>, vector<64x8xf32> -> vector<64x8xf32>
    %90 = arith.truncf %89 : vector<64x8xf32> to vector<64x8xbf16>
    %91 = vector.extract_strided_slice %49 {offsets = [8, 0], sizes = [8, 32], strides = [1, 1]} : vector<32x32xbf16> to vector<8x32xbf16>
    %cst_31 = arith.constant dense<0.000000e+00> : vector<64x32xf32>
    %92 = tpu.matmul %90, %91, %cst_31 {dimension_numbers = #tpu.dot_dimension_numbers<[1], [0], [0], [1], [0, 0, 1, 1], [], []>} : vector<64x8xbf16>, vector<8x32xbf16>, vector<64x32xf32> -> vector<64x32xf32>
    %93 = arith.addf %72, %92 : vector<64x32xf32>
    %94 = vector.extract_strided_slice %48 {offsets = [0, 16], sizes = [64, 8], strides = [1, 1]} : vector<64x96xbf16> to vector<64x8xbf16>
    %95 = vector.extract_strided_slice %48 {offsets = [0, 48], sizes = [64, 8], strides = [1, 1]} : vector<64x96xbf16> to vector<64x8xbf16>
    %96 = vector.extract_strided_slice %48 {offsets = [0, 80], sizes = [64, 8], strides = [1, 1]} : vector<64x96xbf16> to vector<64x8xbf16>
    %cst_32 = arith.constant dense<0.000000e+00> : vector<64x64xf32>
    %97 = tpu.matmul %94, %95, %cst_32 {dimension_numbers = #tpu.dot_dimension_numbers<[1], [1], [0], [0], [0, 0, 1, 0], [], []>} : vector<64x8xbf16>, vector<64x8xbf16>, vector<64x64xf32> -> vector<64x64xf32>
    %98 = arith.addf %97, %15 : vector<64x64xf32>
    %cst_33 = arith.constant dense<0xFF800000> : vector<64xf32>
    %99 = vector.multi_reduction <maximumf>, %98, %cst_33 [1] : vector<64x64xf32> to vector<64xf32>
    %100 = vector.shape_cast %99 : vector<64xf32> to vector<64x1xf32>
    %101 = vector.broadcast %100 : vector<64x1xf32> to vector<64x64xf32>
    %102 = arith.subf %98, %101 : vector<64x64xf32>
    %103 = math.exp %102 : vector<64x64xf32>
    %cst_34 = arith.constant dense<0.000000e+00> : vector<64xf32>
    %104 = vector.multi_reduction <add>, %103, %cst_34 [1] : vector<64x64xf32> to vector<64xf32>
    %105 = vector.shape_cast %104 : vector<64xf32> to vector<64x1xf32>
    %106 = tpu.reciprocal %105 {approx = true} : vector<64x1xf32> -> vector<64x1xf32>
    %107 = vector.broadcast %106 : vector<64x1xf32> to vector<64x64xf32>
    %108 = arith.mulf %103, %107 : vector<64x64xf32>
    %109 = arith.truncf %108 : vector<64x64xf32> to vector<64x64xbf16>
    %cst_35 = arith.constant dense<0.000000e+00> : vector<64x8xf32>
    %110 = tpu.matmul %109, %96, %cst_35 {dimension_numbers = #tpu.dot_dimension_numbers<[1], [0], [0], [1], [0, 0, 1, 1], [], []>} : vector<64x64xbf16>, vector<64x8xbf16>, vector<64x8xf32> -> vector<64x8xf32>
    %111 = arith.truncf %110 : vector<64x8xf32> to vector<64x8xbf16>
    %112 = vector.extract_strided_slice %49 {offsets = [16, 0], sizes = [8, 32], strides = [1, 1]} : vector<32x32xbf16> to vector<8x32xbf16>
    %cst_36 = arith.constant dense<0.000000e+00> : vector<64x32xf32>
    %113 = tpu.matmul %111, %112, %cst_36 {dimension_numbers = #tpu.dot_dimension_numbers<[1], [0], [0], [1], [0, 0, 1, 1], [], []>} : vector<64x8xbf16>, vector<8x32xbf16>, vector<64x32xf32> -> vector<64x32xf32>
    %114 = arith.addf %93, %113 : vector<64x32xf32>
    %115 = vector.extract_strided_slice %48 {offsets = [0, 24], sizes = [64, 8], strides = [1, 1]} : vector<64x96xbf16> to vector<64x8xbf16>
    %116 = vector.extract_strided_slice %48 {offsets = [0, 56], sizes = [64, 8], strides = [1, 1]} : vector<64x96xbf16> to vector<64x8xbf16>
    %117 = vector.extract_strided_slice %48 {offsets = [0, 88], sizes = [64, 8], strides = [1, 1]} : vector<64x96xbf16> to vector<64x8xbf16>
    %cst_37 = arith.constant dense<0.000000e+00> : vector<64x64xf32>
    %118 = tpu.matmul %115, %116, %cst_37 {dimension_numbers = #tpu.dot_dimension_numbers<[1], [1], [0], [0], [0, 0, 1, 0], [], []>} : vector<64x8xbf16>, vector<64x8xbf16>, vector<64x64xf32> -> vector<64x64xf32>
    %119 = arith.addf %118, %15 : vector<64x64xf32>
    %cst_38 = arith.constant dense<0xFF800000> : vector<64xf32>
    %120 = vector.multi_reduction <maximumf>, %119, %cst_38 [1] : vector<64x64xf32> to vector<64xf32>
    %121 = vector.shape_cast %120 : vector<64xf32> to vector<64x1xf32>
    %122 = vector.broadcast %121 : vector<64x1xf32> to vector<64x64xf32>
    %123 = arith.subf %119, %122 : vector<64x64xf32>
    %124 = math.exp %123 : vector<64x64xf32>
    %cst_39 = arith.constant dense<0.000000e+00> : vector<64xf32>
    %125 = vector.multi_reduction <add>, %124, %cst_39 [1] : vector<64x64xf32> to vector<64xf32>
    %126 = vector.shape_cast %125 : vector<64xf32> to vector<64x1xf32>
    %127 = tpu.reciprocal %126 {approx = true} : vector<64x1xf32> -> vector<64x1xf32>
    %128 = vector.broadcast %127 : vector<64x1xf32> to vector<64x64xf32>
    %129 = arith.mulf %124, %128 : vector<64x64xf32>
    %130 = arith.truncf %129 : vector<64x64xf32> to vector<64x64xbf16>
    %cst_40 = arith.constant dense<0.000000e+00> : vector<64x8xf32>
    %131 = tpu.matmul %130, %117, %cst_40 {dimension_numbers = #tpu.dot_dimension_numbers<[1], [0], [0], [1], [0, 0, 1, 1], [], []>} : vector<64x64xbf16>, vector<64x8xbf16>, vector<64x8xf32> -> vector<64x8xf32>
    %132 = arith.truncf %131 : vector<64x8xf32> to vector<64x8xbf16>
    %133 = vector.extract_strided_slice %49 {offsets = [24, 0], sizes = [8, 32], strides = [1, 1]} : vector<32x32xbf16> to vector<8x32xbf16>
    %cst_41 = arith.constant dense<0.000000e+00> : vector<64x32xf32>
    %134 = tpu.matmul %132, %133, %cst_41 {dimension_numbers = #tpu.dot_dimension_numbers<[1], [0], [0], [1], [0, 0, 1, 1], [], []>} : vector<64x8xbf16>, vector<8x32xbf16>, vector<64x32xf32> -> vector<64x32xf32>
    %135 = arith.addf %114, %134 : vector<64x32xf32>
    %136 = arith.addf %135, %41 : vector<64x32xf32>
    %c4 = arith.constant 4 : index
    %c0_42 = arith.constant 0 : index
    %137 = vector.load %arg4[%c4, %c0_42] : memref<19x96xf32, #tpu.memory_space<vmem>>, vector<1x32xf32>
    %c5 = arith.constant 5 : index
    %c0_43 = arith.constant 0 : index
    %138 = vector.load %arg4[%c5, %c0_43] : memref<19x96xf32, #tpu.memory_space<vmem>>, vector<1x32xf32>
    %cst_44 = arith.constant dense<0.000000e+00> : vector<64xf32>
    %139 = vector.multi_reduction <add>, %136, %cst_44 [1] : vector<64x32xf32> to vector<64xf32>
    %140 = vector.shape_cast %139 : vector<64xf32> to vector<64x1xf32>
    %cst_45 = arith.constant 3.200000e+01 : f32
    %141 = vector.broadcast %cst_45 : f32 to vector<64x1xf32>
    %142 = arith.divf %140, %141 : vector<64x1xf32>
    %143 = vector.broadcast %142 : vector<64x1xf32> to vector<64x32xf32>
    %144 = arith.subf %136, %143 : vector<64x32xf32>
    %145 = arith.mulf %144, %144 : vector<64x32xf32>
    %cst_46 = arith.constant dense<0.000000e+00> : vector<64xf32>
    %146 = vector.multi_reduction <add>, %145, %cst_46 [1] : vector<64x32xf32> to vector<64xf32>
    %147 = vector.shape_cast %146 : vector<64xf32> to vector<64x1xf32>
    %cst_47 = arith.constant 3.200000e+01 : f32
    %148 = vector.broadcast %cst_47 : f32 to vector<64x1xf32>
    %149 = arith.divf %147, %148 : vector<64x1xf32>
    %150 = vector.broadcast %142 : vector<64x1xf32> to vector<64x32xf32>
    %151 = arith.subf %136, %150 : vector<64x32xf32>
    %cst_48 = arith.constant 9.99999996E-13 : f32
    %152 = vector.broadcast %cst_48 : f32 to vector<64x1xf32>
    %153 = arith.addf %149, %152 : vector<64x1xf32>
    %154 = math.rsqrt %153 : vector<64x1xf32>
    %155 = vector.broadcast %154 : vector<64x1xf32> to vector<64x32xf32>
    %156 = arith.mulf %151, %155 : vector<64x32xf32>
    %157 = vector.broadcast %137 : vector<1x32xf32> to vector<64x32xf32>
    %158 = arith.mulf %156, %157 : vector<64x32xf32>
    %159 = vector.broadcast %138 : vector<1x32xf32> to vector<64x32xf32>
    %160 = arith.addf %158, %159 : vector<64x32xf32>
    %161 = arith.truncf %160 : vector<64x32xf32> to vector<64x32xbf16>
    %c64 = arith.constant 64 : index
    %c0_49 = arith.constant 0 : index
    %162 = vector.load %arg3[%c64, %c0_49] : memref<352x96xbf16, #tpu.memory_space<vmem>>, vector<32x64xbf16>
    %cst_50 = arith.constant dense<0.000000e+00> : vector<64x64xf32>
    %163 = tpu.matmul %161, %162, %cst_50 {dimension_numbers = #tpu.dot_dimension_numbers<[1], [0], [0], [1], [0, 0, 1, 1], [], []>} : vector<64x32xbf16>, vector<32x64xbf16>, vector<64x64xf32> -> vector<64x64xf32>
    %c6 = arith.constant 6 : index
    %c0_51 = arith.constant 0 : index
    %164 = vector.load %arg4[%c6, %c0_51] : memref<19x96xf32, #tpu.memory_space<vmem>>, vector<1x64xf32>
    %165 = vector.broadcast %164 : vector<1x64xf32> to vector<64x64xf32>
    %166 = arith.addf %163, %165 : vector<64x64xf32>
    %cst_52 = arith.constant 5.000000e-01 : f32
    %167 = vector.broadcast %cst_52 : f32 to vector<64x64xf32>
    %168 = arith.mulf %167, %166 : vector<64x64xf32>
    %cst_53 = arith.constant 4.471500e-02 : f32
    %169 = vector.broadcast %cst_53 : f32 to vector<64x64xf32>
    %170 = arith.mulf %169, %166 : vector<64x64xf32>
    %171 = arith.mulf %170, %166 : vector<64x64xf32>
    %172 = arith.mulf %171, %166 : vector<64x64xf32>
    %173 = arith.addf %166, %172 : vector<64x64xf32>
    %cst_54 = arith.constant 0.797884583 : f32
    %174 = vector.broadcast %cst_54 : f32 to vector<64x64xf32>
    %175 = arith.mulf %174, %173 : vector<64x64xf32>
    %176 = math.tanh %175 : vector<64x64xf32>
    %cst_55 = arith.constant 1.000000e+00 : f32
    %177 = vector.broadcast %cst_55 : f32 to vector<64x64xf32>
    %178 = arith.addf %177, %176 : vector<64x64xf32>
    %179 = arith.mulf %168, %178 : vector<64x64xf32>
    %180 = arith.truncf %179 : vector<64x64xf32> to vector<64x64xbf16>
    %c96 = arith.constant 96 : index
    %c0_56 = arith.constant 0 : index
    %181 = vector.load %arg3[%c96, %c0_56] : memref<352x96xbf16, #tpu.memory_space<vmem>>, vector<64x32xbf16>
    %cst_57 = arith.constant dense<0.000000e+00> : vector<64x32xf32>
    %182 = tpu.matmul %180, %181, %cst_57 {dimension_numbers = #tpu.dot_dimension_numbers<[1], [0], [0], [1], [0, 0, 1, 1], [], []>} : vector<64x64xbf16>, vector<64x32xbf16>, vector<64x32xf32> -> vector<64x32xf32>
    %c7 = arith.constant 7 : index
    %c0_58 = arith.constant 0 : index
    %183 = vector.load %arg4[%c7, %c0_58] : memref<19x96xf32, #tpu.memory_space<vmem>>, vector<1x32xf32>
    %184 = vector.broadcast %183 : vector<1x32xf32> to vector<64x32xf32>
    %185 = arith.addf %182, %184 : vector<64x32xf32>
    %186 = arith.addf %185, %160 : vector<64x32xf32>
    %c8 = arith.constant 8 : index
    %c0_59 = arith.constant 0 : index
    %187 = vector.load %arg4[%c8, %c0_59] : memref<19x96xf32, #tpu.memory_space<vmem>>, vector<1x32xf32>
    %c9 = arith.constant 9 : index
    %c0_60 = arith.constant 0 : index
    %188 = vector.load %arg4[%c9, %c0_60] : memref<19x96xf32, #tpu.memory_space<vmem>>, vector<1x32xf32>
    %cst_61 = arith.constant dense<0.000000e+00> : vector<64xf32>
    %189 = vector.multi_reduction <add>, %186, %cst_61 [1] : vector<64x32xf32> to vector<64xf32>
    %190 = vector.shape_cast %189 : vector<64xf32> to vector<64x1xf32>
    %cst_62 = arith.constant 3.200000e+01 : f32
    %191 = vector.broadcast %cst_62 : f32 to vector<64x1xf32>
    %192 = arith.divf %190, %191 : vector<64x1xf32>
    %193 = vector.broadcast %192 : vector<64x1xf32> to vector<64x32xf32>
    %194 = arith.subf %186, %193 : vector<64x32xf32>
    %195 = arith.mulf %194, %194 : vector<64x32xf32>
    %cst_63 = arith.constant dense<0.000000e+00> : vector<64xf32>
    %196 = vector.multi_reduction <add>, %195, %cst_63 [1] : vector<64x32xf32> to vector<64xf32>
    %197 = vector.shape_cast %196 : vector<64xf32> to vector<64x1xf32>
    %cst_64 = arith.constant 3.200000e+01 : f32
    %198 = vector.broadcast %cst_64 : f32 to vector<64x1xf32>
    %199 = arith.divf %197, %198 : vector<64x1xf32>
    %200 = vector.broadcast %192 : vector<64x1xf32> to vector<64x32xf32>
    %201 = arith.subf %186, %200 : vector<64x32xf32>
    %cst_65 = arith.constant 9.99999996E-13 : f32
    %202 = vector.broadcast %cst_65 : f32 to vector<64x1xf32>
    %203 = arith.addf %199, %202 : vector<64x1xf32>
    %204 = math.rsqrt %203 : vector<64x1xf32>
    %205 = vector.broadcast %204 : vector<64x1xf32> to vector<64x32xf32>
    %206 = arith.mulf %201, %205 : vector<64x32xf32>
    %207 = vector.broadcast %187 : vector<1x32xf32> to vector<64x32xf32>
    %208 = arith.mulf %206, %207 : vector<64x32xf32>
    %209 = vector.broadcast %188 : vector<1x32xf32> to vector<64x32xf32>
    %210 = arith.addf %208, %209 : vector<64x32xf32>
    %211 = arith.truncf %210 : vector<64x32xf32> to vector<64x32xbf16>
    %c160 = arith.constant 160 : index
    %c0_66 = arith.constant 0 : index
    %212 = vector.load %arg3[%c160, %c0_66] : memref<352x96xbf16, #tpu.memory_space<vmem>>, vector<32x96xbf16>
    %cst_67 = arith.constant dense<0.000000e+00> : vector<64x96xf32>
    %213 = tpu.matmul %211, %212, %cst_67 {dimension_numbers = #tpu.dot_dimension_numbers<[1], [0], [0], [1], [0, 0, 1, 1], [], []>} : vector<64x32xbf16>, vector<32x96xbf16>, vector<64x96xf32> -> vector<64x96xf32>
    %c10 = arith.constant 10 : index
    %c0_68 = arith.constant 0 : index
    %214 = vector.load %arg4[%c10, %c0_68] : memref<19x96xf32, #tpu.memory_space<vmem>>, vector<1x96xf32>
    %215 = vector.broadcast %214 : vector<1x96xf32> to vector<64x96xf32>
    %216 = arith.addf %213, %215 : vector<64x96xf32>
    %217 = arith.truncf %216 : vector<64x96xf32> to vector<64x96xbf16>
    %c192 = arith.constant 192 : index
    %c0_69 = arith.constant 0 : index
    %218 = vector.load %arg3[%c192, %c0_69] : memref<352x96xbf16, #tpu.memory_space<vmem>>, vector<32x32xbf16>
    %c11 = arith.constant 11 : index
    %c0_70 = arith.constant 0 : index
    %219 = vector.load %arg4[%c11, %c0_70] : memref<19x96xf32, #tpu.memory_space<vmem>>, vector<1x32xf32>
    %220 = vector.extract_strided_slice %217 {offsets = [0, 0], sizes = [64, 8], strides = [1, 1]} : vector<64x96xbf16> to vector<64x8xbf16>
    %221 = vector.extract_strided_slice %217 {offsets = [0, 32], sizes = [64, 8], strides = [1, 1]} : vector<64x96xbf16> to vector<64x8xbf16>
    %222 = vector.extract_strided_slice %217 {offsets = [0, 64], sizes = [64, 8], strides = [1, 1]} : vector<64x96xbf16> to vector<64x8xbf16>
    %cst_71 = arith.constant dense<0.000000e+00> : vector<64x64xf32>
    %223 = tpu.matmul %220, %221, %cst_71 {dimension_numbers = #tpu.dot_dimension_numbers<[1], [1], [0], [0], [0, 0, 1, 0], [], []>} : vector<64x8xbf16>, vector<64x8xbf16>, vector<64x64xf32> -> vector<64x64xf32>
    %224 = arith.addf %223, %15 : vector<64x64xf32>
    %cst_72 = arith.constant dense<0xFF800000> : vector<64xf32>
    %225 = vector.multi_reduction <maximumf>, %224, %cst_72 [1] : vector<64x64xf32> to vector<64xf32>
    %226 = vector.shape_cast %225 : vector<64xf32> to vector<64x1xf32>
    %227 = vector.broadcast %226 : vector<64x1xf32> to vector<64x64xf32>
    %228 = arith.subf %224, %227 : vector<64x64xf32>
    %229 = math.exp %228 : vector<64x64xf32>
    %cst_73 = arith.constant dense<0.000000e+00> : vector<64xf32>
    %230 = vector.multi_reduction <add>, %229, %cst_73 [1] : vector<64x64xf32> to vector<64xf32>
    %231 = vector.shape_cast %230 : vector<64xf32> to vector<64x1xf32>
    %232 = tpu.reciprocal %231 {approx = true} : vector<64x1xf32> -> vector<64x1xf32>
    %233 = vector.broadcast %232 : vector<64x1xf32> to vector<64x64xf32>
    %234 = arith.mulf %229, %233 : vector<64x64xf32>
    %235 = arith.truncf %234 : vector<64x64xf32> to vector<64x64xbf16>
    %cst_74 = arith.constant dense<0.000000e+00> : vector<64x8xf32>
    %236 = tpu.matmul %235, %222, %cst_74 {dimension_numbers = #tpu.dot_dimension_numbers<[1], [0], [0], [1], [0, 0, 1, 1], [], []>} : vector<64x64xbf16>, vector<64x8xbf16>, vector<64x8xf32> -> vector<64x8xf32>
    %237 = arith.truncf %236 : vector<64x8xf32> to vector<64x8xbf16>
    %238 = vector.extract_strided_slice %218 {offsets = [0, 0], sizes = [8, 32], strides = [1, 1]} : vector<32x32xbf16> to vector<8x32xbf16>
    %cst_75 = arith.constant dense<0.000000e+00> : vector<64x32xf32>
    %239 = tpu.matmul %237, %238, %cst_75 {dimension_numbers = #tpu.dot_dimension_numbers<[1], [0], [0], [1], [0, 0, 1, 1], [], []>} : vector<64x8xbf16>, vector<8x32xbf16>, vector<64x32xf32> -> vector<64x32xf32>
    %240 = vector.broadcast %219 : vector<1x32xf32> to vector<64x32xf32>
    %241 = arith.addf %240, %239 : vector<64x32xf32>
    %242 = vector.extract_strided_slice %217 {offsets = [0, 8], sizes = [64, 8], strides = [1, 1]} : vector<64x96xbf16> to vector<64x8xbf16>
    %243 = vector.extract_strided_slice %217 {offsets = [0, 40], sizes = [64, 8], strides = [1, 1]} : vector<64x96xbf16> to vector<64x8xbf16>
    %244 = vector.extract_strided_slice %217 {offsets = [0, 72], sizes = [64, 8], strides = [1, 1]} : vector<64x96xbf16> to vector<64x8xbf16>
    %cst_76 = arith.constant dense<0.000000e+00> : vector<64x64xf32>
    %245 = tpu.matmul %242, %243, %cst_76 {dimension_numbers = #tpu.dot_dimension_numbers<[1], [1], [0], [0], [0, 0, 1, 0], [], []>} : vector<64x8xbf16>, vector<64x8xbf16>, vector<64x64xf32> -> vector<64x64xf32>
    %246 = arith.addf %245, %15 : vector<64x64xf32>
    %cst_77 = arith.constant dense<0xFF800000> : vector<64xf32>
    %247 = vector.multi_reduction <maximumf>, %246, %cst_77 [1] : vector<64x64xf32> to vector<64xf32>
    %248 = vector.shape_cast %247 : vector<64xf32> to vector<64x1xf32>
    %249 = vector.broadcast %248 : vector<64x1xf32> to vector<64x64xf32>
    %250 = arith.subf %246, %249 : vector<64x64xf32>
    %251 = math.exp %250 : vector<64x64xf32>
    %cst_78 = arith.constant dense<0.000000e+00> : vector<64xf32>
    %252 = vector.multi_reduction <add>, %251, %cst_78 [1] : vector<64x64xf32> to vector<64xf32>
    %253 = vector.shape_cast %252 : vector<64xf32> to vector<64x1xf32>
    %254 = tpu.reciprocal %253 {approx = true} : vector<64x1xf32> -> vector<64x1xf32>
    %255 = vector.broadcast %254 : vector<64x1xf32> to vector<64x64xf32>
    %256 = arith.mulf %251, %255 : vector<64x64xf32>
    %257 = arith.truncf %256 : vector<64x64xf32> to vector<64x64xbf16>
    %cst_79 = arith.constant dense<0.000000e+00> : vector<64x8xf32>
    %258 = tpu.matmul %257, %244, %cst_79 {dimension_numbers = #tpu.dot_dimension_numbers<[1], [0], [0], [1], [0, 0, 1, 1], [], []>} : vector<64x64xbf16>, vector<64x8xbf16>, vector<64x8xf32> -> vector<64x8xf32>
    %259 = arith.truncf %258 : vector<64x8xf32> to vector<64x8xbf16>
    %260 = vector.extract_strided_slice %218 {offsets = [8, 0], sizes = [8, 32], strides = [1, 1]} : vector<32x32xbf16> to vector<8x32xbf16>
    %cst_80 = arith.constant dense<0.000000e+00> : vector<64x32xf32>
    %261 = tpu.matmul %259, %260, %cst_80 {dimension_numbers = #tpu.dot_dimension_numbers<[1], [0], [0], [1], [0, 0, 1, 1], [], []>} : vector<64x8xbf16>, vector<8x32xbf16>, vector<64x32xf32> -> vector<64x32xf32>
    %262 = arith.addf %241, %261 : vector<64x32xf32>
    %263 = vector.extract_strided_slice %217 {offsets = [0, 16], sizes = [64, 8], strides = [1, 1]} : vector<64x96xbf16> to vector<64x8xbf16>
    %264 = vector.extract_strided_slice %217 {offsets = [0, 48], sizes = [64, 8], strides = [1, 1]} : vector<64x96xbf16> to vector<64x8xbf16>
    %265 = vector.extract_strided_slice %217 {offsets = [0, 80], sizes = [64, 8], strides = [1, 1]} : vector<64x96xbf16> to vector<64x8xbf16>
    %cst_81 = arith.constant dense<0.000000e+00> : vector<64x64xf32>
    %266 = tpu.matmul %263, %264, %cst_81 {dimension_numbers = #tpu.dot_dimension_numbers<[1], [1], [0], [0], [0, 0, 1, 0], [], []>} : vector<64x8xbf16>, vector<64x8xbf16>, vector<64x64xf32> -> vector<64x64xf32>
    %267 = arith.addf %266, %15 : vector<64x64xf32>
    %cst_82 = arith.constant dense<0xFF800000> : vector<64xf32>
    %268 = vector.multi_reduction <maximumf>, %267, %cst_82 [1] : vector<64x64xf32> to vector<64xf32>
    %269 = vector.shape_cast %268 : vector<64xf32> to vector<64x1xf32>
    %270 = vector.broadcast %269 : vector<64x1xf32> to vector<64x64xf32>
    %271 = arith.subf %267, %270 : vector<64x64xf32>
    %272 = math.exp %271 : vector<64x64xf32>
    %cst_83 = arith.constant dense<0.000000e+00> : vector<64xf32>
    %273 = vector.multi_reduction <add>, %272, %cst_83 [1] : vector<64x64xf32> to vector<64xf32>
    %274 = vector.shape_cast %273 : vector<64xf32> to vector<64x1xf32>
    %275 = tpu.reciprocal %274 {approx = true} : vector<64x1xf32> -> vector<64x1xf32>
    %276 = vector.broadcast %275 : vector<64x1xf32> to vector<64x64xf32>
    %277 = arith.mulf %272, %276 : vector<64x64xf32>
    %278 = arith.truncf %277 : vector<64x64xf32> to vector<64x64xbf16>
    %cst_84 = arith.constant dense<0.000000e+00> : vector<64x8xf32>
    %279 = tpu.matmul %278, %265, %cst_84 {dimension_numbers = #tpu.dot_dimension_numbers<[1], [0], [0], [1], [0, 0, 1, 1], [], []>} : vector<64x64xbf16>, vector<64x8xbf16>, vector<64x8xf32> -> vector<64x8xf32>
    %280 = arith.truncf %279 : vector<64x8xf32> to vector<64x8xbf16>
    %281 = vector.extract_strided_slice %218 {offsets = [16, 0], sizes = [8, 32], strides = [1, 1]} : vector<32x32xbf16> to vector<8x32xbf16>
    %cst_85 = arith.constant dense<0.000000e+00> : vector<64x32xf32>
    %282 = tpu.matmul %280, %281, %cst_85 {dimension_numbers = #tpu.dot_dimension_numbers<[1], [0], [0], [1], [0, 0, 1, 1], [], []>} : vector<64x8xbf16>, vector<8x32xbf16>, vector<64x32xf32> -> vector<64x32xf32>
    %283 = arith.addf %262, %282 : vector<64x32xf32>
    %284 = vector.extract_strided_slice %217 {offsets = [0, 24], sizes = [64, 8], strides = [1, 1]} : vector<64x96xbf16> to vector<64x8xbf16>
    %285 = vector.extract_strided_slice %217 {offsets = [0, 56], sizes = [64, 8], strides = [1, 1]} : vector<64x96xbf16> to vector<64x8xbf16>
    %286 = vector.extract_strided_slice %217 {offsets = [0, 88], sizes = [64, 8], strides = [1, 1]} : vector<64x96xbf16> to vector<64x8xbf16>
    %cst_86 = arith.constant dense<0.000000e+00> : vector<64x64xf32>
    %287 = tpu.matmul %284, %285, %cst_86 {dimension_numbers = #tpu.dot_dimension_numbers<[1], [1], [0], [0], [0, 0, 1, 0], [], []>} : vector<64x8xbf16>, vector<64x8xbf16>, vector<64x64xf32> -> vector<64x64xf32>
    %288 = arith.addf %287, %15 : vector<64x64xf32>
    %cst_87 = arith.constant dense<0xFF800000> : vector<64xf32>
    %289 = vector.multi_reduction <maximumf>, %288, %cst_87 [1] : vector<64x64xf32> to vector<64xf32>
    %290 = vector.shape_cast %289 : vector<64xf32> to vector<64x1xf32>
    %291 = vector.broadcast %290 : vector<64x1xf32> to vector<64x64xf32>
    %292 = arith.subf %288, %291 : vector<64x64xf32>
    %293 = math.exp %292 : vector<64x64xf32>
    %cst_88 = arith.constant dense<0.000000e+00> : vector<64xf32>
    %294 = vector.multi_reduction <add>, %293, %cst_88 [1] : vector<64x64xf32> to vector<64xf32>
    %295 = vector.shape_cast %294 : vector<64xf32> to vector<64x1xf32>
    %296 = tpu.reciprocal %295 {approx = true} : vector<64x1xf32> -> vector<64x1xf32>
    %297 = vector.broadcast %296 : vector<64x1xf32> to vector<64x64xf32>
    %298 = arith.mulf %293, %297 : vector<64x64xf32>
    %299 = arith.truncf %298 : vector<64x64xf32> to vector<64x64xbf16>
    %cst_89 = arith.constant dense<0.000000e+00> : vector<64x8xf32>
    %300 = tpu.matmul %299, %286, %cst_89 {dimension_numbers = #tpu.dot_dimension_numbers<[1], [0], [0], [1], [0, 0, 1, 1], [], []>} : vector<64x64xbf16>, vector<64x8xbf16>, vector<64x8xf32> -> vector<64x8xf32>
    %301 = arith.truncf %300 : vector<64x8xf32> to vector<64x8xbf16>
    %302 = vector.extract_strided_slice %218 {offsets = [24, 0], sizes = [8, 32], strides = [1, 1]} : vector<32x32xbf16> to vector<8x32xbf16>
    %cst_90 = arith.constant dense<0.000000e+00> : vector<64x32xf32>
    %303 = tpu.matmul %301, %302, %cst_90 {dimension_numbers = #tpu.dot_dimension_numbers<[1], [0], [0], [1], [0, 0, 1, 1], [], []>} : vector<64x8xbf16>, vector<8x32xbf16>, vector<64x32xf32> -> vector<64x32xf32>
    %304 = arith.addf %283, %303 : vector<64x32xf32>
    %305 = arith.addf %304, %210 : vector<64x32xf32>
    %c12 = arith.constant 12 : index
    %c0_91 = arith.constant 0 : index
    %306 = vector.load %arg4[%c12, %c0_91] : memref<19x96xf32, #tpu.memory_space<vmem>>, vector<1x32xf32>
    %c13 = arith.constant 13 : index
    %c0_92 = arith.constant 0 : index
    %307 = vector.load %arg4[%c13, %c0_92] : memref<19x96xf32, #tpu.memory_space<vmem>>, vector<1x32xf32>
    %cst_93 = arith.constant dense<0.000000e+00> : vector<64xf32>
    %308 = vector.multi_reduction <add>, %305, %cst_93 [1] : vector<64x32xf32> to vector<64xf32>
    %309 = vector.shape_cast %308 : vector<64xf32> to vector<64x1xf32>
    %cst_94 = arith.constant 3.200000e+01 : f32
    %310 = vector.broadcast %cst_94 : f32 to vector<64x1xf32>
    %311 = arith.divf %309, %310 : vector<64x1xf32>
    %312 = vector.broadcast %311 : vector<64x1xf32> to vector<64x32xf32>
    %313 = arith.subf %305, %312 : vector<64x32xf32>
    %314 = arith.mulf %313, %313 : vector<64x32xf32>
    %cst_95 = arith.constant dense<0.000000e+00> : vector<64xf32>
    %315 = vector.multi_reduction <add>, %314, %cst_95 [1] : vector<64x32xf32> to vector<64xf32>
    %316 = vector.shape_cast %315 : vector<64xf32> to vector<64x1xf32>
    %cst_96 = arith.constant 3.200000e+01 : f32
    %317 = vector.broadcast %cst_96 : f32 to vector<64x1xf32>
    %318 = arith.divf %316, %317 : vector<64x1xf32>
    %319 = vector.broadcast %311 : vector<64x1xf32> to vector<64x32xf32>
    %320 = arith.subf %305, %319 : vector<64x32xf32>
    %cst_97 = arith.constant 9.99999996E-13 : f32
    %321 = vector.broadcast %cst_97 : f32 to vector<64x1xf32>
    %322 = arith.addf %318, %321 : vector<64x1xf32>
    %323 = math.rsqrt %322 : vector<64x1xf32>
    %324 = vector.broadcast %323 : vector<64x1xf32> to vector<64x32xf32>
    %325 = arith.mulf %320, %324 : vector<64x32xf32>
    %326 = vector.broadcast %306 : vector<1x32xf32> to vector<64x32xf32>
    %327 = arith.mulf %325, %326 : vector<64x32xf32>
    %328 = vector.broadcast %307 : vector<1x32xf32> to vector<64x32xf32>
    %329 = arith.addf %327, %328 : vector<64x32xf32>
    %330 = arith.truncf %329 : vector<64x32xf32> to vector<64x32xbf16>
    %c224 = arith.constant 224 : index
    %c0_98 = arith.constant 0 : index
    %331 = vector.load %arg3[%c224, %c0_98] : memref<352x96xbf16, #tpu.memory_space<vmem>>, vector<32x64xbf16>
    %cst_99 = arith.constant dense<0.000000e+00> : vector<64x64xf32>
    %332 = tpu.matmul %330, %331, %cst_99 {dimension_numbers = #tpu.dot_dimension_numbers<[1], [0], [0], [1], [0, 0, 1, 1], [], []>} : vector<64x32xbf16>, vector<32x64xbf16>, vector<64x64xf32> -> vector<64x64xf32>
    %c14 = arith.constant 14 : index
    %c0_100 = arith.constant 0 : index
    %333 = vector.load %arg4[%c14, %c0_100] : memref<19x96xf32, #tpu.memory_space<vmem>>, vector<1x64xf32>
    %334 = vector.broadcast %333 : vector<1x64xf32> to vector<64x64xf32>
    %335 = arith.addf %332, %334 : vector<64x64xf32>
    %cst_101 = arith.constant 5.000000e-01 : f32
    %336 = vector.broadcast %cst_101 : f32 to vector<64x64xf32>
    %337 = arith.mulf %336, %335 : vector<64x64xf32>
    %cst_102 = arith.constant 4.471500e-02 : f32
    %338 = vector.broadcast %cst_102 : f32 to vector<64x64xf32>
    %339 = arith.mulf %338, %335 : vector<64x64xf32>
    %340 = arith.mulf %339, %335 : vector<64x64xf32>
    %341 = arith.mulf %340, %335 : vector<64x64xf32>
    %342 = arith.addf %335, %341 : vector<64x64xf32>
    %cst_103 = arith.constant 0.797884583 : f32
    %343 = vector.broadcast %cst_103 : f32 to vector<64x64xf32>
    %344 = arith.mulf %343, %342 : vector<64x64xf32>
    %345 = math.tanh %344 : vector<64x64xf32>
    %cst_104 = arith.constant 1.000000e+00 : f32
    %346 = vector.broadcast %cst_104 : f32 to vector<64x64xf32>
    %347 = arith.addf %346, %345 : vector<64x64xf32>
    %348 = arith.mulf %337, %347 : vector<64x64xf32>
    %349 = arith.truncf %348 : vector<64x64xf32> to vector<64x64xbf16>
    %c256 = arith.constant 256 : index
    %c0_105 = arith.constant 0 : index
    %350 = vector.load %arg3[%c256, %c0_105] : memref<352x96xbf16, #tpu.memory_space<vmem>>, vector<64x32xbf16>
    %cst_106 = arith.constant dense<0.000000e+00> : vector<64x32xf32>
    %351 = tpu.matmul %349, %350, %cst_106 {dimension_numbers = #tpu.dot_dimension_numbers<[1], [0], [0], [1], [0, 0, 1, 1], [], []>} : vector<64x64xbf16>, vector<64x32xbf16>, vector<64x32xf32> -> vector<64x32xf32>
    %c15 = arith.constant 15 : index
    %c0_107 = arith.constant 0 : index
    %352 = vector.load %arg4[%c15, %c0_107] : memref<19x96xf32, #tpu.memory_space<vmem>>, vector<1x32xf32>
    %353 = vector.broadcast %352 : vector<1x32xf32> to vector<64x32xf32>
    %354 = arith.addf %351, %353 : vector<64x32xf32>
    %355 = arith.addf %354, %329 : vector<64x32xf32>
    %c16 = arith.constant 16 : index
    %c0_108 = arith.constant 0 : index
    %356 = vector.load %arg4[%c16, %c0_108] : memref<19x96xf32, #tpu.memory_space<vmem>>, vector<1x32xf32>
    %c17 = arith.constant 17 : index
    %c0_109 = arith.constant 0 : index
    %357 = vector.load %arg4[%c17, %c0_109] : memref<19x96xf32, #tpu.memory_space<vmem>>, vector<1x32xf32>
    %cst_110 = arith.constant dense<0.000000e+00> : vector<64xf32>
    %358 = vector.multi_reduction <add>, %355, %cst_110 [1] : vector<64x32xf32> to vector<64xf32>
    %359 = vector.shape_cast %358 : vector<64xf32> to vector<64x1xf32>
    %cst_111 = arith.constant 3.200000e+01 : f32
    %360 = vector.broadcast %cst_111 : f32 to vector<64x1xf32>
    %361 = arith.divf %359, %360 : vector<64x1xf32>
    %362 = vector.broadcast %361 : vector<64x1xf32> to vector<64x32xf32>
    %363 = arith.subf %355, %362 : vector<64x32xf32>
    %364 = arith.mulf %363, %363 : vector<64x32xf32>
    %cst_112 = arith.constant dense<0.000000e+00> : vector<64xf32>
    %365 = vector.multi_reduction <add>, %364, %cst_112 [1] : vector<64x32xf32> to vector<64xf32>
    %366 = vector.shape_cast %365 : vector<64xf32> to vector<64x1xf32>
    %cst_113 = arith.constant 3.200000e+01 : f32
    %367 = vector.broadcast %cst_113 : f32 to vector<64x1xf32>
    %368 = arith.divf %366, %367 : vector<64x1xf32>
    %369 = vector.broadcast %361 : vector<64x1xf32> to vector<64x32xf32>
    %370 = arith.subf %355, %369 : vector<64x32xf32>
    %cst_114 = arith.constant 9.99999996E-13 : f32
    %371 = vector.broadcast %cst_114 : f32 to vector<64x1xf32>
    %372 = arith.addf %368, %371 : vector<64x1xf32>
    %373 = math.rsqrt %372 : vector<64x1xf32>
    %374 = vector.broadcast %373 : vector<64x1xf32> to vector<64x32xf32>
    %375 = arith.mulf %370, %374 : vector<64x32xf32>
    %376 = vector.broadcast %356 : vector<1x32xf32> to vector<64x32xf32>
    %377 = arith.mulf %375, %376 : vector<64x32xf32>
    %378 = vector.broadcast %357 : vector<1x32xf32> to vector<64x32xf32>
    %379 = arith.addf %377, %378 : vector<64x32xf32>
    %380 = tpu.iota {dimensions = array<i32: 0>} : vector<8x64xi32>
    %381 = tpu.iota {dimensions = array<i32: 1>} : vector<8x64xi32>
    %c8_i32 = arith.constant 8 : i32
    %382 = vector.broadcast %c8_i32 : i32 to vector<8x64xi32>
    %383 = arith.muli %380, %382 : vector<8x64xi32>
    %384 = arith.cmpi eq, %381, %383 : vector<8x64xi32>
    %385 = arith.extui %384 : vector<8x64xi1> to vector<8x64xi32>
    %386 = arith.sitofp %385 : vector<8x64xi32> to vector<8x64xf32>
    %387 = arith.truncf %386 : vector<8x64xf32> to vector<8x64xbf16>
    %388 = arith.truncf %379 : vector<64x32xf32> to vector<64x32xbf16>
    %cst_115 = arith.constant dense<0.000000e+00> : vector<8x32xf32>
    %389 = tpu.matmul %387, %388, %cst_115 {dimension_numbers = #tpu.dot_dimension_numbers<[1], [0], [0], [1], [0, 0, 1, 1], [], []>} : vector<8x64xbf16>, vector<64x32xbf16>, vector<8x32xf32> -> vector<8x32xf32>
    %390 = arith.truncf %389 : vector<8x32xf32> to vector<8x32xbf16>
    %c320 = arith.constant 320 : index
    %c0_116 = arith.constant 0 : index
    %391 = vector.load %arg3[%c320, %c0_116] : memref<352x96xbf16, #tpu.memory_space<vmem>>, vector<32x32xbf16>
    %cst_117 = arith.constant dense<0.000000e+00> : vector<8x32xf32>
    %392 = tpu.matmul %390, %391, %cst_117 {dimension_numbers = #tpu.dot_dimension_numbers<[1], [0], [0], [1], [0, 0, 1, 1], [], []>} : vector<8x32xbf16>, vector<32x32xbf16>, vector<8x32xf32> -> vector<8x32xf32>
    %c18 = arith.constant 18 : index
    %c0_118 = arith.constant 0 : index
    %393 = vector.load %arg4[%c18, %c0_118] : memref<19x96xf32, #tpu.memory_space<vmem>>, vector<1x32xf32>
    %394 = vector.broadcast %393 : vector<1x32xf32> to vector<8x32xf32>
    %395 = arith.addf %392, %394 : vector<8x32xf32>
    %396 = math.tanh %395 : vector<8x32xf32>
    %c0_119 = arith.constant 0 : index
    %c0_120 = arith.constant 0 : index
    %c0_121 = arith.constant 0 : index
    %397 = vector.load %arg5[%c0_119, %c0_120, %c0_121] : memref<1x8x32xf32, #tpu.memory_space<vmem>>, vector<1x8x32xf32>
    %398 = vector.shape_cast %397 : vector<1x8x32xf32> to vector<8x32xf32>
    %399 = vector.shape_cast %396 : vector<8x32xf32> to vector<1x8x32xf32>
    tpu.vector_store %arg5[%c0_119, %c0_120, %c0_121], %399 {strides = array<i32>} : memref<1x8x32xf32, #tpu.memory_space<vmem>>, vector<1x8x32xf32>,
    return
  }
  func.func @transform_0(%arg0: i32) -> (i32, i32, i32) {
    %c0_i32 = arith.constant 0 : i32
    %c0_i32_0 = arith.constant 0 : i32
    %c0_i32_1 = arith.constant 0 : i32
    return %arg0, %c0_i32, %c0_i32_0 : i32, i32, i32
  }
  func.func @transform_1(%arg0: i32) -> (i32, i32, i32) {
    %c0_i32 = arith.constant 0 : i32
    %c0_i32_0 = arith.constant 0 : i32
    %c0_i32_1 = arith.constant 0 : i32
    return %arg0, %c0_i32, %c0_i32_0 : i32, i32, i32
  }
  func.func @transform_2(%arg0: i32) -> (i32, i32) {
    %c0_i32 = arith.constant 0 : i32
    %c0_i32_0 = arith.constant 0 : i32
    %c0_i32_1 = arith.constant 0 : i32
    return %c0_i32, %c0_i32_0 : i32, i32
  }
  func.func @transform_3(%arg0: i32) -> (i32, i32) {
    %c0_i32 = arith.constant 0 : i32
    %c0_i32_0 = arith.constant 0 : i32
    %c0_i32_1 = arith.constant 0 : i32
    return %c0_i32, %c0_i32_0 : i32, i32
  }
  func.func @transform_4(%arg0: i32) -> (i32, i32, i32) {
    %c0_i32 = arith.constant 0 : i32
    %c0_i32_0 = arith.constant 0 : i32
    %c0_i32_1 = arith.constant 0 : i32
    return %arg0, %c0_i32, %c0_i32_0 : i32, i32, i32
  }
}

</mosaic_0001>

<bundles_post_ra>
// kernel: tpu_custom_call.1
= control target key start
LH: loop header
LB: loop body
LE: loop exit
PB: predicated region body
PF: predicated region fallthrough
CT: control target
= control target key end

     0   :  { %vm78_vm0 = vcmask 261120   ;;  %s6694_s0 = inlined_call_operand.vmem [shape: f32[1,64,32], index: 0, kind: input, shape index: {}]   ;;  %s6695_s1 = inlined_call_operand.vmem [shape: f32[1,1,64], index: 1, kind: input, shape index: {}]   ;;  %s6696_s2 = inlined_call_operand.vmem [shape: bf16[352,96], index: 2, kind: input, shape index: {}]   ;;  %s6697_s3 = inlined_call_operand.vmem [shape: f32[19,96], index: 3, kind: input, shape index: {}]   ;;  %s6698_s4 = inlined_call_operand.hbm [shape: f32[1,8,32], index: 4, kind: output, shape index: {}]  }
   0x1   :  { %v4635_v0 = vld [vmem:[%s6694_s0 + $0x30] sm:$0xff]  ;;  %v68_v2 = vld [vmem:[%s6694_s0] sm:$0xff]  ;;  %v75_v6 = vld [vmem:[%s6694_s0 + $0x38] sm:$0xff] }
   0x2   :  { %v70_v1 = vld [vmem:[%s6694_s0 + $0x10] sm:$0xff]  ;;  %v97_v3 = vsel %vm78_vm0, %v4635_v0, 0.0  ;;  %v79_v5 = vsel %vm78_vm0, %v68_v2, 0.0  ;;  %v71_v7 = vld [vmem:[%s6694_s0 + $0x18] sm:$0xff]  ;;  %v100_v8 = vsel %vm78_vm0, %v75_v6, 0.0  ;;  %v69_v10 = vld [vmem:[%s6694_s0 + $0x8] sm:$0xff] }
   0x3   :  { %v85_v4 = vsel %vm78_vm0, %v70_v1, 0.0  ;;  %98 = vadd.xlane.f32.xlu2 %v97_v3  ;;  %80 = vadd.xlane.f32.xlu0 %v79_v5  ;;  %v88_v9 = vsel %vm78_vm0, %v71_v7, 0.0  ;;  %v82_v11 = vsel %vm78_vm0, %v69_v10, 0.0 }
   0x4   :  { %86 = vadd.xlane.f32.xlu1 %v85_v4 }
   0xb   :  { %101 = vadd.xlane.f32.xlu2 %v100_v8 }
   0xc   :  { %89 = vadd.xlane.f32.xlu1 %v88_v9 }
   0xd   :  { %9 = vsyncpa [#allocation3], 0  ;;  %83 = vadd.xlane.f32.xlu0 %v82_v11  ;;  %v73_v12 = vld [vmem:[%s6694_s0 + $0x28] sm:$0xff]  ;;  %v72_v13 = vld [vmem:[%s6694_s0 + $0x20] sm:$0xff]  ;;  %v4591_v16 = vmov 32.0   ;;  %s4592_s14 = smov 96  }
   0xe   :  { %v94_v14 = vsel %vm78_vm0, %v73_v12, 0.0  ;;  %v91_v15 = vsel %vm78_vm0, %v72_v13, 0.0  ;;  %4193 = vrcp.f32 %v4591_v16  ;;  %v4138_v5 = vld [vmem:[%s6696_s2] sm:$0xff]  ;;  %s4593_s15 = smov 64   ;;  %s4597_s18 = smov 120  }
   0xf   :  { %s4598_s19 = smov 56   ;;  %s4599_s22 = smov 72  }
  0x10   :  { %s4600_s23 = smov 112   ;;  %s4601_s24 = smov 104  }
  0x11   :  { %s4602_s25 = smov 80   ;;  %s4603_s30 = smov 48  }
  0x12   :  { %s4604_s0 = smov 40   ;;  %s4606_s5 = smov [#allocation2]  }
  0x13   :  { %s3932_s6 = sshll.u32 %s4606_s5, 4  ;;  %s3934_s9 = sshll.u32 %s6698_s4, 4  ;;  %s3933_s6 = int_to_ptr.vmem [resolvable:$true] %s3932_s6  ;;  %s3935_s9 = int_to_ptr.hbm [resolvable:$true] %s3934_s9 }
  0x14   :  { %95 = vadd.xlane.f32.xlu1 %v94_v14  ;;  %v4194_v17 = vpop.eup %4193 }
  0x15   :  { %92 = vadd.xlane.f32.xlu0 %v91_v15  ;;  %v104_v18 = vmul.f32 32.0, %v4194_v17  ;;  %vm108_vm1 = vweird.f32 %v4194_v17 }
  0x17   :  { %v105_v19 = vsub.f32 1.0, %v104_v18 }
  0x19   :  { %v106_v20 = vmul.f32 %v4194_v17, %v105_v19 }
  0x1b   :  { %v107_v21 = vadd.f32 %v4194_v17, %v106_v20 }
  0x1d   :  { %v4667_v22 = vsel %vm108_vm1, %v4194_v17, %v107_v21 }
  0x76   :  { %v99_v23 = vpop.xlane.xlu2 %98  ;;  %v81_v26 = vpop.xlane.xlu0 %80 }
  0x77   :  { %v87_v24 = vpop.xlane.xlu1 %86  ;;  %v110_v27 = vmul.f32 %v4667_v22, %v81_v26  ;;  %v116_v42 = vmul.f32 %v4667_v22, %v99_v23 }
  0x78   :  { %v112_v25 = vmul.f32 %v4667_v22, %v87_v24 }
  0x79   :  { %v4673_v29 = vsub.f32 %v68_v2, %v110_v27  ;;  %v4700_v49 = vsub.f32 %v4635_v0, %v116_v42 }
  0x7a   :  { %v4671_v28 = vsub.f32 %v70_v1, %v112_v25  ;;  %v4139_v1 = vld [vmem:[%s6696_s2 + $0x8] sm:$0xff] }
  0x7b   :  { %v126_v31 = vmul.f32 %v4673_v29, %v4673_v29  ;;  %v132_v56 = vmul.f32 %v4700_v49, %v4700_v49  ;;  %320 = vmatpush.bf16.msra.mxu0 %v4139_v1  ;;  %4156 = vmatpush.bf16.msra.mxu2 %v4139_v1 }
  0x7c   :  { %v128_v30 = vmul.f32 %v4671_v28, %v4671_v28 }
  0x7d   :  { %v134_v35 = vsel %vm78_vm0, %v126_v31, 0.0  ;;  %v152_v59 = vsel %vm78_vm0, %v132_v56, 0.0 }
  0x7e   :  { %v140_v32 = vsel %vm78_vm0, %v128_v30, 0.0  ;;  %v102_v33 = vpop.xlane.xlu2 %101  ;;  %135 = vadd.xlane.f32.xlu2 %v134_v35 }
  0x7f   :  { %141 = vadd.xlane.f32.xlu1 %v140_v32  ;;  %v90_v34 = vpop.xlane.xlu1 %89  ;;  %v117_v36 = vmul.f32 %v4667_v22, %v102_v33  ;;  %321 = vmatpush.bf16.msra.mxu0 %v4138_v5 }
  0x80   :  { %v113_v37 = vmul.f32 %v4667_v22, %v90_v34  ;;  %v84_v38 = vpop.xlane.xlu0 %83  ;;  %4157 = vmatpush.bf16.msra.mxu2 %v4138_v5  ;;  %v4780_v5 = vld [vmem:[%s6697_s3 + $0x1] ss:$0 sm:$0xff] }
  0x81   :  { %v111_v39 = vmul.f32 %v4667_v22, %v84_v38  ;;  %v4684_v40 = vsub.f32 %v75_v6, %v117_v36 }
  0x82   :  { %v4686_v41 = vsub.f32 %v71_v7, %v113_v37 }
  0x83   :  { %v4689_v43 = vsub.f32 %v69_v10, %v111_v39  ;;  %v133_v44 = vmul.f32 %v4684_v40, %v4684_v40 }
  0x84   :  { %v129_v45 = vmul.f32 %v4686_v41, %v4686_v41 }
  0x85   :  { %v127_v46 = vmul.f32 %v4689_v43, %v4689_v43  ;;  %v155_v47 = vsel %vm78_vm0, %v133_v44, 0.0 }
  0x86   :  { %v143_v48 = vsel %vm78_vm0, %v129_v45, 0.0 }
  0x87   :  { %156 = vadd.xlane.f32.xlu1 %v155_v47  ;;  %v137_v50 = vsel %vm78_vm0, %v127_v46, 0.0  ;;  %v96_v51 = vpop.xlane.xlu1 %95  ;;  %144 = vadd.xlane.f32.xlu2 %v143_v48 }
  0x88   :  { %138 = vadd.xlane.f32.xlu0 %v137_v50  ;;  %v93_v52 = vpop.xlane.xlu0 %92  ;;  %v115_v54 = vmul.f32 %v4667_v22, %v96_v51 }
  0x89   :  { %v114_v53 = vmul.f32 %v4667_v22, %v93_v52 }
  0x8a   :  { %v4709_v57 = vsub.f32 %v73_v12, %v115_v54 }
  0x8b   :  { %v4705_v55 = vsub.f32 %v72_v13, %v114_v53 }
  0x8c   :  { %v131_v61 = vmul.f32 %v4709_v57, %v4709_v57 }
  0x8d   :  { %v130_v58 = vmul.f32 %v4705_v55, %v4705_v55 }
  0x8e   :  { %v149_v62 = vsel %vm78_vm0, %v131_v61, 0.0 }
  0x8f   :  { %v146_v60 = vsel %vm78_vm0, %v130_v58, 0.0 }
  0x90   :  { %153 = vadd.xlane.f32.xlu0 %v152_v59  ;;  %147 = vadd.xlane.f32.xlu2 %v146_v60  ;;  %v4768_v59 = vld [vmem:[%s6697_s3] ss:$0 sm:$0xff] }
  0x98   :  { %150 = vadd.xlane.f32.xlu0 %v149_v62 }
  0xf1   :  { %v136_v0 = vpop.xlane.xlu2 %135 }
  0xf2   :  { %v142_v63 = vpop.xlane.xlu1 %141  ;;  %v158_v2 = vmul.f32 %v136_v0, %v4667_v22 }
  0xf3   :  { %v160_v3 = vmul.f32 %v142_v63, %v4667_v22 }
  0xf4   :  { %v166_v4 = vadd.f32 1e-12, %v158_v2 }
  0xf5   :  { %v4726_v6 = vadd.f32 1e-12, %v160_v3 }
  0xf6   :  { %4195 = vrsqrt.f32 %v166_v4  ;;  %vm180_vm3 = vweird.f32 %v166_v4 }
  0xf7   :  { %4197 = vrsqrt.f32 %v4726_v6  ;;  %vm200_vm13 = vweird.f32 %v4726_v6 }
  0xfa   :  { %v157_v7 = vpop.xlane.xlu1 %156  ;;  %v145_v9 = vpop.xlane.xlu2 %144 }
  0xfb   :  { %v165_v8 = vmul.f32 %v157_v7, %v4667_v22  ;;  %v139_v10 = vpop.xlane.xlu0 %138  ;;  %v161_v11 = vmul.f32 %v145_v9, %v4667_v22 }
  0xfc   :  { %v159_v12 = vmul.f32 %v139_v10, %v4667_v22  ;;  %v4196_v14 = vpop.eup %4195 }
  0xfd   :  { %v4731_v13 = vadd.f32 1e-12, %v165_v8  ;;  %v4734_v15 = vadd.f32 1e-12, %v161_v11  ;;  %v175_v17 = vmul.f32 %v4196_v14, %v166_v4  ;;  %v4738_v21 = vpop.eup %4197  ;;  %vm181_vm2 = vweird.f32 %v4196_v14 }
  0xfe   :  { %v167_v16 = vadd.f32 1e-12, %v159_v12  ;;  %v195_v32 = vmul.f32 %v4738_v21, %v4726_v6  ;;  %vm182_vm4 = vmor %vm180_vm3, %vm181_vm2  ;;  %vm201_vm14 = vweird.f32 %v4738_v21 }
  0xff   :  { %4199 = vrsqrt.f32 %v4731_v13  ;;  %v176_v18 = vmul.f32 %v4196_v14, %v175_v17  ;;  %vm250_vm6 = vweird.f32 %v4731_v13  ;;  %vm210_vm11 = vweird.f32 %v4734_v15 }
 0x100   :  { %4201 = vrsqrt.f32 %v4734_v15  ;;  %v196_v47 = vmul.f32 %v4738_v21, %v195_v32  ;;  %vm190_vm7 = vweird.f32 %v167_v16 }
 0x101   :  { %4203 = vrsqrt.f32 %v167_v16  ;;  %v177_v19 = vmul.f32 0.5, %v176_v18 }
 0x102   :  { %v197_v61 = vmul.f32 0.5, %v196_v47 }
 0x103   :  { %v154_v20 = vpop.xlane.xlu0 %153  ;;  %v148_v23 = vpop.xlane.xlu2 %147  ;;  %v178_v26 = vsub.f32 1.5, %v177_v19 }
 0x104   :  { %v164_v24 = vmul.f32 %v154_v20, %v4667_v22  ;;  %v162_v34 = vmul.f32 %v148_v23, %v4667_v22  ;;  %v198_v7 = vsub.f32 1.5, %v197_v61 }
 0x105   :  { %v4741_v25 = vpop.eup %4199  ;;  %v179_v36 = vmul.f32 %v4196_v14, %v178_v26 }
 0x106   :  { %v4743_v27 = vpop.eup %4201  ;;  %v245_v30 = vmul.f32 %v4741_v25, %v4731_v13  ;;  %v4752_v35 = vadd.f32 1e-12, %v164_v24  ;;  %v4757_v45 = vadd.f32 1e-12, %v162_v34  ;;  %vm251_vm8 = vweird.f32 %v4741_v25 }
 0x107   :  { %v4204_v31 = vpop.eup %4203  ;;  %v205_v33 = vmul.f32 %v4743_v27, %v4734_v15  ;;  %v183_v48 = vsel %vm182_vm4, %v4196_v14, %v179_v36  ;;  %vm4784_vm10 = vmor %vm250_vm6, %vm251_vm8  ;;  %vm211_vm12 = vweird.f32 %v4743_v27  ;;  %v199_v18 = vmul.f32 %v4738_v21, %v198_v7 }
 0x108   :  { %v246_v37 = vmul.f32 %v4741_v25, %v245_v30  ;;  %v185_v38 = vmul.f32 %v4204_v31, %v167_v16  ;;  %4205 = vrsqrt.f32 %v4752_v35  ;;  %vm191_vm5 = vweird.f32 %v4204_v31  ;;  %vm4797_vm15 = vmor %vm210_vm11, %vm211_vm12 }
 0x109   :  { %v206_v42 = vmul.f32 %v4743_v27, %v205_v33  ;;  %4207 = vrsqrt.f32 %v4757_v45  ;;  %v254_v58 = vmul.f32 %v183_v48, %v4673_v29  ;;  %vm192_vm9 = vmor %vm190_vm7, %vm191_vm5  ;;  %vm240_vm2 = vweird.f32 %v4752_v35 }
 0x10a   :  { %v247_v39 = vmul.f32 0.5, %v246_v37  ;;  %v186_v44 = vmul.f32 %v4204_v31, %v185_v38  ;;  %vm202_vm4 = vmor %vm200_vm13, %vm201_vm14  ;;  %vm220_vm7 = vweird.f32 %v4757_v45  ;;  %vm384_vm11 = vcmask 64512  }
 0x10b   :  { %v151_v46 = vpop.xlane.xlu0 %150  ;;  %v207_v53 = vmul.f32 0.5, %v206_v42  ;;  %v263_v4 = vmul.f32 %v4768_v59, %v254_v58 }
 0x10c   :  { %v187_v50 = vmul.f32 0.5, %v186_v44  ;;  %v163_v51 = vmul.f32 %v151_v46, %v4667_v22  ;;  %v248_v52 = vsub.f32 1.5, %v247_v39 }
 0x10d   :  { %v208_v29 = vsub.f32 1.5, %v207_v53  ;;  %v4802_v16 = vadd.f32 %v4780_v5, %v263_v4 }
 0x10e   :  { %v188_v54 = vsub.f32 1.5, %v187_v50  ;;  %v4761_v56 = vadd.f32 1e-12, %v163_v51  ;;  %v4206_v60 = vpop.eup %4205  ;;  %v249_v63 = vmul.f32 %v4741_v25, %v248_v52 }
 0x10f   :  { %v235_v0 = vmul.f32 %v4206_v60, %v4752_v35  ;;  %v4208_v9 = vpop.eup %4207  ;;  %v209_v12 = vmul.f32 %v4743_v27, %v208_v29  ;;  %vm241_vm1 = vweird.f32 %v4206_v60 }
 0x110   :  { %v189_v62 = vmul.f32 %v4204_v31, %v188_v54  ;;  %4209 = vrsqrt.f32 %v4761_v56  ;;  %v215_v19 = vmul.f32 %v4208_v9, %v4757_v45  ;;  %vm242_vm3 = vmor %vm240_vm2, %vm241_vm1  ;;  %vm230_vm5 = vweird.f32 %v4761_v56 }
 0x111   :  { %v236_v2 = vmul.f32 %v4206_v60, %v235_v0  ;;  %v213_v26 = vsel %vm4797_vm15, %v4743_v27, %v209_v12  ;;  %vm221_vm8 = vweird.f32 %v4208_v9  ;;  %vm438_vm1 = vcmask 523264  }
 0x112   :  { %v193_v1 = vsel %vm192_vm9, %v4204_v31, %v189_v62  ;;  %v216_v32 = vmul.f32 %v4208_v9, %v215_v19  ;;  %v257_v35 = vmul.f32 %v213_v26, %v4686_v41 }
 0x113   :  { %v255_v3 = vmul.f32 %v193_v1, %v4689_v43  ;;  %v253_v43 = vsel %vm4784_vm10, %v4741_v25, %v249_v63  ;;  %v237_v10 = vmul.f32 0.5, %v236_v2  ;;  %vm222_vm10 = vmor %vm220_vm7, %vm221_vm8 }
 0x114   :  { %v261_v23 = vmul.f32 %v253_v43, %v4684_v40  ;;  %v203_v40 = vsel %vm202_vm4, %v4738_v21, %v199_v18  ;;  %v217_v38 = vmul.f32 0.5, %v216_v32  ;;  %v266_v21 = vmul.f32 %v4768_v59, %v257_v35 }
 0x115   :  { %v264_v11 = vmul.f32 %v4768_v59, %v255_v3  ;;  %v238_v15 = vsub.f32 1.5, %v237_v10  ;;  %v256_v37 = vmul.f32 %v203_v40, %v4671_v28 }
 0x116   :  { %v4210_v13 = vpop.eup %4209  ;;  %v270_v34 = vmul.f32 %v4768_v59, %v261_v23  ;;  %v218_v44 = vsub.f32 1.5, %v217_v38  ;;  %v4841_v28 = vadd.f32 %v4780_v5, %v266_v21 }
 0x117   :  { %v4805_v17 = vadd.f32 %v4780_v5, %v264_v11  ;;  %v225_v20 = vmul.f32 %v4210_v13, %v4761_v56  ;;  %v239_v24 = vmul.f32 %v4206_v60, %v238_v15  ;;  %v265_v41 = vmul.f32 %v4768_v59, %v256_v37 }
 0x118   :  { %v4832_v39 = vadd.f32 %v4780_v5, %v270_v34  ;;  %vm231_vm6 = vweird.f32 %v4210_v13  ;;  %v219_v48 = vmul.f32 %v4208_v9, %v218_v44 }
 0x119   :  { %v280_v25 = vpack.c.bf16 %v4805_v17, %v4802_v16  ;;  %v226_v30 = vmul.f32 %v4210_v13, %v225_v20  ;;  %v243_v31 = vsel %vm242_vm3, %v4206_v60, %v239_v24  ;;  %vm232_vm9 = vmor %vm230_vm5, %vm231_vm6  ;;  %v4845_v47 = vadd.f32 %v4780_v5, %v265_v41 }
 0x11a   :  { %v260_v33 = vmul.f32 %v243_v31, %v4700_v49  ;;  %v223_v52 = vsel %vm222_vm10, %v4208_v9, %v219_v48  ;;  %v47_v48 = vld [vmem:[%s6695_s1] sm:$0x1]  ;;  %s4596_s1 = smov 88  }
 0x11b   :  { %3951 = vmatmul.msk.bf16.vlgmr.msra.gmra.mxu0 %vm78_vm0, %v280_v25  ;;  %v227_v27 = vmul.f32 0.5, %v226_v30  ;;  %v281_v50 = vpack.c.bf16 %v4841_v28, %v4845_v47  ;;  %v258_v54 = vmul.f32 %v223_v52, %v4705_v55  ;;  %v4176_v55 = vld [vmem:[%s6697_s3 + $0x2] ss:$0 sm:$0xff]  ;;  %vm48_vm12 = vcmp.gt.f32.partialorder %v47_v48, 0.5 }
 0x11c   :  { %v269_v36 = vmul.f32 %v4768_v59, %v260_v33 }
 0x11d   :  { %v228_v42 = vsub.f32 1.5, %v227_v27  ;;  %v267_v56 = vmul.f32 %v4768_v59, %v258_v54 }
 0x11e   :  { %v4829_v6 = vadd.f32 %v4780_v5, %v269_v36 }
 0x11f   :  { %v229_v46 = vmul.f32 %v4210_v13, %v228_v42  ;;  %v4858_v60 = vadd.f32 %v4780_v5, %v267_v56 }
 0x120   :  { %v283_v49 = vpack.c.bf16 %v4832_v39, %v4829_v6 }
 0x121   :  { %v233_v51 = vsel %vm232_vm9, %v4210_v13, %v229_v46 }
 0x122   :  { %3954 = vmatmul.msk.bf16.vlgmr.msra.gmra.mxu2 %vm78_vm0, %v283_v49  ;;  %v259_v53 = vmul.f32 %v233_v51, %v4709_v57 }
 0x124   :  { %v268_v45 = vmul.f32 %v4768_v59, %v259_v53  ;;  %v4594_v53 = vmov 0  }
 0x125   :  { %v49_v54 = vsel %vm48_vm12, 1, %v4594_v53 }
 0x126   :  { %v4855_v58 = vadd.f32 %v4780_v5, %v268_v45 }
 0x128   :  { %v282_v61 = vpack.c.bf16 %v4855_v58, %v4858_v60 }
 0x12b   :  { %3952 = vmatmul.msk.bf16.gmra.mxu0 %vm78_vm0, %v281_v50  ;;  %v19_v50 = vlaneseq }
 0x12d   :  { %v4899_v51 = vshrl.u32 %v19_v50, 7  ;;  %v4901_v52 = vand.u32 127, %v19_v50 }
 0x12f   :  { %6711 = vst [vmem:[#allocation5_spill] sm:$0xff] %v4899_v51  ;;  %v30_v45 = vand.u32 4294967288, %v4899_v51  ;;  %v4905_v56 = vand.u32 4294967288, %v4901_v52 }
 0x130   :  { %6712 = vst [vmem:[#allocation6_spill] sm:$0xff] %v4901_v52 }
 0x131   :  { %vm39_vm13 = vcmp.eq.s32.totalorder %v30_v45, %v4905_v56 }
 0x13b   :  { %3953 = vmatmul.msk.bf16.gmra.mxu0 %vm78_vm0, %v282_v61  ;;  %v50_v61 = vperm.slane %v49_v54, 0 }
 0x13d   :  { %vm4908_vm14 = vcmp.eq.s32.totalorder %v50_v61, 1 }
 0x13e   :  { %vm52_vm15 = vmand %vm39_vm13, %vm4908_vm14 }
 0x198   :  { %v323_v62 = vpop.f32.mrf.mxu0 }
 0x199   :  { %v324_v26 = vadd.f32 %v4176_v55, %v323_v62 }
 0x19b   :  { %v343_v33 = vpack.c.bf16 %v324_v26, %v324_v26 }
 0x19d   :  { %v364_v35 = vunpack.c.l.b16 %v343_v33  ;;  %v26_v33 = vadd.s32 48, %v4899_v51 }
 0x1a0   :  { %v325_v63 = vpop.f32.mrf.mxu0 }
 0x1a1   :  { %v326_v24 = vadd.f32 %v4176_v55, %v325_v63  ;;  %v21_v63 = vadd.s32 8, %v4899_v51 }
 0x1a3   :  { %v344_v40 = vpack.c.bf16 %v326_v24, %v326_v24  ;;  %v25_v24 = vadd.s32 40, %v4899_v51 }
 0x1a5   :  { %v338_v57 = vpop.f32.mrf.mxu2  ;;  %v365_v34 = vunpack.c.l.b16 %v344_v40 }
 0x1a6   :  { %v339_v59 = vadd.f32 %v4176_v55, %v338_v57  ;;  %v31_v57 = vand.u32 4294967288, %v21_v63 }
 0x1a7   :  { %v4878_v27 = vpack.c.b16 %v365_v34, %v364_v35 }
 0x1a8   :  { %v328_v0 = vpop.f32.mrf.mxu0  ;;  %v349_v2 = vpack.c.bf16 %v339_v59, %v339_v59  ;;  %vm40_vm2 = vcmp.eq.s32.totalorder %v31_v57, %v4905_v56 }
 0x1a9   :  { %v329_v29 = vadd.f32 %v4176_v55, %v328_v0  ;;  %v4595_v0 = vmov -1e+09   ;;  %vm53_vm3 = vmand %vm40_vm2, %vm4908_vm14 }
 0x1aa   :  { %v370_v43 = vunpack.c.l.b16 %v349_v2 }
 0x1ab   :  { %v345_v5 = vpack.c.bf16 %v329_v29, %v329_v29  ;;  %v22_v29 = vadd.s32 16, %v4899_v51 }
 0x1ad   :  { %v340_v1 = vpop.f32.mrf.mxu2  ;;  %v366_v11 = vunpack.c.l.b16 %v345_v5 }
 0x1ae   :  { %v341_v3 = vadd.f32 %v4176_v55, %v340_v1 }
 0x1b0   :  { %v330_v4 = vpop.f32.mrf.mxu0  ;;  %v350_v8 = vpack.c.bf16 %v341_v3, %v341_v3  ;;  %v32_v3 = vand.u32 4294967288, %v22_v29 }
 0x1b1   :  { %v331_v7 = vadd.f32 %v4176_v55, %v330_v4  ;;  %v4928_v4 = vsel %vm53_vm3, 0.0, %v4595_v0 }
 0x1b2   :  { %v371_v10 = vunpack.c.l.b16 %v350_v8  ;;  %vm41_vm4 = vcmp.eq.s32.totalorder %v32_v3, %v4905_v56 }
 0x1b3   :  { %v346_v9 = vpack.c.bf16 %v331_v7, %v331_v7  ;;  %v23_v7 = vadd.s32 24, %v4899_v51  ;;  %vm54_vm5 = vmand %vm41_vm4, %vm4908_vm14 }
 0x1b4   :  { %v4866_v13 = vpack.c.b16 %v371_v10, %v370_v43  ;;  %v4937_v10 = vsel %vm54_vm5, 0.0, %v4595_v0 }
 0x1b5   :  { %v367_v12 = vunpack.c.l.b16 %v346_v9  ;;  %v33_v43 = vand.u32 4294967288, %v23_v7 }
 0x1b6   :  { %382 = vrot.lane.b32.xlu1 %v4866_v13, %s4592_s14 }
 0x1b7   :  { %v4868_v14 = vpack.c.b16 %v367_v12, %v366_v11  ;;  %vm42_vm6 = vcmp.eq.s32.totalorder %v33_v43, %v4905_v56  ;;  %v24_v12 = vadd.s32 32, %v4899_v51 }
 0x1b8   :  { %v333_v15 = vpop.f32.mrf.mxu0  ;;  %vm55_vm7 = vmand %vm42_vm6, %vm4908_vm14 }
 0x1b9   :  { %378 = vrot.lane.b32.xlu0 %v4868_v14, %s4592_s14  ;;  %v334_v18 = vadd.f32 %v4176_v55, %v333_v15 }
 0x1bb   :  { %v347_v20 = vpack.c.bf16 %v334_v18, %v334_v18 }
 0x1bd   :  { %v368_v30 = vunpack.c.l.b16 %v347_v20  ;;  %v4946_v20 = vsel %vm55_vm7, 0.0, %v4595_v0 }
 0x1c0   :  { %v335_v19 = vpop.f32.mrf.mxu0 }
 0x1c1   :  { %v336_v23 = vadd.f32 %v4176_v55, %v335_v19  ;;  %v4916_v55 = vsel %vm52_vm15, 0.0, %v4595_v0  ;;  %v34_v19 = vand.u32 4294967288, %v24_v12 }
 0x1c3   :  { %v348_v25 = vpack.c.bf16 %v336_v23, %v336_v23  ;;  %vm43_vm8 = vcmp.eq.s32.totalorder %v34_v19, %v4905_v56 }
 0x1c4   :  { %vm56_vm9 = vmand %vm43_vm8, %vm4908_vm14 }
 0x1c5   :  { %v369_v31 = vunpack.c.l.b16 %v348_v25 }
 0x1c7   :  { %v4874_v32 = vpack.c.b16 %v369_v31, %v368_v30  ;;  %v35_v30 = vand.u32 4294967288, %v25_v24  ;;  %v4958_v31 = vsel %vm56_vm9, 0.0, %v4595_v0 }
 0x1c9   :  { %380 = vrot.lane.b32.xlu2 %v4874_v32, %s4592_s14  ;;  %vm44_vm10 = vcmp.eq.s32.totalorder %v35_v30, %v4905_v56 }
 0x1ca   :  { %vm57_vm12 = vmand %vm44_vm10, %vm4908_vm14 }
 0x1d1   :  { %376 = vrot.lane.b32.xlu2 %v4878_v27, %s4592_s14 }
 0x1d9   :  { %537 = vrot.lane.b32.xlu2 %v4866_v13, %s4593_s15 }
 0x223   :  { %v381_v36 = vpop.permute.xlu2 %380 }
 0x224   :  { %v404_v42 = vsel %vm384_vm11, %v381_v36, 0  ;;  %v36_v36 = vand.u32 4294967288, %v26_v33 }
 0x226   :  { %vm45_vm13 = vcmp.eq.s32.totalorder %v36_v36, %v4905_v56 }
 0x227   :  { %vm58_vm15 = vmand %vm45_vm13, %vm4908_vm14 }
 0x228   :  { %v383_v37 = vpop.permute.xlu1 %382 }
 0x229   :  { %v407_v38 = vsel %vm384_vm11, %v383_v37, 0  ;;  %v4967_v37 = vsel %vm57_vm12, 0.0, %v4595_v0 }
 0x22a   :  { %413 = vmatpush.bf16.xpose.msra.mxu1 %v407_v38  ;;  %6715 = vst [vmem:[#allocation7_spill] sm:$0xff] %v4967_v37 }
 0x22b   :  { %v377_v21 = vpop.permute.xlu2 %376  ;;  %v379_v41 = vpop.permute.xlu0 %378 }
 0x22c   :  { %v401_v44 = vsel %vm384_vm11, %v379_v41, 0  ;;  %v398_v46 = vsel %vm384_vm11, %v377_v21, 0  ;;  %v27_v21 = vadd.s32 56, %v4899_v51 }
 0x22e   :  { %v37_v41 = vand.u32 4294967288, %v27_v21 }
 0x230   :  { %vm46_vm2 = vcmp.eq.s32.totalorder %v37_v41, %v4905_v56 }
 0x231   :  { %vm59_vm3 = vmand %vm46_vm2, %vm4908_vm14  ;;  %vm600_vm14 = vcmask 1043456  }
 0x232   :  { %414 = vmatpush.bf16.xpose.msra.mxu1 %v404_v42  ;;  %v4984_v53 = vsel %vm59_vm3, 0.0, %v4595_v0 }
 0x233   :  { %v538_v49 = vpop.permute.xlu2 %537  ;;  %6717 = vst [vmem:[#allocation9_spill] sm:$0xff] %v4984_v53 }
 0x234   :  { %559 = vmatpush.bf16.msrb.mxu2 %v538_v49 }
 0x23a   :  { %415 = vmatpush.bf16.xpose.msra.mxu1 %v401_v44  ;;  %v4976_v44 = vsel %vm58_vm15, 0.0, %v4595_v0 }
 0x23b   :  { %6716 = vst [vmem:[#allocation8_spill] sm:$0xff] %v4976_v44 }
 0x242   :  { %416 = vmatpush.bf16.xpose.msra.mxu1 %v398_v46 }
 0x249   :  { %3955 = vmatmul.msk.bf16.vlgmr.msra.gmra.mxu1 %vm384_vm11, %v4878_v27 }
 0x259   :  { %3956 = vmatmul.msk.bf16.gmra.mxu1 %vm384_vm11, %v4868_v14 }
 0x269   :  { %3957 = vmatmul.msk.bf16.gmra.mxu1 %vm384_vm11, %v4874_v32 }
 0x279   :  { %3958 = vmatmul.msk.bf16.gmra.mxu1 %vm384_vm11, %v4866_v13 }
 0x2c6   :  { %v418_v59 = vpop.f32.mrf.mxu1 }
 0x2c7   :  { %v4921_v1 = vadd.f32 %v418_v59, %v4916_v55 }
 0x2c9   :  { %v439_v2 = vsel %vm438_vm1, %v4921_v1, -inf }
 0x2ca   :  { %440 = vmax.xlane.f32.xlu1 %v439_v2 }
 0x2ce   :  { %v420_v5 = vpop.f32.mrf.mxu1 }
 0x2cf   :  { %v421_v8 = vadd.f32 %v420_v5, %v4928_v4 }
 0x2d1   :  { %v442_v9 = vsel %vm438_vm1, %v421_v8, -inf }
 0x2d2   :  { %443 = vmax.xlane.f32.xlu0 %v442_v9 }
 0x2d6   :  { %v423_v11 = vpop.f32.mrf.mxu1 }
 0x2d7   :  { %v424_v15 = vadd.f32 %v423_v11, %v4937_v10 }
 0x2d9   :  { %v445_v18 = vsel %vm438_vm1, %v424_v15, -inf }
 0x2da   :  { %446 = vmax.xlane.f32.xlu2 %v445_v18 }
 0x2de   :  { %v425_v23 = vpop.f32.mrf.mxu1 }
 0x2df   :  { %v4951_v25 = vadd.f32 %v425_v23, %v4946_v20 }
 0x2e1   :  { %v448_v26 = vsel %vm438_vm1, %v4951_v25, -inf }
 0x2e2   :  { %449 = vmax.xlane.f32.xlu1 %v448_v26 }
 0x2e6   :  { %v428_v40 = vpop.f32.mrf.mxu1 }
 0x2e7   :  { %v429_v34 = vadd.f32 %v428_v40, %v4958_v31 }
 0x2e9   :  { %v451_v35 = vsel %vm438_vm1, %v429_v34, -inf }
 0x2ea   :  { %452 = vmax.xlane.f32.xlu0 %v451_v35 }
 0x2ee   :  { %v430_v38 = vpop.f32.mrf.mxu1 }
 0x2ef   :  { %v431_v42 = vadd.f32 %v430_v38, %v4967_v37 }
 0x2f1   :  { %v454_v49 = vsel %vm438_vm1, %v431_v42, -inf }
 0x2f2   :  { %455 = vmax.xlane.f32.xlu2 %v454_v49 }
 0x2f6   :  { %v433_v46 = vpop.f32.mrf.mxu1 }
 0x2f7   :  { %v434_v48 = vadd.f32 %v433_v46, %v4976_v44 }
 0x2f9   :  { %v457_v50 = vsel %vm438_vm1, %v434_v48, -inf }
 0x2fa   :  { %458 = vmax.xlane.f32.xlu1 %v457_v50 }
 0x2fe   :  { %v435_v54 = vpop.f32.mrf.mxu1 }
 0x2ff   :  { %v436_v45 = vadd.f32 %v435_v54, %v4984_v53 }
 0x301   :  { %v460_v61 = vsel %vm438_vm1, %v436_v45, -inf }
 0x302   :  { %461 = vmax.xlane.f32.xlu0 %v460_v61  ;;  %v351_v61 = vld [vmem:[%s6696_s2 + $0x10] sm:$0xf] }
 0x30a   :  { %531 = vrot.lane.b32.xlu2 %v4878_v27, %s4593_s15 }
 0x33d   :  { %v441_v56 = vpop.xlane.xlu1 %440 }
 0x33e   :  { %v463_v63 = vsub.f32 %v4921_v1, %v441_v56 }
 0x340   :  { %v471_v57 = vmul.f32 1.442695, %v463_v63  ;;  %v602_v63 = vsel %vm600_vm14, %v351_v61, 0 }
 0x341   :  { %611 = vmatpush.bf16.msra.mxu3 %v602_v63 }
 0x342   :  { %4211 = vpow2.f32 %v471_v57 }
 0x345   :  { %v444_v62 = vpop.xlane.xlu0 %443 }
 0x346   :  { %v464_v59 = vsub.f32 %v421_v8, %v444_v62 }
 0x348   :  { %v4991_v29 = vpop.eup %4211  ;;  %v473_v0 = vmul.f32 1.442695, %v464_v59 }
 0x349   :  { %v487_v2 = vsel %vm438_vm1, %v4991_v29, 0.0 }
 0x34a   :  { %4213 = vpow2.f32 %v473_v0  ;;  %488 = vadd.xlane.f32.xlu1 %v487_v2 }
 0x34d   :  { %v447_v3 = vpop.xlane.xlu2 %446 }
 0x34e   :  { %v465_v5 = vsub.f32 %v424_v15, %v447_v3 }
 0x350   :  { %v4995_v7 = vpop.eup %4213  ;;  %v475_v9 = vmul.f32 1.442695, %v465_v5 }
 0x351   :  { %v490_v1 = vsel %vm438_vm1, %v4995_v7, 0.0 }
 0x352   :  { %4215 = vpow2.f32 %v475_v9  ;;  %491 = vadd.xlane.f32.xlu0 %v490_v1 }
 0x355   :  { %v450_v24 = vpop.xlane.xlu1 %449 }
 0x356   :  { %v466_v30 = vsub.f32 %v4951_v25, %v450_v24 }
 0x358   :  { %v4999_v43 = vpop.eup %4215  ;;  %v477_v35 = vmul.f32 1.442695, %v466_v30 }
 0x359   :  { %v493_v8 = vsel %vm438_vm1, %v4999_v43, 0.0 }
 0x35a   :  { %494 = vadd.xlane.f32.xlu2 %v493_v8 }
 0x35d   :  { %v453_v23 = vpop.xlane.xlu0 %452 }
 0x35e   :  { %v467_v26 = vsub.f32 %v429_v34, %v453_v23 }
 0x360   :  { %v479_v40 = vmul.f32 1.442695, %v467_v26 }
 0x363   :  { %535 = vrot.lane.b32.xlu1 %v4874_v32, %s4593_s15 }
 0x365   :  { %v456_v11 = vpop.xlane.xlu2 %455 }
 0x366   :  { %v468_v12 = vsub.f32 %v431_v42, %v456_v11  ;;  %533 = vrot.lane.b32.xlu0 %v4868_v14, %s4593_s15 }
 0x368   :  { %v481_v15 = vmul.f32 1.442695, %v468_v12 }
 0x36a   :  { %4217 = vpow2.f32 %v481_v15 }
 0x36b   :  { %4219 = vpow2.f32 %v479_v40 }
 0x36c   :  { %4221 = vpow2.f32 %v477_v35 }
 0x36d   :  { %v459_v36 = vpop.xlane.xlu1 %458  ;;  %v532_v62 = vpop.permute.xlu2 %531 }
 0x36e   :  { %v469_v21 = vsub.f32 %v434_v48, %v459_v36 }
 0x370   :  { %v5007_v18 = vpop.eup %4217  ;;  %v483_v41 = vmul.f32 1.442695, %v469_v21 }
 0x371   :  { %v502_v19 = vsel %vm438_vm1, %v5007_v18, 0.0  ;;  %v5012_v49 = vpop.eup %4219 }
 0x372   :  { %503 = vadd.xlane.f32.xlu2 %v502_v19  ;;  %v4222_v34 = vpop.eup %4221  ;;  %v499_v25 = vsel %vm438_vm1, %v5012_v49, 0.0 }
 0x373   :  { %v496_v46 = vsel %vm438_vm1, %v4222_v34, 0.0 }
 0x375   :  { %v462_v33 = vpop.xlane.xlu0 %461 }
 0x376   :  { %v470_v38 = vsub.f32 %v436_v45, %v462_v33 }
 0x378   :  { %v485_v42 = vmul.f32 1.442695, %v470_v38 }
 0x37a   :  { %4223 = vpow2.f32 %v485_v42 }
 0x37b   :  { %4225 = vpow2.f32 %v483_v41 }
 0x380   :  { %v5019_v50 = vpop.eup %4223 }
 0x381   :  { %v5023_v48 = vpop.eup %4225  ;;  %v508_v54 = vsel %vm438_vm1, %v5019_v50, 0.0 }
 0x382   :  { %v505_v45 = vsel %vm438_vm1, %v5023_v48, 0.0 }
 0x38a   :  { %656 = vrot.lane.b32.xlu2 %v4866_v13, %s4596_s1 }
 0x38d   :  { %500 = vadd.xlane.f32.xlu1 %v499_v25 }
 0x390   :  { %497 = vadd.xlane.f32.xlu0 %v496_v46 }
 0x392   :  { %642 = vrot.lane.b32.xlu2 %v4878_v27, %s4597_s18 }
 0x395   :  { %509 = vadd.xlane.f32.xlu1 %v508_v54 }
 0x398   :  { %506 = vadd.xlane.f32.xlu0 %v505_v45 }
 0x39a   :  { %648 = vrot.lane.b32.xlu2 %v4866_v13, %s4597_s18 }
 0x3a2   :  { %809 = vrot.lane.b32.xlu2 %v4866_v13, %s4598_s19 }
 0x3ac   :  { %654 = vrot.lane.b32.xlu0 %v4874_v32, %s4596_s1 }
 0x3ae   :  { %652 = vrot.lane.b32.xlu1 %v4868_v14, %s4596_s1 }
 0x3b4   :  { %650 = vrot.lane.b32.xlu0 %v4878_v27, %s4596_s1 }
 0x3b6   :  { %644 = vrot.lane.b32.xlu1 %v4868_v14, %s4597_s18 }
 0x3bc   :  { %646 = vrot.lane.b32.xlu0 %v4874_v32, %s4597_s18 }
 0x3bd   :  { %v489_v56 = vpop.xlane.xlu1 %488 }
 0x3c5   :  { %v492_v57 = vpop.xlane.xlu0 %491 }
 0x3c6   :  { %4227 = vrcp.f32 %v492_v57 }
 0x3c7   :  { %4229 = vrcp.f32 %v489_v56 }
 0x3cc   :  { %v4228_v0 = vpop.eup %4227 }
 0x3cd   :  { %v4230_v3 = vpop.eup %4229  ;;  %v520_v5 = vmul.f32 %v4228_v0, %v4995_v7  ;;  %v495_v1 = vpop.xlane.xlu2 %494 }
 0x3ce   :  { %v519_v9 = vmul.f32 %v4230_v3, %v4991_v29  ;;  %4231 = vrcp.f32 %v495_v1 }
 0x3d0   :  { %v527_v8 = vpack.c.bf16 %v520_v5, %v519_v9 }
 0x3d4   :  { %v4232_v7 = vpop.eup %4231 }
 0x3d5   :  { %v536_v59 = vpop.permute.xlu1 %535  ;;  %v521_v29 = vmul.f32 %v4232_v7, %v4999_v43 }
 0x3d6   :  { %560 = vmatpush.bf16.msrb.mxu2 %v536_v59 }
 0x3d8   :  { %v534_v2 = vpop.permute.xlu0 %533 }
 0x3da   :  { %561 = vmatpush.bf16.msrb.mxu2 %v534_v2 }
 0x3de   :  { %562 = vmatpush.bf16.msrb.mxu2 %v532_v62 }
 0x3e1   :  { %3959 = vmatmul.msk.bf16.vlgmr.msrb.gmra.mxu2 %vm438_vm1, %v527_v8 }
 0x3e5   :  { %v504_v11 = vpop.xlane.xlu2 %503 }
 0x3ed   :  { %v657_v12 = vpop.permute.xlu2 %656 }
 0x3ee   :  { %v680_v15 = vsel %vm384_vm11, %v657_v12, 0 }
 0x3ef   :  { %686 = vmatpush.bf16.xpose.msrb.mxu3 %v680_v15 }
 0x3f5   :  { %v643_v19 = vpop.permute.xlu2 %642 }
 0x3fd   :  { %v649_v23 = vpop.permute.xlu2 %648 }
 0x400   :  { %v501_v33 = vpop.xlane.xlu1 %500 }
 0x403   :  { %v498_v24 = vpop.xlane.xlu0 %497 }
 0x404   :  { %4233 = vrcp.f32 %v498_v24 }
 0x405   :  { %v810_v26 = vpop.permute.xlu2 %809  ;;  %4235 = vrcp.f32 %v501_v33 }
 0x406   :  { %831 = vmatpush.bf16.msrb.mxu0 %v810_v26  ;;  %4237 = vrcp.f32 %v504_v11 }
 0x408   :  { %v510_v25 = vpop.xlane.xlu1 %509 }
 0x40a   :  { %v4234_v30 = vpop.eup %4233 }
 0x40b   :  { %v522_v40 = vmul.f32 %v4234_v30, %v4222_v34  ;;  %v4236_v36 = vpop.eup %4235  ;;  %v507_v38 = vpop.xlane.xlu0 %506 }
 0x40c   :  { %v4238_v21 = vpop.eup %4237  ;;  %v523_v42 = vmul.f32 %v4236_v36, %v5012_v49  ;;  %4239 = vrcp.f32 %v507_v38 }
 0x40d   :  { %v528_v35 = vpack.c.bf16 %v522_v40, %v521_v29  ;;  %v524_v41 = vmul.f32 %v4238_v21, %v5007_v18  ;;  %4241 = vrcp.f32 %v510_v25 }
 0x40f   :  { %3960 = vmatmul.msk.bf16.gmra.mxu2 %vm438_vm1, %v528_v35  ;;  %v529_v46 = vpack.c.bf16 %v524_v41, %v523_v42 }
 0x412   :  { %v4240_v45 = vpop.eup %4239 }
 0x413   :  { %v4242_v56 = vpop.eup %4241  ;;  %v525_v49 = vmul.f32 %v4240_v45, %v5023_v48 }
 0x414   :  { %v526_v18 = vmul.f32 %v4242_v56, %v5019_v50 }
 0x416   :  { %v530_v57 = vpack.c.bf16 %v526_v18, %v525_v49 }
 0x41e   :  { %v655_v54 = vpop.permute.xlu0 %654 }
 0x41f   :  { %3961 = vmatmul.msk.bf16.gmra.mxu2 %vm438_vm1, %v529_v46  ;;  %v677_v43 = vsel %vm384_vm11, %v655_v54, 0 }
 0x420   :  { %687 = vmatpush.bf16.xpose.msrb.mxu3 %v677_v43  ;;  %v653_v34 = vpop.permute.xlu1 %652 }
 0x421   :  { %v674_v61 = vsel %vm384_vm11, %v653_v34, 0 }
 0x426   :  { %v651_v63 = vpop.permute.xlu0 %650 }
 0x427   :  { %v671_v62 = vsel %vm384_vm11, %v651_v63, 0 }
 0x428   :  { %688 = vmatpush.bf16.xpose.msrb.mxu3 %v674_v61  ;;  %v645_v15 = vpop.permute.xlu1 %644 }
 0x42e   :  { %v647_v24 = vpop.permute.xlu0 %646 }
 0x42f   :  { %3962 = vmatmul.msk.bf16.gmra.mxu2 %vm438_vm1, %v530_v57 }
 0x430   :  { %689 = vmatpush.bf16.xpose.msrb.mxu3 %v671_v62 }
 0x464   :  { %v564_v59 = vpop.f32.mrf.mxu2 }
 0x46c   :  { %v566_v0 = vpop.f32.mrf.mxu2 }
 0x46d   :  { %v584_v2 = vpack.c.bf16 %v566_v0, %v564_v59 }
 0x46f   :  { %3963 = vmatmul.msk.bf16.vlgmr.msra.gmra.mxu3 %vm384_vm11, %v584_v2 }
 0x492   :  { %v569_v3 = vpop.f32.mrf.mxu2 }
 0x49a   :  { %v571_v5 = vpop.f32.mrf.mxu2 }
 0x49b   :  { %v585_v9 = vpack.c.bf16 %v571_v5, %v569_v3 }
 0x49d   :  { %3964 = vmatmul.msk.bf16.gmra.mxu3 %vm384_vm11, %v585_v9 }
 0x4a2   :  { %v574_v48 = vpop.f32.mrf.mxu2 }
 0x4aa   :  { %v576_v1 = vpop.f32.mrf.mxu2 }
 0x4ab   :  { %v586_v50 = vpack.c.bf16 %v576_v1, %v574_v48 }
 0x4ad   :  { %3965 = vmatmul.msk.bf16.gmra.mxu3 %vm384_vm11, %v586_v50 }
 0x4b2   :  { %v579_v8 = vpop.f32.mrf.mxu2 }
 0x4ba   :  { %v581_v11 = vpop.f32.mrf.mxu2 }
 0x4bb   :  { %v587_v12 = vpack.c.bf16 %v581_v11, %v579_v8 }
 0x4bd   :  { %3966 = vmatmul.msk.bf16.gmra.mxu3 %vm384_vm11, %v587_v12 }
 0x4cd   :  { %3967 = vmatmul.msk.bf16.vlgmr.msrb.gmra.mxu3 %vm384_vm11, %v643_v19 }
 0x4dd   :  { %3968 = vmatmul.msk.bf16.gmra.mxu3 %vm384_vm11, %v645_v15 }
 0x4ed   :  { %3969 = vmatmul.msk.bf16.gmra.mxu3 %vm384_vm11, %v647_v24 }
 0x4f2   :  { %v5070_v26 = vpop.f32.mrf.mxu3 }
 0x4fa   :  { %v5072_v7 = vpop.f32.mrf.mxu3 }
 0x4fd   :  { %3970 = vmatmul.msk.bf16.gmra.mxu3 %vm384_vm11, %v649_v23 }
 0x520   :  { %v5074_v30 = vpop.f32.mrf.mxu3 }
 0x528   :  { %v5076_v29 = vpop.f32.mrf.mxu3 }
 0x530   :  { %v5078_v40 = vpop.f32.mrf.mxu3 }
 0x538   :  { %v5080_v33 = vpop.f32.mrf.mxu3 }
 0x540   :  { %v5082_v19 = vpop.f32.mrf.mxu3 }
 0x548   :  { %v5084_v35 = vpop.f32.mrf.mxu3 }
 0x550   :  { %v691_v36 = vpop.f32.mrf.mxu3 }
 0x551   :  { %v692_v38 = vadd.f32 %v691_v36, %v4916_v55 }
 0x553   :  { %v711_v23 = vsel %vm438_vm1, %v692_v38, -inf }
 0x554   :  { %712 = vmax.xlane.f32.xlu1 %v711_v23 }
 0x558   :  { %v693_v21 = vpop.f32.mrf.mxu3 }
 0x559   :  { %v694_v42 = vadd.f32 %v693_v21, %v4928_v4 }
 0x55b   :  { %v714_v41 = vsel %vm438_vm1, %v694_v42, -inf }
 0x55c   :  { %715 = vmax.xlane.f32.xlu0 %v714_v41 }
 0x560   :  { %v696_v25 = vpop.f32.mrf.mxu3 }
 0x561   :  { %v697_v46 = vadd.f32 %v696_v25, %v4937_v10 }
 0x563   :  { %v717_v54 = vsel %vm438_vm1, %v697_v46, -inf }
 0x564   :  { %718 = vmax.xlane.f32.xlu2 %v717_v54 }
 0x568   :  { %v698_v43 = vpop.f32.mrf.mxu3 }
 0x569   :  { %v699_v34 = vadd.f32 %v698_v43, %v4946_v20 }
 0x56b   :  { %v720_v45 = vsel %vm438_vm1, %v699_v34, -inf }
 0x56c   :  { %721 = vmax.xlane.f32.xlu1 %v720_v45 }
 0x570   :  { %v701_v61 = vpop.f32.mrf.mxu3 }
 0x571   :  { %v702_v56 = vadd.f32 %v701_v61, %v4958_v31 }
 0x573   :  { %v723_v49 = vsel %vm438_vm1, %v702_v56, -inf }
 0x574   :  { %724 = vmax.xlane.f32.xlu0 %v723_v49 }
 0x578   :  { %v703_v18 = vpop.f32.mrf.mxu3 }
 0x579   :  { %v704_v63 = vadd.f32 %v703_v18, %v4967_v37 }
 0x57b   :  { %v726_v57 = vsel %vm438_vm1, %v704_v63, -inf }
 0x57c   :  { %727 = vmax.xlane.f32.xlu2 %v726_v57 }
 0x580   :  { %v706_v62 = vpop.f32.mrf.mxu3 }
 0x581   :  { %v707_v59 = vadd.f32 %v706_v62, %v4976_v44 }
 0x583   :  { %v729_v0 = vsel %vm438_vm1, %v707_v59, -inf }
 0x584   :  { %730 = vmax.xlane.f32.xlu1 %v729_v0 }
 0x588   :  { %v708_v2 = vpop.f32.mrf.mxu3 }
 0x589   :  { %v709_v3 = vadd.f32 %v708_v2, %v4984_v53 }
 0x58b   :  { %v732_v5 = vsel %vm438_vm1, %v709_v3, -inf }
 0x58c   :  { %733 = vmax.xlane.f32.xlu0 %v732_v5 }
 0x594   :  { %803 = vrot.lane.b32.xlu2 %v4878_v27, %s4598_s19 }
 0x5c7   :  { %v713_v9 = vpop.xlane.xlu1 %712 }
 0x5c8   :  { %v735_v48 = vsub.f32 %v692_v38, %v713_v9 }
 0x5ca   :  { %v743_v1 = vmul.f32 1.442695, %v735_v48 }
 0x5cc   :  { %4243 = vpow2.f32 %v743_v1 }
 0x5cf   :  { %v716_v50 = vpop.xlane.xlu0 %715 }
 0x5d0   :  { %v736_v8 = vsub.f32 %v694_v42, %v716_v50 }
 0x5d2   :  { %v5104_v11 = vpop.eup %4243  ;;  %v745_v12 = vmul.f32 1.442695, %v736_v8 }
 0x5d3   :  { %v759_v15 = vsel %vm438_vm1, %v5104_v11, 0.0 }
 0x5d4   :  { %4245 = vpow2.f32 %v745_v12  ;;  %760 = vadd.xlane.f32.xlu1 %v759_v15 }
 0x5d7   :  { %v719_v24 = vpop.xlane.xlu2 %718 }
 0x5d8   :  { %v737_v36 = vsub.f32 %v697_v46, %v719_v24  ;;  %v352_v24 = vld [vmem:[%s6696_s2 + $0x14] sm:$0xf] }
 0x5da   :  { %v5108_v23 = vpop.eup %4245  ;;  %v747_v21 = vmul.f32 1.442695, %v737_v36 }
 0x5db   :  { %v762_v38 = vsel %vm438_vm1, %v5108_v23, 0.0 }
 0x5dc   :  { %4247 = vpow2.f32 %v747_v21  ;;  %763 = vadd.xlane.f32.xlu0 %v762_v38  ;;  %v873_v21 = vsel %vm600_vm14, %v352_v24, 0 }
 0x5dd   :  { %882 = vmatpush.bf16.msra.mxu2 %v873_v21 }
 0x5df   :  { %v722_v49 = vpop.xlane.xlu1 %721 }
 0x5e0   :  { %v738_v57 = vsub.f32 %v699_v34, %v722_v49 }
 0x5e2   :  { %v5112_v41 = vpop.eup %4247  ;;  %v749_v2 = vmul.f32 1.442695, %v738_v57 }
 0x5e3   :  { %v765_v42 = vsel %vm438_vm1, %v5112_v41, 0.0 }
 0x5e4   :  { %766 = vadd.xlane.f32.xlu2 %v765_v42 }
 0x5e7   :  { %v725_v61 = vpop.xlane.xlu0 %724 }
 0x5e8   :  { %v739_v18 = vsub.f32 %v702_v56, %v725_v61 }
 0x5ea   :  { %v751_v62 = vmul.f32 1.442695, %v739_v18 }
 0x5ed   :  { %807 = vrot.lane.b32.xlu1 %v4874_v32, %s4598_s19 }
 0x5ef   :  { %v728_v25 = vpop.xlane.xlu2 %727 }
 0x5f0   :  { %v740_v54 = vsub.f32 %v704_v63, %v728_v25  ;;  %805 = vrot.lane.b32.xlu0 %v4868_v14, %s4598_s19 }
 0x5f2   :  { %v753_v46 = vmul.f32 1.442695, %v740_v54 }
 0x5f4   :  { %4249 = vpow2.f32 %v753_v46 }
 0x5f5   :  { %4251 = vpow2.f32 %v751_v62 }
 0x5f6   :  { %4253 = vpow2.f32 %v749_v2 }
 0x5f7   :  { %v731_v63 = vpop.xlane.xlu1 %730  ;;  %v804_v42 = vpop.permute.xlu2 %803 }
 0x5f8   :  { %v741_v9 = vsub.f32 %v707_v59, %v731_v63 }
 0x5fa   :  { %v5120_v43 = vpop.eup %4249  ;;  %v755_v50 = vmul.f32 1.442695, %v741_v9 }
 0x5fb   :  { %v774_v45 = vsel %vm438_vm1, %v5120_v43, 0.0  ;;  %v5124_v1 = vpop.eup %4251 }
 0x5fc   :  { %775 = vadd.xlane.f32.xlu2 %v774_v45  ;;  %v4254_v8 = vpop.eup %4253  ;;  %v771_v34 = vsel %vm438_vm1, %v5124_v1, 0.0 }
 0x5fd   :  { %v768_v56 = vsel %vm438_vm1, %v4254_v8, 0.0 }
 0x5ff   :  { %v734_v0 = vpop.xlane.xlu0 %733 }
 0x600   :  { %v742_v5 = vsub.f32 %v709_v3, %v734_v0 }
 0x602   :  { %v757_v48 = vmul.f32 1.442695, %v742_v5 }
 0x604   :  { %4255 = vpow2.f32 %v757_v48 }
 0x605   :  { %4257 = vpow2.f32 %v755_v50 }
 0x60a   :  { %v5131_v3 = vpop.eup %4255 }
 0x60b   :  { %v5135_v59 = vpop.eup %4257  ;;  %v780_v12 = vsel %vm438_vm1, %v5131_v3, 0.0 }
 0x60c   :  { %v777_v15 = vsel %vm438_vm1, %v5135_v59, 0.0 }
 0x614   :  { %1196 = vrot.lane.b32.xlu2 %v4866_v13, %s4599_s22 }
 0x617   :  { %772 = vadd.xlane.f32.xlu1 %v771_v34 }
 0x61a   :  { %769 = vadd.xlane.f32.xlu0 %v768_v56 }
 0x61c   :  { %1192 = vrot.lane.b32.xlu2 %v4868_v14, %s4599_s22 }
 0x61f   :  { %781 = vadd.xlane.f32.xlu1 %v780_v12 }
 0x622   :  { %778 = vadd.xlane.f32.xlu0 %v777_v15 }
 0x624   :  { %1190 = vrot.lane.b32.xlu2 %v4878_v27, %s4599_s22 }
 0x62c   :  { %912 = vrot.lane.b32.xlu2 %v4878_v27, %s4600_s23 }
 0x634   :  { %1186 = vrot.lane.b32.xlu2 %v4874_v32, %s4601_s24 }
 0x636   :  { %926 = vrot.lane.b32.xlu0 %v4866_v13, %s4602_s25 }
 0x638   :  { %1194 = vrot.lane.b32.xlu1 %v4874_v32, %s4599_s22 }
 0x63c   :  { %918 = vrot.lane.b32.xlu2 %v4866_v13, %s4600_s23 }
 0x63e   :  { %924 = vrot.lane.b32.xlu0 %v4874_v32, %s4602_s25 }
 0x640   :  { %920 = vrot.lane.b32.xlu1 %v4878_v27, %s4602_s25 }
 0x646   :  { %922 = vrot.lane.b32.xlu0 %v4868_v14, %s4602_s25 }
 0x647   :  { %v761_v36 = vpop.xlane.xlu1 %760 }
 0x648   :  { %1184 = vrot.lane.b32.xlu1 %v4868_v14, %s4601_s24 }
 0x64e   :  { %1182 = vrot.lane.b32.xlu0 %v4878_v27, %s4601_s24 }
 0x64f   :  { %v764_v38 = vpop.xlane.xlu0 %763 }
 0x650   :  { %916 = vrot.lane.b32.xlu1 %v4874_v32, %s4600_s23  ;;  %4259 = vrcp.f32 %v764_v38 }
 0x651   :  { %4261 = vrcp.f32 %v761_v36 }
 0x656   :  { %914 = vrot.lane.b32.xlu0 %v4868_v14, %s4600_s23  ;;  %v4260_v54 = vpop.eup %4259 }
 0x657   :  { %v4262_v45 = vpop.eup %4261  ;;  %v792_v61 = vmul.f32 %v4260_v54, %v5108_v23  ;;  %v767_v18 = vpop.xlane.xlu2 %766 }
 0x658   :  { %v791_v49 = vmul.f32 %v4262_v45, %v5104_v11  ;;  %4263 = vrcp.f32 %v767_v18 }
 0x65a   :  { %v799_v57 = vpack.c.bf16 %v792_v61, %v791_v49 }
 0x65e   :  { %1188 = vrot.lane.b32.xlu0 %v4866_v13, %s4601_s24  ;;  %v4264_v5 = vpop.eup %4263 }
 0x65f   :  { %v808_v25 = vpop.permute.xlu1 %807  ;;  %v793_v48 = vmul.f32 %v4264_v5, %v5112_v41 }
 0x660   :  { %832 = vmatpush.bf16.msrb.mxu0 %v808_v25 }
 0x662   :  { %v806_v46 = vpop.permute.xlu0 %805 }
 0x664   :  { %833 = vmatpush.bf16.msrb.mxu0 %v806_v46 }
 0x668   :  { %834 = vmatpush.bf16.msrb.mxu0 %v804_v42 }
 0x66b   :  { %3971 = vmatmul.msk.bf16.vlgmr.msrb.gmra.mxu0 %vm438_vm1, %v799_v57 }
 0x66f   :  { %v776_v62 = vpop.xlane.xlu2 %775 }
 0x677   :  { %v1197_v0 = vpop.permute.xlu2 %1196 }
 0x678   :  { %v1220_v2 = vsel %vm384_vm11, %v1197_v0, 0 }
 0x679   :  { %1226 = vmatpush.bf16.xpose.msrb.mxu2 %v1220_v2 }
 0x67f   :  { %v1193_v25 = vpop.permute.xlu2 %1192 }
 0x687   :  { %v1191_v57 = vpop.permute.xlu2 %1190 }
 0x688   :  { %v1211_v2 = vsel %vm384_vm11, %v1191_v57, 0 }
 0x68a   :  { %v773_v50 = vpop.xlane.xlu1 %772 }
 0x68d   :  { %v770_v63 = vpop.xlane.xlu0 %769 }
 0x68e   :  { %4265 = vrcp.f32 %v770_v63 }
 0x68f   :  { %4267 = vrcp.f32 %v773_v50 }
 0x690   :  { %4269 = vrcp.f32 %v776_v62 }
 0x692   :  { %v782_v15 = vpop.xlane.xlu1 %781 }
 0x694   :  { %v4266_v9 = vpop.eup %4265 }
 0x695   :  { %v794_v23 = vmul.f32 %v4266_v9, %v4254_v8  ;;  %v4268_v34 = vpop.eup %4267  ;;  %v779_v56 = vpop.xlane.xlu0 %778 }
 0x696   :  { %v4270_v12 = vpop.eup %4269  ;;  %v795_v24 = vmul.f32 %v4268_v34, %v5124_v1  ;;  %4271 = vrcp.f32 %v779_v56  ;;  %v913_v9 = vpop.permute.xlu2 %912 }
 0x697   :  { %v800_v11 = vpack.c.bf16 %v794_v23, %v793_v48  ;;  %v796_v36 = vmul.f32 %v4270_v12, %v5120_v43  ;;  %4273 = vrcp.f32 %v782_v15  ;;  %v1214_v43 = vsel %vm384_vm11, %v1193_v25, 0 }
 0x699   :  { %3972 = vmatmul.msk.bf16.gmra.mxu0 %vm438_vm1, %v800_v11  ;;  %v801_v21 = vpack.c.bf16 %v796_v36, %v795_v24 }
 0x69c   :  { %v4272_v54 = vpop.eup %4271 }
 0x69d   :  { %v4274_v45 = vpop.eup %4273  ;;  %v797_v61 = vmul.f32 %v4272_v54, %v5135_v59 }
 0x69e   :  { %v798_v49 = vmul.f32 %v4274_v45, %v5131_v3  ;;  %v1187_v11 = vpop.permute.xlu2 %1186 }
 0x6a0   :  { %v802_v18 = vpack.c.bf16 %v798_v49, %v797_v61 }
 0x6a6   :  { %v919_v12 = vpop.permute.xlu2 %918 }
 0x6a8   :  { %v927_v38 = vpop.permute.xlu0 %926 }
 0x6a9   :  { %3973 = vmatmul.msk.bf16.gmra.mxu0 %vm438_vm1, %v801_v21  ;;  %v950_v41 = vsel %vm384_vm11, %v927_v38, 0 }
 0x6aa   :  { %v1195_v8 = vpop.permute.xlu1 %1194  ;;  %956 = vmatpush.bf16.xpose.msrb.mxu1 %v950_v41 }
 0x6ab   :  { %v1217_v42 = vsel %vm384_vm11, %v1195_v8, 0 }
 0x6ac   :  { %1227 = vmatpush.bf16.xpose.msrb.mxu2 %v1217_v42 }
 0x6b0   :  { %v925_v46 = vpop.permute.xlu0 %924 }
 0x6b1   :  { %v947_v1 = vsel %vm384_vm11, %v925_v46, 0 }
 0x6b2   :  { %957 = vmatpush.bf16.xpose.msrb.mxu1 %v947_v1  ;;  %v921_v63 = vpop.permute.xlu1 %920 }
 0x6b3   :  { %v941_v5 = vsel %vm384_vm11, %v921_v63, 0 }
 0x6b4   :  { %1228 = vmatpush.bf16.xpose.msrb.mxu2 %v1214_v43 }
 0x6b8   :  { %v923_v62 = vpop.permute.xlu0 %922 }
 0x6b9   :  { %3974 = vmatmul.msk.bf16.gmra.mxu0 %vm438_vm1, %v802_v18  ;;  %v944_v0 = vsel %vm384_vm11, %v923_v62, 0 }
 0x6ba   :  { %958 = vmatpush.bf16.xpose.msrb.mxu1 %v944_v0  ;;  %v1185_v48 = vpop.permute.xlu1 %1184 }
 0x6bc   :  { %1229 = vmatpush.bf16.xpose.msrb.mxu2 %v1211_v2 }
 0x6c0   :  { %v1183_v59 = vpop.permute.xlu0 %1182 }
 0x6c2   :  { %959 = vmatpush.bf16.xpose.msrb.mxu1 %v941_v5  ;;  %v917_v23 = vpop.permute.xlu1 %916 }
 0x6c8   :  { %v915_v3 = vpop.permute.xlu0 %914 }
 0x6c9   :  { %3979 = vmatmul.msk.bf16.vlgmr.msrb.gmra.mxu1 %vm384_vm11, %v913_v9 }
 0x6d9   :  { %3980 = vmatmul.msk.bf16.gmra.mxu1 %vm384_vm11, %v915_v3 }
 0x6e8   :  { %v836_v50 = vpop.f32.mrf.mxu0 }
 0x6e9   :  { %3981 = vmatmul.msk.bf16.gmra.mxu1 %vm384_vm11, %v917_v23 }
 0x6f0   :  { %v838_v34 = vpop.f32.mrf.mxu0 }
 0x6f1   :  { %v856_v56 = vpack.c.bf16 %v838_v34, %v836_v50 }
 0x6f3   :  { %3975 = vmatmul.msk.bf16.vlgmr.msra.gmra.mxu2 %vm384_vm11, %v856_v56 }
 0x6f9   :  { %3982 = vmatmul.msk.bf16.gmra.mxu1 %vm384_vm11, %v919_v12 }
 0x716   :  { %v841_v15 = vpop.f32.mrf.mxu0 }
 0x71e   :  { %v843_v24 = vpop.f32.mrf.mxu0 }
 0x71f   :  { %v857_v36 = vpack.c.bf16 %v843_v24, %v841_v15 }
 0x721   :  { %3976 = vmatmul.msk.bf16.gmra.mxu2 %vm384_vm11, %v857_v36 }
 0x726   :  { %v846_v21 = vpop.f32.mrf.mxu0 }
 0x72e   :  { %v848_v38 = vpop.f32.mrf.mxu0 }
 0x72f   :  { %v858_v41 = vpack.c.bf16 %v848_v38, %v846_v21 }
 0x731   :  { %3977 = vmatmul.msk.bf16.gmra.mxu2 %vm384_vm11, %v858_v41 }
 0x736   :  { %v851_v8 = vpop.f32.mrf.mxu0 }
 0x73e   :  { %v853_v42 = vpop.f32.mrf.mxu0 }
 0x73f   :  { %v859_v25 = vpack.c.bf16 %v853_v42, %v851_v8 }
 0x741   :  { %3978 = vmatmul.msk.bf16.gmra.mxu2 %vm384_vm11, %v859_v25 }
 0x746   :  { %v961_v54 = vpop.f32.mrf.mxu1 }
 0x747   :  { %v962_v46 = vadd.f32 %v961_v54, %v4916_v55 }
 0x749   :  { %v981_v1 = vsel %vm438_vm1, %v962_v46, -inf }
 0x74a   :  { %982 = vmax.xlane.f32.xlu1 %v981_v1 }
 0x74e   :  { %v963_v45 = vpop.f32.mrf.mxu1 }
 0x74f   :  { %v964_v43 = vadd.f32 %v963_v45, %v4928_v4 }
 0x751   :  { %3991 = vmatmul.msk.bf16.vlgmr.msrb.gmra.mxu2 %vm384_vm11, %v1183_v59  ;;  %v984_v61 = vsel %vm438_vm1, %v964_v43, -inf }
 0x752   :  { %985 = vmax.xlane.f32.xlu0 %v984_v61 }
 0x756   :  { %v966_v49 = vpop.f32.mrf.mxu1 }
 0x757   :  { %v5206_v18 = vadd.f32 %v966_v49, %v4937_v10 }
 0x759   :  { %v987_v57 = vsel %vm438_vm1, %v5206_v18, -inf }
 0x75a   :  { %988 = vmax.xlane.f32.xlu2 %v987_v57 }
 0x75e   :  { %v968_v62 = vpop.f32.mrf.mxu1 }
 0x75f   :  { %v5211_v0 = vadd.f32 %v968_v62, %v4946_v20 }
 0x761   :  { %3992 = vmatmul.msk.bf16.gmra.mxu2 %vm384_vm11, %v1185_v48  ;;  %v990_v2 = vsel %vm438_vm1, %v5211_v0, -inf  ;;  %v5227_v48 = vld [vmem:[%s6697_s3 + $0x3] ss:$0 sm:$0xff] }
 0x762   :  { %991 = vmax.xlane.f32.xlu0 %v990_v2  ;;  %v634_v50 = vadd.f32 %v5227_v48, %v5070_v26  ;;  %v1189_v26 = vpop.permute.xlu0 %1188  ;;  %v636_v41 = vadd.f32 %v5227_v48, %v5074_v30  ;;  %v638_v54 = vadd.f32 %v5227_v48, %v5078_v40  ;;  %v640_v30 = vadd.f32 %v5227_v48, %v5082_v19 }
 0x766   :  { %v971_v63 = vpop.f32.mrf.mxu1 }
 0x767   :  { %v5217_v5 = vadd.f32 %v971_v63, %v4958_v31 }
 0x769   :  { %v993_v9 = vsel %vm438_vm1, %v5217_v5, -inf }
 0x76a   :  { %994 = vmax.xlane.f32.xlu0 %v993_v9 }
 0x76e   :  { %v973_v59 = vpop.f32.mrf.mxu1 }
 0x76f   :  { %v5222_v3 = vadd.f32 %v973_v59, %v4967_v37 }
 0x771   :  { %3993 = vmatmul.msk.bf16.gmra.mxu2 %vm384_vm11, %v1187_v11  ;;  %v996_v23 = vsel %vm438_vm1, %v5222_v3, -inf }
 0x772   :  { %997 = vmax.xlane.f32.xlu1 %v996_v23 }
 0x776   :  { %v884_v34 = vpop.f32.mrf.mxu2  ;;  %v976_v56 = vpop.f32.mrf.mxu1 }
 0x777   :  { %v5234_v12 = vadd.f32 %v884_v34, %v634_v50  ;;  %v5237_v15 = vadd.f32 %v976_v56, %v4976_v44 }
 0x779   :  { %v999_v24 = vsel %vm438_vm1, %v5237_v15, -inf }
 0x77a   :  { %1000 = vmax.xlane.f32.xlu1 %v999_v24 }
 0x77e   :  { %v978_v36 = vpop.f32.mrf.mxu1  ;;  %1079 = vrot.lane.b32.xlu0 %v4866_v13, %s4603_s30  ;;  %v5251_v38 = vpop.f32.mrf.mxu2 }
 0x77f   :  { %v5244_v11 = vadd.f32 %v978_v36, %v4984_v53 }
 0x781   :  { %3994 = vmatmul.msk.bf16.gmra.mxu2 %vm384_vm11, %v1189_v26  ;;  %v1002_v21 = vsel %vm438_vm1, %v5244_v11, -inf }
 0x782   :  { %1003 = vmax.xlane.f32.xlu2 %v1002_v21 }
 0x793   :  { %1349 = vrot.lane.b32.xlu1 %v4866_v13, %s4604_s0 }
 0x7a4   :  { %v889_v8 = vpop.f32.mrf.mxu2 }
 0x7a5   :  { %v5255_v42 = vadd.f32 %v889_v8, %v636_v41 }
 0x7ac   :  { %v5257_v25 = vpop.f32.mrf.mxu2 }
 0x7b4   :  { %v894_v1 = vpop.f32.mrf.mxu2 }
 0x7b5   :  { %v5261_v45 = vadd.f32 %v894_v1, %v638_v54 }
 0x7bc   :  { %v5263_v61 = vpop.f32.mrf.mxu2 }
 0x7bd   :  { %v983_v49 = vpop.xlane.xlu1 %982 }
 0x7be   :  { %v1005_v13 = vsub.f32 %v962_v46, %v983_v49 }
 0x7c0   :  { %v1013_v57 = vmul.f32 1.442695, %v1005_v13 }
 0x7c2   :  { %4275 = vpow2.f32 %v1013_v57 }
 0x7c4   :  { %v899_v62 = vpop.f32.mrf.mxu2 }
 0x7c5   :  { %v5267_v2 = vadd.f32 %v899_v62, %v640_v30  ;;  %v986_v63 = vpop.xlane.xlu0 %985 }
 0x7c6   :  { %v1006_v9 = vsub.f32 %v964_v43, %v986_v63 }
 0x7c8   :  { %v5269_v59 = vpop.eup %4275  ;;  %v1015_v40 = vmul.f32 1.442695, %v1006_v9 }
 0x7c9   :  { %v1029_v23 = vsel %vm438_vm1, %v5269_v59, 0.0 }
 0x7ca   :  { %4277 = vpow2.f32 %v1015_v40  ;;  %1030 = vadd.xlane.f32.xlu2 %v1029_v23 }
 0x7cc   :  { %v5273_v50 = vpop.f32.mrf.mxu2 }
 0x7d0   :  { %v5275_v46 = vpop.eup %4277 }
 0x7d1   :  { %v1032_v19 = vsel %vm438_vm1, %v5275_v46, 0.0 }
 0x7d2   :  { %1033 = vadd.xlane.f32.xlu0 %v1032_v19 }
 0x7d4   :  { %v1231_v34 = vpop.f32.mrf.mxu2 }
 0x7d5   :  { %v5280_v24 = vpop.xlane.xlu0 %991  ;;  %v1232_v9 = vadd.f32 %v1231_v34, %v4916_v55 }
 0x7d7   :  { %v1251_v23 = vsel %vm438_vm1, %v1232_v9, -inf }
 0x7dc   :  { %v1233_v56 = vpop.f32.mrf.mxu2 }
 0x7dd   :  { %v1234_v43 = vadd.f32 %v1233_v56, %v4928_v4  ;;  %v5292_v8 = vpop.xlane.xlu0 %994 }
 0x7df   :  { %v1254_v36 = vsel %vm438_vm1, %v1234_v43, -inf }
 0x7e0   :  { %1255 = vmax.xlane.f32.xlu1 %v1254_v36 }
 0x7e2   :  { %1077 = vrot.lane.b32.xlu2 %v4874_v32, %s4603_s30 }
 0x7e4   :  { %v1236_v26 = vpop.f32.mrf.mxu2 }
 0x7e5   :  { %v5286_v21 = vadd.f32 %v1236_v26, %v4937_v10  ;;  %v5294_v49 = vpop.xlane.xlu1 %997 }
 0x7e6   :  { %1347 = vrot.lane.b32.xlu0 %v4874_v32, %s4604_s0 }
 0x7e7   :  { %v1257_v41 = vsel %vm438_vm1, %v5286_v21, -inf }
 0x7e8   :  { %1258 = vmax.xlane.f32.xlu1 %v1257_v41 }
 0x7ec   :  { %v1238_v54 = vpop.f32.mrf.mxu2 }
 0x7ed   :  { %v5296_v30 = vpop.xlane.xlu1 %1000  ;;  %v1239_v56 = vadd.f32 %v1238_v54, %v4946_v20 }
 0x7ef   :  { %v1260_v26 = vsel %vm438_vm1, %v1239_v56, -inf }
 0x7f0   :  { %v1080_v1 = vpop.permute.xlu0 %1079 }
 0x7f1   :  { %1101 = vmatpush.bf16.msra.mxu3 %v1080_v1 }
 0x7f4   :  { %v1241_v13 = vpop.f32.mrf.mxu2 }
 0x7f5   :  { %v5313_v34 = vadd.f32 %v1241_v13, %v4958_v31  ;;  %v989_v13 = vpop.xlane.xlu2 %988 }
 0x7f7   :  { %v1263_v41 = vsel %vm438_vm1, %v5313_v34, -inf }
 0x7fc   :  { %v1243_v57 = vpop.f32.mrf.mxu2 }
 0x7fd   :  { %v5306_v19 = vadd.f32 %v1243_v57, %v4967_v37 }
 0x7ff   :  { %v1266_v36 = vsel %vm438_vm1, %v5306_v19, -inf }
 0x804   :  { %v1246_v62 = vpop.f32.mrf.mxu2 }
 0x805   :  { %v5299_v63 = vadd.f32 %v1246_v62, %v4976_v44  ;;  %v1350_v32 = vpop.permute.xlu1 %1349  ;;  %v5326_v62 = vpop.xlane.xlu2 %1003 }
 0x806   :  { %1371 = vmatpush.bf16.msra.mxu1 %v1350_v32 }
 0x807   :  { %v1269_v40 = vsel %vm438_vm1, %v5299_v63, -inf }
 0x808   :  { %1270 = vmax.xlane.f32.xlu1 %v1269_v40  ;;  %v1007_v40 = vsub.f32 %v5206_v18, %v989_v13 }
 0x80b   :  { %1252 = vmax.xlane.f32.xlu2 %v1251_v23 }
 0x80c   :  { %v1248_v1 = vpop.f32.mrf.mxu2 }
 0x80d   :  { %v5318_v57 = vadd.f32 %v1248_v1, %v4984_v53 }
 0x80f   :  { %v1272_v54 = vsel %vm438_vm1, %v5318_v57, -inf }
 0x810   :  { %1267 = vmax.xlane.f32.xlu0 %v1266_v36  ;;  %v1017_v36 = vmul.f32 1.442695, %v1007_v40 }
 0x812   :  { %4279 = vpow2.f32 %v1017_v36 }
 0x813   :  { %1261 = vmax.xlane.f32.xlu2 %v1260_v26 }
 0x81b   :  { %1264 = vmax.xlane.f32.xlu2 %v1263_v41  ;;  %v5333_v41 = vpop.eup %4279 }
 0x81c   :  { %v1035_v52 = vsel %vm438_vm1, %v5333_v41, 0.0 }
 0x823   :  { %1273 = vmax.xlane.f32.xlu2 %v1272_v54 }
 0x824   :  { %1345 = vrot.lane.b32.xlu0 %v4868_v14, %s4604_s0 }
 0x82c   :  { %1343 = vrot.lane.b32.xlu0 %v4878_v27, %s4604_s0 }
 0x83d   :  { %v5328_v32 = vpop.xlane.xlu2 %1030 }
 0x845   :  { %v1078_v23 = vpop.permute.xlu2 %1077  ;;  %v5331_v26 = vpop.xlane.xlu0 %1033 }
 0x846   :  { %1102 = vmatpush.bf16.msra.mxu3 %v1078_v23 }
 0x853   :  { %v1256_v1 = vpop.xlane.xlu1 %1255 }
 0x854   :  { %v1276_v54 = vsub.f32 %v1234_v43, %v1256_v1 }
 0x856   :  { %v1285_v51 = vmul.f32 1.442695, %v1276_v54  ;;  %1036 = vadd.xlane.f32.xlu0 %v1035_v52 }
 0x858   :  { %4281 = vpow2.f32 %v1285_v51  ;;  %v1348_v44 = vpop.permute.xlu0 %1347  ;;  %v1010_v51 = vsub.f32 %v5222_v3, %v5294_v49 }
 0x859   :  { %1372 = vmatpush.bf16.msra.mxu1 %v1348_v44 }
 0x85b   :  { %v1259_v54 = vpop.xlane.xlu1 %1258 }
 0x85e   :  { %v5337_v37 = vpop.eup %4281 }
 0x85f   :  { %v1302_v18 = vsel %vm438_vm1, %v5337_v37, 0.0 }
 0x860   :  { %1303 = vadd.xlane.f32.xlu2 %v1302_v18  ;;  %v1023_v18 = vmul.f32 1.442695, %v1010_v51 }
 0x878   :  { %1073 = vrot.lane.b32.xlu2 %v4878_v27, %s4603_s30 }
 0x87e   :  { %v1253_v13 = vpop.xlane.xlu2 %1252 }
 0x87f   :  { %v1275_v40 = vsub.f32 %v1232_v9, %v1253_v13  ;;  %v1277_v9 = vsub.f32 %v5286_v21, %v1259_v54 }
 0x881   :  { %v1283_v43 = vmul.f32 1.442695, %v1275_v40  ;;  %v1287_v49 = vmul.f32 1.442695, %v1277_v9 }
 0x883   :  { %4283 = vpow2.f32 %v1283_v43  ;;  %v1268_v27 = vpop.xlane.xlu0 %1267 }
 0x884   :  { %v1280_v51 = vsub.f32 %v5306_v19, %v1268_v27 }
 0x886   :  { %v1262_v23 = vpop.xlane.xlu2 %1261 }
 0x887   :  { %v1278_v36 = vsub.f32 %v1239_v56, %v1262_v23  ;;  %v1011_v56 = vsub.f32 %v5237_v15, %v5296_v30  ;;  %v1293_v30 = vmul.f32 1.442695, %v1280_v51 }
 0x889   :  { %v5343_v1 = vpop.eup %4283  ;;  %v1289_v52 = vmul.f32 1.442695, %v1278_v36  ;;  %v1025_v40 = vmul.f32 1.442695, %v1011_v56 }
 0x88a   :  { %v1299_v44 = vsel %vm438_vm1, %v5343_v1, 0.0 }
 0x88b   :  { %4285 = vpow2.f32 %v1289_v52  ;;  %1300 = vadd.xlane.f32.xlu1 %v1299_v44  ;;  %v1271_v52 = vpop.xlane.xlu1 %1270 }
 0x88c   :  { %4287 = vpow2.f32 %v1023_v18  ;;  %v1281_v56 = vsub.f32 %v5299_v63, %v1271_v52 }
 0x88d   :  { %4289 = vpow2.f32 %v1287_v49 }
 0x88e   :  { %v1265_v53 = vpop.xlane.xlu2 %1264  ;;  %4291 = vpow2.f32 %v1025_v40  ;;  %v1295_v27 = vmul.f32 1.442695, %v1281_v56 }
 0x88f   :  { %4293 = vpow2.f32 %v1293_v30  ;;  %v1279_v52 = vsub.f32 %v5313_v34, %v1265_v53 }
 0x891   :  { %v5350_v13 = vpop.eup %4285 }
 0x892   :  { %v1308_v3 = vsel %vm438_vm1, %v5350_v13, 0.0  ;;  %v5356_v36 = vpop.eup %4287 }
 0x893   :  { %1309 = vadd.xlane.f32.xlu0 %v1308_v3  ;;  %v1044_v15 = vsel %vm438_vm1, %v5356_v36, 0.0  ;;  %v5362_v44 = vpop.eup %4289 }
 0x894   :  { %v5364_v9 = vpop.eup %4291  ;;  %v1305_v19 = vsel %vm438_vm1, %v5362_v44, 0.0 }
 0x895   :  { %v5373_v3 = vpop.eup %4293 }
 0x896   :  { %v1274_v43 = vpop.xlane.xlu2 %1273  ;;  %v1346_v23 = vpop.permute.xlu0 %1345  ;;  %v1314_v63 = vsel %vm438_vm1, %v5373_v3, 0.0 }
 0x897   :  { %1373 = vmatpush.bf16.msra.mxu1 %v1346_v23  ;;  %v1282_v21 = vsub.f32 %v5318_v57, %v1274_v43  ;;  %v1047_v57 = vsel %vm438_vm1, %v5364_v9, 0.0 }
 0x899   :  { %v1297_v54 = vmul.f32 1.442695, %v1282_v21  ;;  %v1009_v21 = vsub.f32 %v5217_v5, %v5292_v8 }
 0x89b   :  { %1045 = vadd.xlane.f32.xlu0 %v1044_v15  ;;  %4295 = vpow2.f32 %v1297_v54  ;;  %v1021_v15 = vmul.f32 1.442695, %v1009_v21 }
 0x89c   :  { %4297 = vpow2.f32 %v1295_v27 }
 0x89e   :  { %v1344_v18 = vpop.permute.xlu0 %1343 }
 0x89f   :  { %1374 = vmatpush.bf16.msra.mxu1 %v1344_v18  ;;  %v1291_v18 = vmul.f32 1.442695, %v1279_v52 }
 0x8a1   :  { %1306 = vadd.xlane.f32.xlu2 %v1305_v19  ;;  %v5375_v49 = vpop.eup %4295  ;;  %v1012_v19 = vsub.f32 %v5244_v11, %v5326_v62 }
 0x8a2   :  { %v1320_v40 = vsel %vm438_vm1, %v5375_v49, 0.0  ;;  %v5381_v43 = vpop.eup %4297 }
 0x8a3   :  { %1048 = vadd.xlane.f32.xlu0 %v1047_v57  ;;  %v1317_v23 = vsel %vm438_vm1, %v5381_v43, 0.0  ;;  %v1027_v5 = vmul.f32 1.442695, %v1012_v19 }
 0x8a4   :  { %1075 = vrot.lane.b32.xlu1 %v4868_v14, %s4603_s30  ;;  %v1008_v14 = vsub.f32 %v5211_v0, %v5280_v24 }
 0x8a6   :  { %v1019_v51 = vmul.f32 1.442695, %v1008_v14 }
 0x8a8   :  { %4299 = vpow2.f32 %v1019_v51 }
 0x8a9   :  { %1315 = vadd.xlane.f32.xlu2 %v1314_v63  ;;  %4301 = vpow2.f32 %v1021_v15 }
 0x8aa   :  { %4303 = vpow2.f32 %v1291_v18 }
 0x8ab   :  { %1321 = vadd.xlane.f32.xlu0 %v1320_v40  ;;  %4305 = vpow2.f32 %v1027_v5 }
 0x8ae   :  { %v4300_v30 = vpop.eup %4299 }
 0x8af   :  { %v1038_v54 = vsel %vm438_vm1, %v4300_v30, 0.0  ;;  %v5391_v56 = vpop.eup %4301 }
 0x8b0   :  { %v1041_v0 = vsel %vm438_vm1, %v5391_v56, 0.0  ;;  %v5397_v24 = vpop.eup %4303 }
 0x8b1   :  { %1318 = vadd.xlane.f32.xlu2 %v1317_v23  ;;  %v1311_v53 = vsel %vm438_vm1, %v5397_v24, 0.0  ;;  %v5401_v8 = vpop.eup %4305 }
 0x8b2   :  { %v1050_v34 = vsel %vm438_vm1, %v5401_v8, 0.0 }
 0x8c9   :  { %v1037_v23 = vpop.xlane.xlu0 %1036 }
 0x8ce   :  { %1039 = vadd.xlane.f32.xlu1 %v1038_v54 }
 0x8d3   :  { %v1304_v11 = vpop.xlane.xlu2 %1303 }
 0x8d4   :  { %4307 = vrcp.f32 %v1304_v11 }
 0x8d6   :  { %1042 = vadd.xlane.f32.xlu1 %v1041_v0 }
 0x8da   :  { %v4308_v57 = vpop.eup %4307 }
 0x8db   :  { %v1332_v63 = vmul.f32 %v4308_v57, %v5337_v37  ;;  %v1074_v51 = vpop.permute.xlu2 %1073 }
 0x8de   :  { %1312 = vadd.xlane.f32.xlu1 %v1311_v53 }
 0x8e6   :  { %1051 = vadd.xlane.f32.xlu1 %v1050_v34 }
 0x8fe   :  { %v1301_v62 = vpop.xlane.xlu1 %1300 }
 0x8ff   :  { %4309 = vrcp.f32 %v1301_v62 }
 0x900   :  { %4311 = vrcp.f32 %v5331_v26 }
 0x901   :  { %4313 = vrcp.f32 %v5328_v32 }
 0x905   :  { %v4310_v27 = vpop.eup %4309 }
 0x906   :  { %v1331_v40 = vmul.f32 %v4310_v27, %v5343_v1  ;;  %v1310_v21 = vpop.xlane.xlu0 %1309  ;;  %v4312_v52 = vpop.eup %4311 }
 0x907   :  { %4315 = vrcp.f32 %v1310_v21  ;;  %v4314_v18 = vpop.eup %4313  ;;  %v1062_v37 = vmul.f32 %v4312_v52, %v5275_v46 }
 0x908   :  { %v1339_v14 = vpack.c.bf16 %v1332_v63, %v1331_v40  ;;  %v1061_v19 = vmul.f32 %v4314_v18, %v5269_v59 }
 0x90a   :  { %3995 = vmatmul.msk.bf16.vlgmr.msra.gmra.mxu1 %vm438_vm1, %v1339_v14  ;;  %v1069_v5 = vpack.c.bf16 %v1062_v37, %v1061_v19 }
 0x90d   :  { %v4316_v1 = vpop.eup %4315 }
 0x90e   :  { %v1334_v53 = vmul.f32 %v4316_v1, %v5350_v13  ;;  %v1046_v62 = vpop.xlane.xlu0 %1045 }
 0x914   :  { %v1307_v15 = vpop.xlane.xlu2 %1306 }
 0x915   :  { %4317 = vrcp.f32 %v1307_v15 }
 0x916   :  { %v1076_v54 = vpop.permute.xlu1 %1075  ;;  %4319 = vrcp.f32 %v1037_v23 }
 0x917   :  { %1103 = vmatpush.bf16.msra.mxu3 %v1076_v54 }
 0x91b   :  { %v4318_v0 = vpop.eup %4317  ;;  %1104 = vmatpush.bf16.msra.mxu3 %v1074_v51 }
 0x91c   :  { %v1333_v26 = vmul.f32 %v4318_v0, %v5362_v44  ;;  %v4320_v11 = vpop.eup %4319  ;;  %v1316_v40 = vpop.xlane.xlu2 %1315 }
 0x91d   :  { %v1063_v59 = vmul.f32 %v4320_v11, %v5333_v41  ;;  %v1049_v44 = vpop.xlane.xlu0 %1048  ;;  %v354_v11 = vld [vmem:[%s6696_s2 + $0x1c] sm:$0xf] }
 0x91e   :  { %3983 = vmatmul.msk.bf16.vlgmr.msra.gmra.mxu3 %vm438_vm1, %v1069_v5  ;;  %v1340_v32 = vpack.c.bf16 %v1334_v53, %v1333_v26 }
 0x920   :  { %3996 = vmatmul.msk.bf16.gmra.mxu1 %vm438_vm1, %v1340_v32 }
 0x924   :  { %v1319_v54 = vpop.xlane.xlu2 %1318 }
 0x925   :  { %v1322_v19 = vpop.xlane.xlu0 %1321 }
 0x941   :  { %v1040_v34 = vpop.xlane.xlu1 %1039 }
 0x942   :  { %4321 = vrcp.f32 %v1040_v34 }
 0x948   :  { %v4322_v46 = vpop.eup %4321 }
 0x949   :  { %v1043_v57 = vpop.xlane.xlu1 %1042  ;;  %v1064_v27 = vmul.f32 %v4322_v46, %v4300_v30  ;;  %v1413_v46 = vsel %vm600_vm14, %v354_v11, 0 }
 0x94a   :  { %4323 = vrcp.f32 %v1043_v57  ;;  %1422 = vmatpush.bf16.msrb.mxu3 %v1413_v46 }
 0x94b   :  { %v1070_v63 = vpack.c.bf16 %v1064_v27, %v1063_v59  ;;  %4325 = vrcp.f32 %v1046_v62 }
 0x94c   :  { %4327 = vrcp.f32 %v1316_v40 }
 0x94d   :  { %3984 = vmatmul.msk.bf16.gmra.mxu3 %vm438_vm1, %v1070_v63 }
 0x950   :  { %v4324_v23 = vpop.eup %4323 }
 0x951   :  { %v1313_v13 = vpop.xlane.xlu1 %1312  ;;  %v4326_v14 = vpop.eup %4325  ;;  %v1065_v21 = vmul.f32 %v4324_v23, %v5391_v56 }
 0x952   :  { %4329 = vrcp.f32 %v1313_v13  ;;  %v4328_v51 = vpop.eup %4327  ;;  %v1066_v52 = vmul.f32 %v4326_v14, %v5356_v36 }
 0x953   :  { %v1336_v30 = vmul.f32 %v4328_v51, %v5373_v3  ;;  %4331 = vrcp.f32 %v1319_v54 }
 0x954   :  { %v1071_v37 = vpack.c.bf16 %v1066_v52, %v1065_v21 }
 0x958   :  { %v4330_v15 = vpop.eup %4329 }
 0x959   :  { %v1335_v41 = vmul.f32 %v4330_v15, %v5397_v24  ;;  %v1052_v18 = vpop.xlane.xlu1 %1051  ;;  %v4332_v56 = vpop.eup %4331 }
 0x95a   :  { %4333 = vrcp.f32 %v1052_v18  ;;  %v1337_v3 = vmul.f32 %v4332_v56, %v5381_v43  ;;  %v353_v43 = vld [vmem:[%s6696_s2 + $0x18] sm:$0xf] }
 0x95b   :  { %v1341_v1 = vpack.c.bf16 %v1336_v30, %v1335_v41  ;;  %4335 = vrcp.f32 %v1049_v44 }
 0x95c   :  { %4337 = vrcp.f32 %v1322_v19 }
 0x95d   :  { %3985 = vmatmul.msk.bf16.gmra.mxu3 %vm438_vm1, %v1071_v37  ;;  %3997 = vmatmul.msk.bf16.gmra.mxu1 %vm438_vm1, %v1341_v1 }
 0x960   :  { %v4334_v0 = vpop.eup %4333 }
 0x961   :  { %v4336_v36 = vpop.eup %4335  ;;  %v1068_v24 = vmul.f32 %v4334_v0, %v5401_v8 }
 0x962   :  { %v4338_v5 = vpop.eup %4337  ;;  %v1067_v26 = vmul.f32 %v4336_v36, %v5364_v9  ;;  %v1143_v9 = vsel %vm600_vm14, %v353_v43, 0 }
 0x963   :  { %v1338_v53 = vmul.f32 %v4338_v5, %v5375_v49  ;;  %1152 = vmatpush.bf16.msra.mxu0 %v1143_v9 }
 0x964   :  { %v1072_v32 = vpack.c.bf16 %v1068_v24, %v1067_v26 }
 0x965   :  { %v1342_v34 = vpack.c.bf16 %v1338_v53, %v1337_v3  ;;  %v635_v3 = vadd.f32 %v5227_v48, %v5072_v7 }
 0x967   :  { %v905_v53 = vadd.f32 %v5251_v38, %v635_v3 }
 0x96d   :  { %3986 = vmatmul.msk.bf16.gmra.mxu3 %vm438_vm1, %v1072_v32  ;;  %3998 = vmatmul.msk.bf16.gmra.mxu1 %vm438_vm1, %v1342_v34 }
 0x987   :  { %v1376_v49 = vpop.f32.mrf.mxu1 }
 0x98f   :  { %v1378_v8 = vpop.f32.mrf.mxu1 }
 0x990   :  { %v1396_v62 = vpack.c.bf16 %v1378_v8, %v1376_v49 }
 0x992   :  { %3999 = vmatmul.msk.bf16.vlgmr.msrb.gmra.mxu3 %vm384_vm11, %v1396_v62 }
 0x99d   :  { %v1381_v57 = vpop.f32.mrf.mxu1 }
 0x9a1   :  { %v1106_v59 = vpop.f32.mrf.mxu3 }
 0x9a5   :  { %v1383_v27 = vpop.f32.mrf.mxu1 }
 0x9a6   :  { %v1397_v63 = vpack.c.bf16 %v1383_v27, %v1381_v57 }
 0x9a8   :  { %4000 = vmatmul.msk.bf16.gmra.mxu3 %vm384_vm11, %v1397_v63 }
 0x9a9   :  { %v1108_v40 = vpop.f32.mrf.mxu3 }
 0x9aa   :  { %v1126_v13 = vpack.c.bf16 %v1108_v40, %v1106_v59 }
 0x9ac   :  { %3987 = vmatmul.msk.bf16.vlgmr.msra.gmra.mxu0 %vm384_vm11, %v1126_v13 }
 0x9d0   :  { %v1111_v44 = vpop.f32.mrf.mxu3 }
 0x9d8   :  { %v1113_v23 = vpop.f32.mrf.mxu3 }
 0x9d9   :  { %v1127_v14 = vpack.c.bf16 %v1113_v23, %v1111_v44 }
 0x9da   :  { %v1386_v51 = vpop.f32.mrf.mxu1 }
 0x9db   :  { %3988 = vmatmul.msk.bf16.gmra.mxu0 %vm384_vm11, %v1127_v14 }
 0x9e0   :  { %v1116_v21 = vpop.f32.mrf.mxu3 }
 0x9e2   :  { %v1388_v15 = vpop.f32.mrf.mxu1 }
 0x9e3   :  { %v1398_v52 = vpack.c.bf16 %v1388_v15, %v1386_v51 }
 0x9e5   :  { %4001 = vmatmul.msk.bf16.gmra.mxu3 %vm384_vm11, %v1398_v52 }
 0x9e8   :  { %v1118_v41 = vpop.f32.mrf.mxu3 }
 0x9e9   :  { %v1128_v30 = vpack.c.bf16 %v1118_v41, %v1116_v21 }
 0x9ea   :  { %v1391_v54 = vpop.f32.mrf.mxu1 }
 0x9eb   :  { %3989 = vmatmul.msk.bf16.gmra.mxu0 %vm384_vm11, %v1128_v30 }
 0x9f0   :  { %v1121_v18 = vpop.f32.mrf.mxu3 }
 0x9f2   :  { %v1393_v37 = vpop.f32.mrf.mxu1 }
 0x9f3   :  { %v1399_v1 = vpack.c.bf16 %v1393_v37, %v1391_v54 }
 0x9f5   :  { %4002 = vmatmul.msk.bf16.gmra.mxu3 %vm384_vm11, %v1399_v1  ;;  %v641_v1 = vadd.f32 %v5227_v48, %v5084_v35 }
 0x9f8   :  { %v1123_v19 = vpop.f32.mrf.mxu3 }
 0x9f9   :  { %v1129_v56 = vpack.c.bf16 %v1123_v19, %v1121_v18 }
 0x9fb   :  { %3990 = vmatmul.msk.bf16.gmra.mxu0 %vm384_vm11, %v1129_v56 }
 0xa15   :  { %v1424_v0 = vpop.f32.mrf.mxu3 }
 0xa1d   :  { %v1426_v46 = vpop.f32.mrf.mxu3 }
 0xa29   :  { %v1154_v36 = vpop.f32.mrf.mxu0 }
 0xa2a   :  { %v1174_v5 = vadd.f32 %v1154_v36, %v5234_v12 }
 0xa2b   :  { %v1429_v12 = vpop.f32.mrf.mxu3 }
 0xa2c   :  { %v1444_v24 = vadd.f32 %v1424_v0, %v1174_v5 }
 0xa2e   :  { %v1452_v26 = vadd.f32 %v1444_v24, %v4802_v16  ;;  %v637_v16 = vadd.f32 %v5227_v48, %v5076_v29 }
 0xa30   :  { %v1462_v32 = vsel %vm78_vm0, %v1452_v26, 0.0  ;;  %v907_v57 = vadd.f32 %v5257_v25, %v637_v16 }
 0xa31   :  { %v1156_v34 = vpop.f32.mrf.mxu0  ;;  %1463 = vadd.xlane.f32.xlu1 %v1462_v32 }
 0xa32   :  { %v1175_v11 = vadd.f32 %v1156_v34, %v905_v53 }
 0xa33   :  { %v1431_v27 = vpop.f32.mrf.mxu3 }
 0xa34   :  { %v1445_v43 = vadd.f32 %v1426_v46, %v1175_v11 }
 0xa36   :  { %v1453_v9 = vadd.f32 %v1445_v43, %v4805_v17 }
 0xa38   :  { %v1465_v49 = vsel %vm78_vm0, %v1453_v9, 0.0 }
 0xa39   :  { %1466 = vadd.xlane.f32.xlu2 %v1465_v49 }
 0xa58   :  { %v1159_v8 = vpop.f32.mrf.mxu0 }
 0xa59   :  { %v1176_v7 = vadd.f32 %v1159_v8, %v5255_v42 }
 0xa5b   :  { %v1446_v62 = vadd.f32 %v1429_v12, %v1176_v7 }
 0xa5d   :  { %v1454_v38 = vadd.f32 %v1446_v62, %v4845_v47  ;;  %v639_v47 = vadd.f32 %v5227_v48, %v5080_v33 }
 0xa5f   :  { %v1468_v59 = vsel %vm78_vm0, %v1454_v38, 0.0  ;;  %v909_v51 = vadd.f32 %v5263_v61, %v639_v47 }
 0xa60   :  { %v1161_v63 = vpop.f32.mrf.mxu0  ;;  %1469 = vadd.xlane.f32.xlu0 %v1468_v59 }
 0xa61   :  { %v1177_v17 = vadd.f32 %v1161_v63, %v907_v57 }
 0xa63   :  { %v1447_v40 = vadd.f32 %v1431_v27, %v1177_v17 }
 0xa65   :  { %v1455_v13 = vadd.f32 %v1447_v40, %v4841_v28 }
 0xa67   :  { %v1471_v44 = vsel %vm78_vm0, %v1455_v13, 0.0 }
 0xa68   :  { %v1164_v42 = vpop.f32.mrf.mxu0  ;;  %1472 = vadd.xlane.f32.xlu1 %v1471_v44  ;;  %v1434_v23 = vpop.f32.mrf.mxu3 }
 0xa69   :  { %v1178_v29 = vadd.f32 %v1164_v42, %v5261_v45 }
 0xa6b   :  { %v1448_v14 = vadd.f32 %v1434_v23, %v1178_v29 }
 0xa6d   :  { %v1456_v25 = vadd.f32 %v1448_v14, %v4858_v60 }
 0xa6f   :  { %v1474_v21 = vsel %vm78_vm0, %v1456_v25, 0.0 }
 0xa70   :  { %v1166_v15 = vpop.f32.mrf.mxu0  ;;  %1475 = vadd.xlane.f32.xlu2 %v1474_v21  ;;  %v1436_v28 = vpop.f32.mrf.mxu3 }
 0xa71   :  { %v1179_v52 = vadd.f32 %v1166_v15, %v909_v51  ;;  %v4140_v15 = vld [vmem:[%s6696_s2 + $0x20] sm:$0xff] }
 0xa73   :  { %v1449_v41 = vadd.f32 %v1436_v28, %v1179_v52 }
 0xa75   :  { %v1457_v30 = vadd.f32 %v1449_v41, %v4855_v58  ;;  %v911_v58 = vadd.f32 %v5273_v50, %v641_v1 }
 0xa77   :  { %v1477_v54 = vsel %vm78_vm0, %v1457_v30, 0.0 }
 0xa78   :  { %1478 = vadd.xlane.f32.xlu0 %v1477_v54  ;;  %v1169_v45 = vpop.f32.mrf.mxu0  ;;  %v1439_v33 = vpop.f32.mrf.mxu3 }
 0xa79   :  { %v1180_v18 = vadd.f32 %v1169_v45, %v5267_v2 }
 0xa7b   :  { %v1450_v37 = vadd.f32 %v1439_v33, %v1180_v18 }
 0xa7d   :  { %v1458_v60 = vadd.f32 %v1450_v37, %v4829_v6 }
 0xa7f   :  { %v1480_v61 = vsel %vm78_vm0, %v1458_v60, 0.0 }
 0xa80   :  { %1481 = vadd.xlane.f32.xlu0 %v1480_v61  ;;  %v1171_v19 = vpop.f32.mrf.mxu0  ;;  %v1441_v24 = vpop.f32.mrf.mxu3 }
 0xa81   :  { %v1181_v36 = vadd.f32 %v1171_v19, %v911_v58 }
 0xa83   :  { %v1451_v6 = vadd.f32 %v1441_v24, %v1181_v36 }
 0xa85   :  { %v1459_v50 = vadd.f32 %v1451_v6, %v4832_v39 }
 0xa87   :  { %v1483_v34 = vsel %vm78_vm0, %v1459_v50, 0.0 }
 0xaa4   :  { %v1464_v56 = vpop.xlane.xlu1 %1463 }
 0xaa5   :  { %v1486_v0 = vmul.f32 %v1464_v56, %v4667_v22 }
 0xaa7   :  { %v5477_v5 = vsub.f32 %v1452_v26, %v1486_v0 }
 0xaa9   :  { %v1502_v2 = vmul.f32 %v5477_v5, %v5477_v5 }
 0xaab   :  { %v1510_v3 = vsel %vm78_vm0, %v1502_v2, 0.0 }
 0xaac   :  { %v1467_v53 = vpop.xlane.xlu2 %1466  ;;  %1511 = vadd.xlane.f32.xlu1 %v1510_v3 }
 0xaad   :  { %v1487_v35 = vmul.f32 %v1467_v53, %v4667_v22  ;;  %v5537_v53 = vld [vmem:[%s6697_s3 + $0x4] ss:$0 sm:$0xff] }
 0xaaf   :  { %v5483_v48 = vsub.f32 %v1453_v9, %v1487_v35 }
 0xab1   :  { %v1503_v32 = vmul.f32 %v5483_v48, %v5483_v48 }
 0xab3   :  { %v1513_v26 = vsel %vm78_vm0, %v1503_v32, 0.0 }
 0xab4   :  { %1514 = vadd.xlane.f32.xlu2 %v1513_v26  ;;  %1484 = vadd.xlane.f32.xlu1 %v1483_v34 }
 0xad3   :  { %v1470_v11 = vpop.xlane.xlu0 %1469 }
 0xad4   :  { %v1488_v46 = vmul.f32 %v1470_v11, %v4667_v22  ;;  %v5545_v11 = vld [vmem:[%s6697_s3 + $0x5] ss:$0 sm:$0xff] }
 0xad6   :  { %v5491_v43 = vsub.f32 %v1454_v38, %v1488_v46 }
 0xad8   :  { %v1504_v9 = vmul.f32 %v5491_v43, %v5491_v43 }
 0xada   :  { %v1516_v49 = vsel %vm78_vm0, %v1504_v9, 0.0 }
 0xadb   :  { %v1473_v39 = vpop.xlane.xlu1 %1472  ;;  %1517 = vadd.xlane.f32.xlu2 %v1516_v49 }
 0xadc   :  { %v1489_v12 = vmul.f32 %v1473_v39, %v4667_v22 }
 0xade   :  { %v5497_v8 = vsub.f32 %v1455_v13, %v1489_v12 }
 0xae0   :  { %v1505_v7 = vmul.f32 %v5497_v8, %v5497_v8 }
 0xae2   :  { %v1519_v62 = vsel %vm78_vm0, %v1505_v7, 0.0 }
 0xae3   :  { %v1476_v16 = vpop.xlane.xlu2 %1475  ;;  %1520 = vadd.xlane.f32.xlu0 %v1519_v62 }
 0xae4   :  { %v1490_v38 = vmul.f32 %v1476_v16, %v4667_v22 }
 0xae6   :  { %v5503_v57 = vsub.f32 %v1456_v25, %v1490_v38  ;;  %v4141_v25 = vld [vmem:[%s6696_s2 + $0x28] sm:$0xff] }
 0xae7   :  { %1696 = vmatpush.bf16.msrb.mxu0 %v4141_v25 }
 0xae8   :  { %v1506_v59 = vmul.f32 %v5503_v57, %v5503_v57 }
 0xaea   :  { %v1522_v27 = vsel %vm78_vm0, %v1506_v59, 0.0 }
 0xaeb   :  { %1523 = vadd.xlane.f32.xlu1 %v1522_v27  ;;  %v1479_v63 = vpop.xlane.xlu0 %1478  ;;  %1697 = vmatpush.bf16.msrb.mxu0 %v4140_v15 }
 0xaec   :  { %v1491_v17 = vmul.f32 %v1479_v63, %v4667_v22 }
 0xaee   :  { %v5509_v40 = vsub.f32 %v1457_v30, %v1491_v17 }
 0xaf0   :  { %v1507_v13 = vmul.f32 %v5509_v40, %v5509_v40 }
 0xaf2   :  { %v1525_v44 = vsel %vm78_vm0, %v1507_v13, 0.0 }
 0xaf3   :  { %1526 = vadd.xlane.f32.xlu2 %v1525_v44  ;;  %v1482_v42 = vpop.xlane.xlu0 %1481 }
 0xaf4   :  { %v1492_v23 = vmul.f32 %v1482_v42, %v4667_v22 }
 0xaf6   :  { %v5515_v29 = vsub.f32 %v1458_v60, %v1492_v23 }
 0xaf8   :  { %v1508_v14 = vmul.f32 %v5515_v29, %v5515_v29 }
 0xafa   :  { %v1528_v47 = vsel %vm78_vm0, %v1508_v14, 0.0 }
 0xafb   :  { %1529 = vadd.xlane.f32.xlu0 %v1528_v47 }
 0xb1f   :  { %v1512_v51 = vpop.xlane.xlu1 %1511 }
 0xb20   :  { %v1534_v21 = vmul.f32 %v1512_v51, %v4667_v22 }
 0xb22   :  { %v1542_v28 = vadd.f32 1e-12, %v1534_v21 }
 0xb24   :  { %4339 = vrsqrt.f32 %v1542_v28  ;;  %vm1556_vm5 = vweird.f32 %v1542_v28 }
 0xb27   :  { %v1515_v52 = vpop.xlane.xlu2 %1514  ;;  %v1485_v41 = vpop.xlane.xlu1 %1484 }
 0xb28   :  { %v1535_v30 = vmul.f32 %v1515_v52, %v4667_v22  ;;  %v1493_v54 = vmul.f32 %v1485_v41, %v4667_v22 }
 0xb2a   :  { %v4340_v45 = vpop.eup %4339  ;;  %v1543_v18 = vadd.f32 1e-12, %v1535_v30  ;;  %v5529_v33 = vsub.f32 %v1459_v50, %v1493_v54 }
 0xb2b   :  { %v1551_v37 = vmul.f32 %v4340_v45, %v1542_v28  ;;  %vm1557_vm4 = vweird.f32 %v4340_v45 }
 0xb2c   :  { %4341 = vrsqrt.f32 %v1543_v18  ;;  %v1509_v60 = vmul.f32 %v5529_v33, %v5529_v33  ;;  %vm1558_vm6 = vmor %vm1556_vm5, %vm1557_vm4  ;;  %vm1566_vm8 = vweird.f32 %v1543_v18 }
 0xb2d   :  { %v1552_v61 = vmul.f32 %v4340_v45, %v1551_v37 }
 0xb2e   :  { %v1531_v1 = vsel %vm78_vm0, %v1509_v60, 0.0 }
 0xb2f   :  { %v1553_v19 = vmul.f32 0.5, %v1552_v61  ;;  %1532 = vadd.xlane.f32.xlu1 %v1531_v1 }
 0xb31   :  { %v1554_v56 = vsub.f32 1.5, %v1553_v19 }
 0xb32   :  { %v4342_v58 = vpop.eup %4341 }
 0xb33   :  { %v1555_v0 = vmul.f32 %v4340_v45, %v1554_v56  ;;  %v1561_v36 = vmul.f32 %v4342_v58, %v1543_v18  ;;  %vm1567_vm7 = vweird.f32 %v4342_v58 }
 0xb34   :  { %vm1568_vm9 = vmor %vm1566_vm8, %vm1567_vm7 }
 0xb35   :  { %v1562_v2 = vmul.f32 %v4342_v58, %v1561_v36  ;;  %v1559_v24 = vsel %vm1558_vm6, %v4340_v45, %v1555_v0 }
 0xb36   :  { %v1630_v35 = vmul.f32 %v1559_v24, %v5477_v5 }
 0xb37   :  { %v1563_v6 = vmul.f32 0.5, %v1562_v2 }
 0xb38   :  { %v1639_v26 = vmul.f32 %v5537_v53, %v1630_v35 }
 0xb39   :  { %v1564_v3 = vsub.f32 1.5, %v1563_v6 }
 0xb3a   :  { %v5549_v9 = vadd.f32 %v5545_v11, %v1639_v26 }
 0xb3b   :  { %v1565_v50 = vmul.f32 %v4342_v58, %v1564_v3 }
 0xb3d   :  { %v1569_v32 = vsel %vm1568_vm9, %v4342_v58, %v1565_v50 }
 0xb3e   :  { %v1631_v34 = vmul.f32 %v1569_v32, %v5483_v48 }
 0xb40   :  { %v1640_v46 = vmul.f32 %v5537_v53, %v1631_v34 }
 0xb42   :  { %v5552_v5 = vadd.f32 %v5545_v11, %v1640_v46 }
 0xb44   :  { %v1656_v49 = vpack.c.bf16 %v5552_v5, %v5549_v9 }
 0xb46   :  { %4011 = vmatmul.msk.bf16.vlgmr.msrb.gmra.mxu0 %vm78_vm0, %v1656_v49 }
 0xb4e   :  { %v1518_v39 = vpop.xlane.xlu2 %1517 }
 0xb4f   :  { %v1536_v48 = vmul.f32 %v1518_v39, %v4667_v22 }
 0xb51   :  { %v1544_v12 = vadd.f32 1e-12, %v1536_v48 }
 0xb53   :  { %4343 = vrsqrt.f32 %v1544_v12  ;;  %vm1576_vm12 = vweird.f32 %v1544_v12 }
 0xb56   :  { %v1521_v7 = vpop.xlane.xlu0 %1520 }
 0xb57   :  { %v1537_v62 = vmul.f32 %v1521_v7, %v4667_v22 }
 0xb59   :  { %v4344_v16 = vpop.eup %4343  ;;  %v1545_v38 = vadd.f32 1e-12, %v1537_v62 }
 0xb5a   :  { %v1571_v59 = vmul.f32 %v4344_v16, %v1544_v12  ;;  %vm1577_vm10 = vweird.f32 %v4344_v16 }
 0xb5b   :  { %4345 = vrsqrt.f32 %v1545_v38  ;;  %vm1578_vm13 = vmor %vm1576_vm12, %vm1577_vm10  ;;  %vm1586_vm2 = vweird.f32 %v1545_v38 }
 0xb5c   :  { %v1572_v27 = vmul.f32 %v4344_v16, %v1571_v59 }
 0xb5e   :  { %v1573_v63 = vmul.f32 0.5, %v1572_v27  ;;  %v1524_v17 = vpop.xlane.xlu1 %1523 }
 0xb5f   :  { %v1538_v13 = vmul.f32 %v1524_v17, %v4667_v22 }
 0xb60   :  { %v1574_v44 = vsub.f32 1.5, %v1573_v63 }
 0xb61   :  { %v4346_v42 = vpop.eup %4345  ;;  %v1546_v23 = vadd.f32 1e-12, %v1538_v13 }
 0xb62   :  { %v1575_v14 = vmul.f32 %v4344_v16, %v1574_v44  ;;  %v1581_v47 = vmul.f32 %v4346_v42, %v1545_v38  ;;  %vm1587_vm15 = vweird.f32 %v4346_v42 }
 0xb63   :  { %4347 = vrsqrt.f32 %v1546_v23  ;;  %vm1588_vm3 = vmor %vm1586_vm2, %vm1587_vm15  ;;  %vm1596_vm5 = vweird.f32 %v1546_v23 }
 0xb64   :  { %v1582_v25 = vmul.f32 %v4346_v42, %v1581_v47  ;;  %v1579_v51 = vsel %vm1578_vm13, %v4344_v16, %v1575_v14 }
 0xb65   :  { %v1632_v30 = vmul.f32 %v1579_v51, %v5491_v43 }
 0xb66   :  { %v1583_v21 = vmul.f32 0.5, %v1582_v25  ;;  %v1527_v15 = vpop.xlane.xlu2 %1526 }
 0xb67   :  { %v1539_v28 = vmul.f32 %v1527_v15, %v4667_v22  ;;  %v1641_v1 = vmul.f32 %v5537_v53, %v1632_v30  ;;  %v4145_v15 = vld [vmem:[%s6696_s2 + $0x48] sm:$0xff]  ;;  %v4144_v30 = vld [vmem:[%s6696_s2 + $0x40] sm:$0xff] }
 0xb68   :  { %v1584_v52 = vsub.f32 1.5, %v1583_v21  ;;  %1845 = vmatpush.bf16.msra.mxu2 %v4145_v15 }
 0xb69   :  { %v4348_v41 = vpop.eup %4347  ;;  %v1547_v54 = vadd.f32 1e-12, %v1539_v28  ;;  %v5566_v36 = vadd.f32 %v5545_v11, %v1641_v1 }
 0xb6a   :  { %v1585_v45 = vmul.f32 %v4346_v42, %v1584_v52  ;;  %v1591_v18 = vmul.f32 %v4348_v41, %v1546_v23  ;;  %vm1597_vm4 = vweird.f32 %v4348_v41 }
 0xb6b   :  { %4349 = vrsqrt.f32 %v1547_v54  ;;  %vm1598_vm6 = vmor %vm1596_vm5, %vm1597_vm4  ;;  %vm1606_vm8 = vweird.f32 %v1547_v54 }
 0xb6c   :  { %v1589_v37 = vsel %vm1588_vm3, %v4346_v42, %v1585_v45  ;;  %v1592_v60 = vmul.f32 %v4348_v41, %v1591_v18  ;;  %1846 = vmatpush.bf16.msra.mxu2 %v4144_v30 }
 0xb6d   :  { %v1633_v61 = vmul.f32 %v1589_v37, %v5497_v8 }
 0xb6e   :  { %v1593_v19 = vmul.f32 0.5, %v1592_v60 }
 0xb6f   :  { %v1642_v56 = vmul.f32 %v5537_v53, %v1633_v61 }
 0xb70   :  { %v1594_v58 = vsub.f32 1.5, %v1593_v19 }
 0xb71   :  { %v4350_v0 = vpop.eup %4349  ;;  %v5569_v43 = vadd.f32 %v5545_v11, %v1642_v56 }
 0xb72   :  { %v1595_v2 = vmul.f32 %v4348_v41, %v1594_v58  ;;  %v1601_v24 = vmul.f32 %v4350_v0, %v1547_v54  ;;  %vm1607_vm7 = vweird.f32 %v4350_v0 }
 0xb73   :  { %v1657_v6 = vpack.c.bf16 %v5569_v43, %v5566_v36  ;;  %vm1608_vm9 = vmor %vm1606_vm8, %vm1607_vm7 }
 0xb74   :  { %v1602_v8 = vmul.f32 %v4350_v0, %v1601_v24  ;;  %v1599_v3 = vsel %vm1598_vm6, %v4348_v41, %v1595_v2 }
 0xb75   :  { %4012 = vmatmul.msk.bf16.gmra.mxu0 %vm78_vm0, %v1657_v6  ;;  %v1634_v32 = vmul.f32 %v1599_v3, %v5503_v57  ;;  %v1530_v57 = vpop.xlane.xlu0 %1529 }
 0xb76   :  { %v1603_v35 = vmul.f32 0.5, %v1602_v8  ;;  %v1540_v62 = vmul.f32 %v1530_v57, %v4667_v22 }
 0xb77   :  { %v1643_v49 = vmul.f32 %v5537_v53, %v1634_v32 }
 0xb78   :  { %v1604_v50 = vsub.f32 1.5, %v1603_v35  ;;  %v1548_v16 = vadd.f32 1e-12, %v1540_v62 }
 0xb79   :  { %v5579_v48 = vadd.f32 %v5545_v11, %v1643_v49 }
 0xb7a   :  { %v1605_v26 = vmul.f32 %v4350_v0, %v1604_v50  ;;  %4351 = vrsqrt.f32 %v1548_v16  ;;  %vm1616_vm12 = vweird.f32 %v1548_v16 }
 0xb7c   :  { %v1609_v34 = vsel %vm1608_vm9, %v4350_v0, %v1605_v26 }
 0xb7d   :  { %v1635_v46 = vmul.f32 %v1609_v34, %v5509_v40 }
 0xb7f   :  { %v1644_v39 = vmul.f32 %v5537_v53, %v1635_v46 }
 0xb80   :  { %v4352_v40 = vpop.eup %4351 }
 0xb81   :  { %v5582_v12 = vadd.f32 %v5545_v11, %v1644_v39  ;;  %v1611_v38 = vmul.f32 %v4352_v40, %v1548_v16  ;;  %vm1617_vm10 = vweird.f32 %v4352_v40 }
 0xb82   :  { %vm1618_vm13 = vmor %vm1616_vm12, %vm1617_vm10 }
 0xb83   :  { %v1658_v7 = vpack.c.bf16 %v5582_v12, %v5579_v48  ;;  %v1612_v59 = vmul.f32 %v4352_v40, %v1611_v38 }
 0xb85   :  { %4013 = vmatmul.msk.bf16.gmra.mxu0 %vm78_vm0, %v1658_v7  ;;  %v1613_v13 = vmul.f32 0.5, %v1612_v59 }
 0xb87   :  { %v1614_v44 = vsub.f32 1.5, %v1613_v13 }
 0xb89   :  { %v1615_v23 = vmul.f32 %v4352_v40, %v1614_v44 }
 0xb8b   :  { %v1619_v25 = vsel %vm1618_vm13, %v4352_v40, %v1615_v23 }
 0xb8c   :  { %v1636_v28 = vmul.f32 %v1619_v25, %v5515_v29  ;;  %v4143_v29 = vld [vmem:[%s6696_s2 + $0x38] sm:$0xff] }
 0xb8d   :  { %1847 = vmatpush.bf16.msra.mxu2 %v4143_v29 }
 0xb8e   :  { %v1645_v45 = vmul.f32 %v5537_v53, %v1636_v28 }
 0xb90   :  { %v5603_v37 = vadd.f32 %v5545_v11, %v1645_v45 }
 0xba2   :  { %v1533_v27 = vpop.xlane.xlu1 %1532 }
 0xba3   :  { %v1541_v63 = vmul.f32 %v1533_v27, %v4667_v22 }
 0xba5   :  { %v1549_v17 = vadd.f32 1e-12, %v1541_v63 }
 0xba7   :  { %4353 = vrsqrt.f32 %v1549_v17  ;;  %vm1626_vm2 = vweird.f32 %v1549_v17 }
 0xbad   :  { %v4354_v42 = vpop.eup %4353 }
 0xbae   :  { %v1621_v14 = vmul.f32 %v4354_v42, %v1549_v17  ;;  %vm1627_vm15 = vweird.f32 %v4354_v42 }
 0xbaf   :  { %vm1628_vm3 = vmor %vm1626_vm2, %vm1627_vm15 }
 0xbb0   :  { %v1622_v47 = vmul.f32 %v4354_v42, %v1621_v14 }
 0xbb2   :  { %v1623_v51 = vmul.f32 0.5, %v1622_v47 }
 0xbb4   :  { %v1624_v21 = vsub.f32 1.5, %v1623_v51 }
 0xbb6   :  { %v1625_v52 = vmul.f32 %v4354_v42, %v1624_v21 }
 0xbb8   :  { %v1629_v41 = vsel %vm1628_vm3, %v4354_v42, %v1625_v52 }
 0xbb9   :  { %v1637_v54 = vmul.f32 %v1629_v41, %v5529_v33  ;;  %v5613_v33 = vld [vmem:[%s6697_s3 + $0x6] ss:$0 sm:$0xff] }
 0xbbb   :  { %v1646_v18 = vmul.f32 %v5537_v53, %v1637_v54  ;;  %v4142_v53 = vld [vmem:[%s6696_s2 + $0x30] sm:$0xff] }
 0xbbc   :  { %1848 = vmatpush.bf16.msra.mxu2 %v4142_v53 }
 0xbbd   :  { %v5606_v60 = vadd.f32 %v5545_v11, %v1646_v18 }
 0xbbf   :  { %v1659_v61 = vpack.c.bf16 %v5606_v60, %v5603_v37 }
 0xbc1   :  { %4014 = vmatmul.msk.bf16.gmra.mxu0 %vm78_vm0, %v1659_v61 }
 0xbc3   :  { %v1699_v1 = vpop.f32.mrf.mxu0 }
 0xbc4   :  { %v1700_v11 = vadd.f32 %v5613_v33, %v1699_v1 }
 0xbc6   :  { %v1727_v19 = vmul.f32 0.044715, %v1700_v11  ;;  %v1719_v49 = vmul.f32 0.5, %v1700_v11 }
 0xbc8   :  { %v1735_v56 = vmul.f32 %v1727_v19, %v1700_v11 }
 0xbca   :  { %v1743_v58 = vmul.f32 %v1735_v56, %v1700_v11 }
 0xbcb   :  { %v1701_v0 = vpop.f32.mrf.mxu0 }
 0xbcc   :  { %v1751_v2 = vadd.f32 %v1743_v58, %v1700_v11  ;;  %v1702_v24 = vadd.f32 %v5613_v33, %v1701_v0 }
 0xbce   :  { %v1728_v6 = vmul.f32 0.044715, %v1702_v24  ;;  %v1759_v8 = vmul.f32 0.7978846, %v1751_v2  ;;  %v1720_v39 = vmul.f32 0.5, %v1702_v24 }
 0xbd0   :  { %v1736_v3 = vmul.f32 %v1728_v6, %v1702_v24  ;;  %4355 = vtanh.f32 %v1759_v8 }
 0xbd2   :  { %v1744_v35 = vmul.f32 %v1736_v3, %v1702_v24 }
 0xbd4   :  { %v1752_v50 = vadd.f32 %v1744_v35, %v1702_v24 }
 0xbd6   :  { %v1760_v32 = vmul.f32 0.7978846, %v1752_v50  ;;  %v4356_v26 = vpop.eup %4355 }
 0xbd7   :  { %v1775_v34 = vadd.f32 1.0, %v4356_v26 }
 0xbd8   :  { %4357 = vtanh.f32 %v1760_v32 }
 0xbd9   :  { %v1783_v57 = vmul.f32 %v1775_v34, %v1719_v49 }
 0xbde   :  { %v4358_v46 = vpop.eup %4357 }
 0xbdf   :  { %v1776_v7 = vadd.f32 1.0, %v4358_v46 }
 0xbe1   :  { %v1784_v62 = vmul.f32 %v1776_v7, %v1720_v39 }
 0xbe3   :  { %v1791_v16 = vpack.c.bf16 %v1784_v62, %v1783_v57 }
 0xbe5   :  { %4031 = vmatmul.msk.bf16.vlgmr.msra.gmra.mxu2 %vm438_vm1, %v1791_v16 }
 0xbf2   :  { %v1704_v40 = vpop.f32.mrf.mxu0 }
 0xbf3   :  { %v1705_v38 = vadd.f32 %v5613_v33, %v1704_v40 }
 0xbf5   :  { %v1729_v59 = vmul.f32 0.044715, %v1705_v38  ;;  %v1721_v1 = vmul.f32 0.5, %v1705_v38 }
 0xbf7   :  { %v1737_v27 = vmul.f32 %v1729_v59, %v1705_v38 }
 0xbf9   :  { %v1745_v63 = vmul.f32 %v1737_v27, %v1705_v38 }
 0xbfa   :  { %v1706_v17 = vpop.f32.mrf.mxu0 }
 0xbfb   :  { %v1753_v13 = vadd.f32 %v1745_v63, %v1705_v38  ;;  %v1707_v44 = vadd.f32 %v5613_v33, %v1706_v17 }
 0xbfd   :  { %v1730_v42 = vmul.f32 0.044715, %v1707_v44  ;;  %v1761_v23 = vmul.f32 0.7978846, %v1753_v13  ;;  %v1722_v11 = vmul.f32 0.5, %v1707_v44 }
 0xbff   :  { %v1738_v14 = vmul.f32 %v1730_v42, %v1707_v44  ;;  %4359 = vtanh.f32 %v1761_v23 }
 0xc01   :  { %v1746_v47 = vmul.f32 %v1738_v14, %v1707_v44 }
 0xc02   :  { %v1709_v25 = vpop.f32.mrf.mxu0 }
 0xc03   :  { %v1710_v51 = vadd.f32 %v5613_v33, %v1709_v25  ;;  %v1754_v21 = vadd.f32 %v1746_v47, %v1707_v44 }
 0xc05   :  { %v1731_v15 = vmul.f32 0.044715, %v1710_v51  ;;  %v1762_v28 = vmul.f32 0.7978846, %v1754_v21  ;;  %v4360_v41 = vpop.eup %4359  ;;  %v1723_v26 = vmul.f32 0.5, %v1710_v51 }
 0xc06   :  { %v1777_v29 = vadd.f32 1.0, %v4360_v41 }
 0xc07   :  { %v1739_v52 = vmul.f32 %v1731_v15, %v1710_v51  ;;  %4361 = vtanh.f32 %v1762_v28 }
 0xc08   :  { %v1785_v0 = vmul.f32 %v1777_v29, %v1721_v1 }
 0xc09   :  { %v1747_v30 = vmul.f32 %v1739_v52, %v1710_v51 }
 0xc0a   :  { %v1711_v54 = vpop.f32.mrf.mxu0 }
 0xc0b   :  { %v1755_v45 = vadd.f32 %v1747_v30, %v1710_v51  ;;  %v1712_v18 = vadd.f32 %v5613_v33, %v1711_v54 }
 0xc0d   :  { %v4362_v61 = vpop.eup %4361  ;;  %v1732_v53 = vmul.f32 0.044715, %v1712_v18  ;;  %v1763_v56 = vmul.f32 0.7978846, %v1755_v45  ;;  %v1724_v34 = vmul.f32 0.5, %v1712_v18 }
 0xc0e   :  { %v1778_v19 = vadd.f32 1.0, %v4362_v61 }
 0xc0f   :  { %v1740_v58 = vmul.f32 %v1732_v53, %v1712_v18  ;;  %4363 = vtanh.f32 %v1763_v56 }
 0xc10   :  { %v1786_v2 = vmul.f32 %v1778_v19, %v1722_v11 }
 0xc11   :  { %v1748_v24 = vmul.f32 %v1740_v58, %v1712_v18 }
 0xc12   :  { %v1792_v6 = vpack.c.bf16 %v1786_v2, %v1785_v0 }
 0xc13   :  { %v1756_v8 = vadd.f32 %v1748_v24, %v1712_v18 }
 0xc14   :  { %4032 = vmatmul.msk.bf16.gmra.mxu2 %vm438_vm1, %v1792_v6 }
 0xc15   :  { %v1764_v3 = vmul.f32 0.7978846, %v1756_v8  ;;  %v4364_v35 = vpop.eup %4363 }
 0xc16   :  { %v1779_v50 = vadd.f32 1.0, %v4364_v35 }
 0xc17   :  { %4365 = vtanh.f32 %v1764_v3 }
 0xc18   :  { %v1787_v49 = vmul.f32 %v1779_v50, %v1723_v26 }
 0xc1d   :  { %v4366_v32 = vpop.eup %4365 }
 0xc1e   :  { %v1780_v46 = vadd.f32 1.0, %v4366_v32 }
 0xc20   :  { %v1788_v39 = vmul.f32 %v1780_v46, %v1724_v34 }
 0xc22   :  { %v1793_v7 = vpack.c.bf16 %v1788_v39, %v1787_v49 }
 0xc24   :  { %4033 = vmatmul.msk.bf16.gmra.mxu2 %vm438_vm1, %v1793_v7 }
 0xc3e   :  { %v1714_v57 = vpop.f32.mrf.mxu0 }
 0xc3f   :  { %v1715_v62 = vadd.f32 %v5613_v33, %v1714_v57 }
 0xc41   :  { %v1733_v16 = vmul.f32 0.044715, %v1715_v62  ;;  %v1725_v21 = vmul.f32 0.5, %v1715_v62 }
 0xc43   :  { %v1741_v40 = vmul.f32 %v1733_v16, %v1715_v62 }
 0xc45   :  { %v1749_v38 = vmul.f32 %v1741_v40, %v1715_v62 }
 0xc46   :  { %v1716_v59 = vpop.f32.mrf.mxu0 }
 0xc47   :  { %v1757_v27 = vadd.f32 %v1749_v38, %v1715_v62  ;;  %v1717_v63 = vadd.f32 %v5613_v33, %v1716_v59  ;;  %v4181_v33 = vld [vmem:[%s6697_s3 + $0x7] ss:$0 sm:$0xff] }
 0xc49   :  { %v1734_v17 = vmul.f32 0.044715, %v1717_v63  ;;  %v1765_v13 = vmul.f32 0.7978846, %v1757_v27  ;;  %v1726_v15 = vmul.f32 0.5, %v1717_v63 }
 0xc4b   :  { %v1742_v44 = vmul.f32 %v1734_v17, %v1717_v63  ;;  %4367 = vtanh.f32 %v1765_v13 }
 0xc4d   :  { %v1750_v42 = vmul.f32 %v1742_v44, %v1717_v63 }
 0xc4f   :  { %v1758_v23 = vadd.f32 %v1750_v42, %v1717_v63 }
 0xc51   :  { %v1766_v14 = vmul.f32 0.7978846, %v1758_v23  ;;  %v4368_v47 = vpop.eup %4367 }
 0xc52   :  { %v1781_v25 = vadd.f32 1.0, %v4368_v47 }
 0xc53   :  { %4369 = vtanh.f32 %v1766_v14 }
 0xc54   :  { %v1789_v52 = vmul.f32 %v1781_v25, %v1725_v21 }
 0xc59   :  { %v4370_v51 = vpop.eup %4369 }
 0xc5a   :  { %v1782_v28 = vadd.f32 1.0, %v4370_v51 }
 0xc5c   :  { %v1790_v41 = vmul.f32 %v1782_v28, %v1726_v15 }
 0xc5e   :  { %v1794_v30 = vpack.c.bf16 %v1790_v41, %v1789_v52 }
 0xc60   :  { %4034 = vmatmul.msk.bf16.gmra.mxu2 %vm438_vm1, %v1794_v30 }
 0xc68   :  { %v1850_v54 = vpop.f32.mrf.mxu2 }
 0xc69   :  { %v1851_v45 = vadd.f32 %v4181_v33, %v1850_v54 }
 0xc6b   :  { %v1870_v18 = vadd.f32 %v1851_v45, %v5549_v9 }
 0xc6d   :  { %v1880_v29 = vsel %vm78_vm0, %v1870_v18, 0.0 }
 0xc6e   :  { %1881 = vadd.xlane.f32.xlu2 %v1880_v29 }
 0xc70   :  { %v1852_v61 = vpop.f32.mrf.mxu2 }
 0xc71   :  { %v1853_v53 = vadd.f32 %v4181_v33, %v1852_v61  ;;  %v4147_v61 = vld [vmem:[%s6696_s2 + $0x58] sm:$0xff] }
 0xc72   :  { %2114 = vmatpush.bf16.msrb.mxu1 %v4147_v61 }
 0xc73   :  { %v1871_v1 = vadd.f32 %v1853_v53, %v5552_v5 }
 0xc75   :  { %v1883_v11 = vsel %vm78_vm0, %v1871_v1, 0.0 }
 0xc76   :  { %1884 = vadd.xlane.f32.xlu0 %v1883_v11 }
 0xc97   :  { %v1855_v19 = vpop.f32.mrf.mxu2 }
 0xc98   :  { %v1856_v56 = vadd.f32 %v4181_v33, %v1855_v19 }
 0xc9a   :  { %v1872_v58 = vadd.f32 %v1856_v56, %v5566_v36  ;;  %v4146_v56 = vld [vmem:[%s6696_s2 + $0x50] sm:$0xff] }
 0xc9b   :  { %2115 = vmatpush.bf16.msrb.mxu1 %v4146_v56 }
 0xc9c   :  { %v1886_v0 = vsel %vm78_vm0, %v1872_v58, 0.0 }
 0xc9d   :  { %1887 = vadd.xlane.f32.xlu1 %v1886_v0 }
 0xc9f   :  { %v1857_v2 = vpop.f32.mrf.mxu2 }
 0xca0   :  { %v1858_v24 = vadd.f32 %v4181_v33, %v1857_v2 }
 0xca2   :  { %v1873_v9 = vadd.f32 %v1858_v24, %v5569_v43 }
 0xca4   :  { %v1889_v6 = vsel %vm78_vm0, %v1873_v9, 0.0 }
 0xca5   :  { %1890 = vadd.xlane.f32.xlu2 %v1889_v6 }
 0xca7   :  { %v1860_v8 = vpop.f32.mrf.mxu2 }
 0xca8   :  { %v1861_v3 = vadd.f32 %v4181_v33, %v1860_v8 }
 0xcaa   :  { %v1874_v5 = vadd.f32 %v1861_v3, %v5579_v48 }
 0xcac   :  { %v1892_v35 = vsel %vm78_vm0, %v1874_v5, 0.0 }
 0xcad   :  { %1893 = vadd.xlane.f32.xlu0 %v1892_v35 }
 0xcaf   :  { %v1862_v50 = vpop.f32.mrf.mxu2 }
 0xcb0   :  { %v1863_v32 = vadd.f32 %v4181_v33, %v1862_v50 }
 0xcb2   :  { %v1875_v36 = vadd.f32 %v1863_v32, %v5582_v12 }
 0xcb4   :  { %v1895_v26 = vsel %vm78_vm0, %v1875_v36, 0.0 }
 0xcb5   :  { %1896 = vadd.xlane.f32.xlu1 %v1895_v26 }
 0xce1   :  { %v1882_v34 = vpop.xlane.xlu2 %1881 }
 0xce2   :  { %v1904_v43 = vmul.f32 %v1882_v34, %v4667_v22 }
 0xce3   :  { %v1865_v46 = vpop.f32.mrf.mxu2 }
 0xce4   :  { %v5647_v49 = vsub.f32 %v1870_v18, %v1904_v43  ;;  %v1866_v39 = vadd.f32 %v4181_v33, %v1865_v46 }
 0xce6   :  { %v1920_v48 = vmul.f32 %v5647_v49, %v5647_v49  ;;  %v1876_v7 = vadd.f32 %v1866_v39, %v5603_v37 }
 0xce8   :  { %v1928_v57 = vsel %vm78_vm0, %v1920_v48, 0.0  ;;  %v1898_v62 = vsel %vm78_vm0, %v1876_v7, 0.0 }
 0xce9   :  { %1929 = vadd.xlane.f32.xlu2 %v1928_v57  ;;  %1899 = vadd.xlane.f32.xlu1 %v1898_v62  ;;  %v1885_v12 = vpop.xlane.xlu0 %1884 }
 0xcea   :  { %v1905_v16 = vmul.f32 %v1885_v12, %v4667_v22 }
 0xceb   :  { %v1867_v40 = vpop.f32.mrf.mxu2 }
 0xcec   :  { %v5655_v38 = vsub.f32 %v1871_v1, %v1905_v16  ;;  %v1868_v59 = vadd.f32 %v4181_v33, %v1867_v40  ;;  %v5709_v40 = vld [vmem:[%s6697_s3 + $0x8] ss:$0 sm:$0xff] }
 0xcee   :  { %v1877_v27 = vadd.f32 %v1868_v59, %v5606_v60  ;;  %v1921_v63 = vmul.f32 %v5655_v38, %v5655_v38 }
 0xcf0   :  { %v1901_v37 = vsel %vm78_vm0, %v1877_v27, 0.0  ;;  %v1931_v17 = vsel %vm78_vm0, %v1921_v63, 0.0 }
 0xcf1   :  { %1902 = vadd.xlane.f32.xlu2 %v1901_v37  ;;  %1932 = vadd.xlane.f32.xlu0 %v1931_v17  ;;  %v5715_v37 = vld [vmem:[%s6697_s3 + $0x9] ss:$0 sm:$0xff] }
 0xd10   :  { %v1888_v13 = vpop.xlane.xlu1 %1887 }
 0xd11   :  { %v1906_v44 = vmul.f32 %v1888_v13, %v4667_v22 }
 0xd13   :  { %v5663_v42 = vsub.f32 %v1872_v58, %v1906_v44 }
 0xd15   :  { %v1922_v23 = vmul.f32 %v5663_v42, %v5663_v42 }
 0xd17   :  { %v1934_v14 = vsel %vm78_vm0, %v1922_v23, 0.0 }
 0xd18   :  { %v1891_v60 = vpop.xlane.xlu2 %1890  ;;  %1935 = vadd.xlane.f32.xlu0 %v1934_v14 }
 0xd19   :  { %v1907_v47 = vmul.f32 %v1891_v60, %v4667_v22 }
 0xd1b   :  { %v5669_v25 = vsub.f32 %v1873_v9, %v1907_v47 }
 0xd1d   :  { %v1923_v51 = vmul.f32 %v5669_v25, %v5669_v25 }
 0xd1f   :  { %v1937_v21 = vsel %vm78_vm0, %v1923_v51, 0.0 }
 0xd20   :  { %1938 = vadd.xlane.f32.xlu1 %v1937_v21  ;;  %v1894_v15 = vpop.xlane.xlu0 %1893 }
 0xd21   :  { %v1908_v28 = vmul.f32 %v1894_v15, %v4667_v22 }
 0xd23   :  { %v5675_v52 = vsub.f32 %v1874_v5, %v1908_v28 }
 0xd25   :  { %v1924_v41 = vmul.f32 %v5675_v52, %v5675_v52 }
 0xd27   :  { %v1940_v30 = vsel %vm78_vm0, %v1924_v41, 0.0 }
 0xd28   :  { %v1897_v33 = vpop.xlane.xlu1 %1896  ;;  %1941 = vadd.xlane.f32.xlu2 %v1940_v30 }
 0xd29   :  { %v1909_v54 = vmul.f32 %v1897_v33, %v4667_v22 }
 0xd2b   :  { %v5681_v45 = vsub.f32 %v1875_v36, %v1909_v54 }
 0xd2d   :  { %v1925_v18 = vmul.f32 %v5681_v45, %v5681_v45 }
 0xd2f   :  { %v1943_v29 = vsel %vm78_vm0, %v1925_v18, 0.0 }
 0xd30   :  { %1944 = vadd.xlane.f32.xlu0 %v1943_v29 }
 0xd5c   :  { %v1930_v53 = vpop.xlane.xlu2 %1929  ;;  %v1900_v1 = vpop.xlane.xlu1 %1899 }
 0xd5d   :  { %v1952_v11 = vmul.f32 %v1930_v53, %v4667_v22  ;;  %v1910_v19 = vmul.f32 %v1900_v1, %v4667_v22 }
 0xd5f   :  { %v1960_v58 = vadd.f32 1e-12, %v1952_v11  ;;  %v5694_v0 = vsub.f32 %v1876_v7, %v1910_v19 }
 0xd61   :  { %4371 = vrsqrt.f32 %v1960_v58  ;;  %v1926_v2 = vmul.f32 %v5694_v0, %v5694_v0  ;;  %vm1974_vm5 = vweird.f32 %v1960_v58 }
 0xd63   :  { %v1946_v24 = vsel %vm78_vm0, %v1926_v2, 0.0 }
 0xd64   :  { %v1903_v9 = vpop.xlane.xlu2 %1902  ;;  %1947 = vadd.xlane.f32.xlu1 %v1946_v24  ;;  %v1933_v6 = vpop.xlane.xlu0 %1932 }
 0xd65   :  { %v1911_v8 = vmul.f32 %v1903_v9, %v4667_v22  ;;  %v1953_v3 = vmul.f32 %v1933_v6, %v4667_v22 }
 0xd67   :  { %v4372_v5 = vpop.eup %4371  ;;  %v5701_v35 = vsub.f32 %v1877_v27, %v1911_v8  ;;  %v1961_v50 = vadd.f32 1e-12, %v1953_v3 }
 0xd68   :  { %v1969_v32 = vmul.f32 %v4372_v5, %v1960_v58  ;;  %vm1975_vm4 = vweird.f32 %v4372_v5 }
 0xd69   :  { %4373 = vrsqrt.f32 %v1961_v50  ;;  %v1927_v36 = vmul.f32 %v5701_v35, %v5701_v35  ;;  %vm1976_vm6 = vmor %vm1974_vm5, %vm1975_vm4  ;;  %vm1984_vm8 = vweird.f32 %v1961_v50 }
 0xd6a   :  { %v1970_v26 = vmul.f32 %v4372_v5, %v1969_v32 }
 0xd6b   :  { %v1949_v34 = vsel %vm78_vm0, %v1927_v36, 0.0 }
 0xd6c   :  { %v1971_v43 = vmul.f32 0.5, %v1970_v26  ;;  %1950 = vadd.xlane.f32.xlu2 %v1949_v34 }
 0xd6e   :  { %v1972_v46 = vsub.f32 1.5, %v1971_v43 }
 0xd6f   :  { %v4374_v39 = vpop.eup %4373 }
 0xd70   :  { %v1973_v48 = vmul.f32 %v4372_v5, %v1972_v46  ;;  %v1979_v7 = vmul.f32 %v4374_v39, %v1961_v50  ;;  %vm1985_vm7 = vweird.f32 %v4374_v39 }
 0xd71   :  { %vm1986_vm9 = vmor %vm1984_vm8, %vm1985_vm7 }
 0xd72   :  { %v1980_v57 = vmul.f32 %v4374_v39, %v1979_v7  ;;  %v1977_v62 = vsel %vm1976_vm6, %v4372_v5, %v1973_v48 }
 0xd73   :  { %v2048_v59 = vmul.f32 %v1977_v62, %v5647_v49 }
 0xd74   :  { %v1981_v12 = vmul.f32 0.5, %v1980_v57 }
 0xd75   :  { %v2057_v17 = vmul.f32 %v5709_v40, %v2048_v59 }
 0xd76   :  { %v1982_v16 = vsub.f32 1.5, %v1981_v12 }
 0xd77   :  { %v5721_v23 = vadd.f32 %v5715_v37, %v2057_v17 }
 0xd78   :  { %v1983_v27 = vmul.f32 %v4374_v39, %v1982_v16 }
 0xd7a   :  { %v1987_v63 = vsel %vm1986_vm9, %v4374_v39, %v1983_v27 }
 0xd7b   :  { %v2049_v13 = vmul.f32 %v1987_v63, %v5655_v38 }
 0xd7d   :  { %v2058_v44 = vmul.f32 %v5709_v40, %v2049_v13 }
 0xd7f   :  { %v5724_v49 = vadd.f32 %v5715_v37, %v2058_v44 }
 0xd81   :  { %v2074_v14 = vpack.c.bf16 %v5724_v49, %v5721_v23 }
 0xd83   :  { %4043 = vmatmul.msk.bf16.vlgmr.msrb.gmra.mxu1 %vm78_vm0, %v2074_v14 }
 0xd8b   :  { %v1936_v60 = vpop.xlane.xlu0 %1935 }
 0xd8c   :  { %v1954_v47 = vmul.f32 %v1936_v60, %v4667_v22 }
 0xd8e   :  { %v1962_v51 = vadd.f32 1e-12, %v1954_v47 }
 0xd90   :  { %4375 = vrsqrt.f32 %v1962_v51  ;;  %vm1994_vm12 = vweird.f32 %v1962_v51 }
 0xd93   :  { %v1939_v21 = vpop.xlane.xlu1 %1938 }
 0xd94   :  { %v1955_v38 = vmul.f32 %v1939_v21, %v4667_v22 }
 0xd96   :  { %v4376_v15 = vpop.eup %4375  ;;  %v1963_v28 = vadd.f32 1e-12, %v1955_v38 }
 0xd97   :  { %v1989_v41 = vmul.f32 %v4376_v15, %v1962_v51  ;;  %vm1995_vm10 = vweird.f32 %v4376_v15 }
 0xd98   :  { %4377 = vrsqrt.f32 %v1963_v28  ;;  %vm1996_vm13 = vmor %vm1994_vm12, %vm1995_vm10  ;;  %vm2004_vm2 = vweird.f32 %v1963_v28 }
 0xd99   :  { %v1990_v30 = vmul.f32 %v4376_v15, %v1989_v41 }
 0xd9b   :  { %v1991_v33 = vmul.f32 0.5, %v1990_v30  ;;  %v1942_v54 = vpop.xlane.xlu2 %1941 }
 0xd9c   :  { %v1956_v18 = vmul.f32 %v1942_v54, %v4667_v22 }
 0xd9d   :  { %v1992_v29 = vsub.f32 1.5, %v1991_v33 }
 0xd9e   :  { %v4378_v61 = vpop.eup %4377  ;;  %v1964_v53 = vadd.f32 1e-12, %v1956_v18 }
 0xd9f   :  { %v1993_v1 = vmul.f32 %v4376_v15, %v1992_v29  ;;  %v1999_v11 = vmul.f32 %v4378_v61, %v1963_v28  ;;  %vm2005_vm15 = vweird.f32 %v4378_v61 }
 0xda0   :  { %4379 = vrsqrt.f32 %v1964_v53  ;;  %vm2006_vm3 = vmor %vm2004_vm2, %vm2005_vm15  ;;  %vm2014_vm5 = vweird.f32 %v1964_v53 }
 0xda1   :  { %v2000_v19 = vmul.f32 %v4378_v61, %v1999_v11  ;;  %v1997_v56 = vsel %vm1996_vm13, %v4376_v15, %v1993_v1 }
 0xda2   :  { %v2050_v8 = vmul.f32 %v1997_v56, %v5663_v42 }
 0xda3   :  { %v2001_v58 = vmul.f32 0.5, %v2000_v19  ;;  %v1945_v2 = vpop.xlane.xlu0 %1944 }
 0xda4   :  { %v1957_v24 = vmul.f32 %v1945_v2, %v4667_v22  ;;  %v2059_v34 = vmul.f32 %v5709_v40, %v2050_v8 }
 0xda5   :  { %v2002_v9 = vsub.f32 1.5, %v2001_v58 }
 0xda6   :  { %v4380_v6 = vpop.eup %4379  ;;  %v1965_v3 = vadd.f32 1e-12, %v1957_v24  ;;  %v5738_v7 = vadd.f32 %v5715_v37, %v2059_v34 }
 0xda7   :  { %v2003_v5 = vmul.f32 %v4378_v61, %v2002_v9  ;;  %v2009_v50 = vmul.f32 %v4380_v6, %v1964_v53  ;;  %vm2015_vm4 = vweird.f32 %v4380_v6 }
 0xda8   :  { %4381 = vrsqrt.f32 %v1965_v3  ;;  %vm2016_vm6 = vmor %vm2014_vm5, %vm2015_vm4  ;;  %vm2024_vm8 = vweird.f32 %v1965_v3 }
 0xda9   :  { %v2007_v32 = vsel %vm2006_vm3, %v4378_v61, %v2003_v5  ;;  %v2010_v36 = vmul.f32 %v4380_v6, %v2009_v50 }
 0xdaa   :  { %v2051_v26 = vmul.f32 %v2007_v32, %v5669_v25 }
 0xdab   :  { %v2011_v43 = vmul.f32 0.5, %v2010_v36 }
 0xdac   :  { %v2060_v46 = vmul.f32 %v5709_v40, %v2051_v26 }
 0xdad   :  { %v2012_v39 = vsub.f32 1.5, %v2011_v43 }
 0xdae   :  { %v4382_v48 = vpop.eup %4381  ;;  %v5741_v42 = vadd.f32 %v5715_v37, %v2060_v46 }
 0xdaf   :  { %v2013_v57 = vmul.f32 %v4380_v6, %v2012_v39  ;;  %v2019_v62 = vmul.f32 %v4382_v48, %v1965_v3  ;;  %vm2025_vm7 = vweird.f32 %v4382_v48 }
 0xdb0   :  { %v2075_v12 = vpack.c.bf16 %v5741_v42, %v5738_v7  ;;  %vm2026_vm9 = vmor %vm2024_vm8, %vm2025_vm7 }
 0xdb1   :  { %v2020_v25 = vmul.f32 %v4382_v48, %v2019_v62  ;;  %v2017_v16 = vsel %vm2016_vm6, %v4380_v6, %v2013_v57 }
 0xdb2   :  { %4044 = vmatmul.msk.bf16.gmra.mxu1 %vm78_vm0, %v2075_v12  ;;  %v2052_v63 = vmul.f32 %v2017_v16, %v5675_v52 }
 0xdb3   :  { %v2021_v59 = vmul.f32 0.5, %v2020_v25 }
 0xdb4   :  { %v2061_v14 = vmul.f32 %v5709_v40, %v2052_v63 }
 0xdb5   :  { %v2022_v27 = vsub.f32 1.5, %v2021_v59 }
 0xdb6   :  { %v5751_v47 = vadd.f32 %v5715_v37, %v2061_v14 }
 0xdb7   :  { %v2023_v17 = vmul.f32 %v4382_v48, %v2022_v27 }
 0xdb9   :  { %v2027_v13 = vsel %vm2026_vm9, %v4382_v48, %v2023_v17 }
 0xdba   :  { %v2053_v44 = vmul.f32 %v2027_v13, %v5681_v45 }
 0xdbc   :  { %v2062_v60 = vmul.f32 %v5709_v40, %v2053_v44 }
 0xdbe   :  { %v5754_v51 = vadd.f32 %v5715_v37, %v2062_v60 }
 0xdc0   :  { %v2076_v21 = vpack.c.bf16 %v5754_v51, %v5751_v47 }
 0xdc2   :  { %4045 = vmatmul.msk.bf16.gmra.mxu1 %vm78_vm0, %v2076_v21 }
 0xdd7   :  { %v1948_v52 = vpop.xlane.xlu1 %1947 }
 0xdd8   :  { %v1958_v38 = vmul.f32 %v1948_v52, %v4667_v22 }
 0xdda   :  { %v1966_v15 = vadd.f32 1e-12, %v1958_v38 }
 0xddc   :  { %4383 = vrsqrt.f32 %v1966_v15  ;;  %vm2034_vm12 = vweird.f32 %v1966_v15 }
 0xddf   :  { %v1951_v45 = vpop.xlane.xlu2 %1950 }
 0xde0   :  { %v1959_v28 = vmul.f32 %v1951_v45, %v4667_v22 }
 0xde2   :  { %v4384_v41 = vpop.eup %4383  ;;  %v1967_v30 = vadd.f32 1e-12, %v1959_v28 }
 0xde3   :  { %v2029_v33 = vmul.f32 %v4384_v41, %v1966_v15  ;;  %vm2035_vm10 = vweird.f32 %v4384_v41 }
 0xde4   :  { %4385 = vrsqrt.f32 %v1967_v30  ;;  %vm2036_vm13 = vmor %vm2034_vm12, %vm2035_vm10  ;;  %vm2044_vm2 = vweird.f32 %v1967_v30 }
 0xde5   :  { %v2030_v54 = vmul.f32 %v4384_v41, %v2029_v33 }
 0xde7   :  { %v2031_v18 = vmul.f32 0.5, %v2030_v54 }
 0xde9   :  { %v2032_v29 = vsub.f32 1.5, %v2031_v18 }
 0xdea   :  { %v4386_v61 = vpop.eup %4385 }
 0xdeb   :  { %v2033_v53 = vmul.f32 %v4384_v41, %v2032_v29  ;;  %v2039_v1 = vmul.f32 %v4386_v61, %v1967_v30  ;;  %vm2045_vm15 = vweird.f32 %v4386_v61 }
 0xdec   :  { %vm2046_vm3 = vmor %vm2044_vm2, %vm2045_vm15 }
 0xded   :  { %v2040_v11 = vmul.f32 %v4386_v61, %v2039_v1  ;;  %v2037_v19 = vsel %vm2036_vm13, %v4384_v41, %v2033_v53 }
 0xdee   :  { %v2054_v2 = vmul.f32 %v2037_v19, %v5694_v0 }
 0xdef   :  { %v2041_v56 = vmul.f32 0.5, %v2040_v11 }
 0xdf0   :  { %v2063_v8 = vmul.f32 %v5709_v40, %v2054_v2 }
 0xdf1   :  { %v2042_v58 = vsub.f32 1.5, %v2041_v56 }
 0xdf2   :  { %v5766_v5 = vadd.f32 %v5715_v37, %v2063_v8 }
 0xdf3   :  { %v2043_v24 = vmul.f32 %v4386_v61, %v2042_v58 }
 0xdf5   :  { %v2047_v9 = vsel %vm2046_vm3, %v4386_v61, %v2043_v24 }
 0xdf6   :  { %v2055_v6 = vmul.f32 %v2047_v9, %v5701_v35 }
 0xdf8   :  { %v2064_v3 = vmul.f32 %v5709_v40, %v2055_v6  ;;  %v4184_v40 = vld [vmem:[%s6697_s3 + $0xa] ss:$0 sm:$0xff] }
 0xdfa   :  { %v5769_v50 = vadd.f32 %v5715_v37, %v2064_v3 }
 0xdfc   :  { %v2077_v32 = vpack.c.bf16 %v5769_v50, %v5766_v5 }
 0xdfe   :  { %4046 = vmatmul.msk.bf16.gmra.mxu1 %vm78_vm0, %v2077_v32 }
 0xe00   :  { %v2117_v0 = vpop.f32.mrf.mxu1 }
 0xe01   :  { %v2118_v62 = vadd.f32 %v4184_v40, %v2117_v0 }
 0xe03   :  { %v2137_v27 = vpack.c.bf16 %v2118_v62, %v2118_v62 }
 0xe05   :  { %v2158_v17 = vunpack.c.l.b16 %v2137_v27 }
 0xe08   :  { %v2119_v36 = vpop.f32.mrf.mxu1 }
 0xe09   :  { %v2120_v37 = vadd.f32 %v4184_v40, %v2119_v36 }
 0xe0b   :  { %v2138_v16 = vpack.c.bf16 %v2120_v37, %v2120_v37 }
 0xe0d   :  { %v2159_v63 = vunpack.c.l.b16 %v2138_v16 }
 0xe0f   :  { %v5781_v13 = vpack.c.b16 %v2159_v63, %v2158_v17 }
 0xe2f   :  { %v2122_v26 = vpop.f32.mrf.mxu1 }
 0xe30   :  { %v2123_v45 = vadd.f32 %v4184_v40, %v2122_v26 }
 0xe32   :  { %v2139_v54 = vpack.c.bf16 %v2123_v45, %v2123_v45 }
 0xe34   :  { %v2160_v29 = vunpack.c.l.b16 %v2139_v54 }
 0xe37   :  { %v2124_v34 = vpop.f32.mrf.mxu1 }
 0xe38   :  { %v2125_v38 = vadd.f32 %v4184_v40, %v2124_v34 }
 0xe3a   :  { %v2140_v30 = vpack.c.bf16 %v2125_v38, %v2125_v38 }
 0xe3c   :  { %v2161_v18 = vunpack.c.l.b16 %v2140_v30 }
 0xe3e   :  { %v5795_v61 = vpack.c.b16 %v2161_v18, %v2160_v29 }
 0xe3f   :  { %v2127_v35 = vpop.f32.mrf.mxu1 }
 0xe40   :  { %v2128_v43 = vadd.f32 %v4184_v40, %v2127_v35 }
 0xe42   :  { %v2141_v39 = vpack.c.bf16 %v2128_v43, %v2128_v43 }
 0xe44   :  { %v2162_v12 = vunpack.c.l.b16 %v2141_v39 }
 0xe47   :  { %v2129_v46 = vpop.f32.mrf.mxu1 }
 0xe48   :  { %v2130_v48 = vadd.f32 %v4184_v40, %v2129_v46 }
 0xe4a   :  { %v2142_v57 = vpack.c.bf16 %v2130_v48, %v2130_v48 }
 0xe4c   :  { %v2163_v25 = vunpack.c.l.b16 %v2142_v57 }
 0xe4e   :  { %v5777_v59 = vpack.c.b16 %v2163_v25, %v2162_v12 }
 0xe50   :  { %2174 = vrot.lane.b32.xlu1 %v5777_v59, %s4592_s14 }
 0xe58   :  { %2170 = vrot.lane.b32.xlu1 %v5781_v13, %s4592_s14 }
 0xe60   :  { %2433 = vrot.lane.b32.xlu1 %v5781_v13, %s4597_s18 }
 0xe7b   :  { %v2132_v44 = vpop.f32.mrf.mxu1 }
 0xe7c   :  { %v2133_v14 = vadd.f32 %v4184_v40, %v2132_v44 }
 0xe7e   :  { %v2143_v21 = vpack.c.bf16 %v2133_v14, %v2133_v14 }
 0xe80   :  { %v2164_v28 = vunpack.c.l.b16 %v2143_v21 }
 0xe83   :  { %v2134_v60 = vpop.f32.mrf.mxu1 }
 0xe84   :  { %v2135_v52 = vadd.f32 %v4184_v40, %v2134_v60 }
 0xe86   :  { %v2144_v15 = vpack.c.bf16 %v2135_v52, %v2135_v52 }
 0xe88   :  { %v2165_v41 = vunpack.c.l.b16 %v2144_v15 }
 0xe8a   :  { %v5787_v33 = vpack.c.b16 %v2165_v41, %v2164_v28 }
 0xe8c   :  { %2447 = vrot.lane.b32.xlu2 %v5787_v33, %s4596_s1  ;;  %2176 = vrot.lane.b32.xlu0 %v5787_v33, %s4592_s14 }
 0xe8d   :  { %2439 = vrot.lane.b32.xlu1 %v5787_v33, %s4597_s18 }
 0xe94   :  { %2443 = vrot.lane.b32.xlu2 %v5795_v61, %s4596_s1  ;;  %2172 = vrot.lane.b32.xlu0 %v5795_v61, %s4592_s14 }
 0xe95   :  { %2329 = vrot.lane.b32.xlu1 %v5787_v33, %s4593_s15 }
 0xe9c   :  { %2435 = vrot.lane.b32.xlu2 %v5795_v61, %s4597_s18  ;;  %2445 = vrot.lane.b32.xlu0 %v5777_v59, %s4596_s1 }
 0xea4   :  { %2441 = vrot.lane.b32.xlu0 %v5781_v13, %s4596_s1 }
 0xeac   :  { %2437 = vrot.lane.b32.xlu0 %v5777_v59, %s4597_s18 }
 0xec2   :  { %v2175_v53 = vpop.permute.xlu1 %2174 }
 0xec3   :  { %v2197_v6 = vsel %vm384_vm11, %v2175_v53, 0 }
 0xeca   :  { %v2171_v19 = vpop.permute.xlu1 %2170 }
 0xecb   :  { %v2191_v26 = vsel %vm384_vm11, %v2171_v19, 0 }
 0xed2   :  { %v2434_v56 = vpop.permute.xlu1 %2433 }
 0xee6   :  { %v2448_v1 = vpop.permute.xlu2 %2447 }
 0xee7   :  { %v2471_v11 = vsel %vm384_vm11, %v2448_v1, 0 }
 0xee8   :  { %2477 = vmatpush.bf16.xpose.msra.mxu1 %v2471_v11 }
 0xeee   :  { %v2444_v36 = vpop.permute.xlu2 %2443 }
 0xeef   :  { %v2465_v34 = vsel %vm384_vm11, %v2444_v36, 0  ;;  %v6719_v36 = vld [vmem:[#allocation7_spill] sm:$0xff] }
 0xef6   :  { %v2436_v43 = vpop.permute.xlu2 %2435 }
 0xefe   :  { %v2177_v58 = vpop.permute.xlu0 %2176 }
 0xeff   :  { %v2200_v2 = vsel %vm384_vm11, %v2177_v58, 0  ;;  %v2440_v24 = vpop.permute.xlu1 %2439 }
 0xf00   :  { %2206 = vmatpush.bf16.xpose.msra.mxu3 %v2200_v2 }
 0xf06   :  { %v2173_v9 = vpop.permute.xlu0 %2172 }
 0xf07   :  { %v2330_v8 = vpop.permute.xlu1 %2329  ;;  %v2194_v32 = vsel %vm384_vm11, %v2173_v9, 0 }
 0xf08   :  { %2351 = vmatpush.bf16.msra.mxu0 %v2330_v8  ;;  %2207 = vmatpush.bf16.xpose.msra.mxu3 %v2197_v6 }
 0xf0e   :  { %v2446_v3 = vpop.permute.xlu0 %2445 }
 0xf0f   :  { %v2468_v0 = vsel %vm384_vm11, %v2446_v3, 0 }
 0xf10   :  { %2208 = vmatpush.bf16.xpose.msra.mxu3 %v2194_v32  ;;  %2478 = vmatpush.bf16.xpose.msra.mxu1 %v2468_v0 }
 0xf16   :  { %v2442_v35 = vpop.permute.xlu0 %2441 }
 0xf17   :  { %v2462_v40 = vsel %vm384_vm11, %v2442_v35, 0 }
 0xf18   :  { %2209 = vmatpush.bf16.xpose.msra.mxu3 %v2191_v26  ;;  %2479 = vmatpush.bf16.xpose.msra.mxu1 %v2465_v34 }
 0xf1e   :  { %v2438_v46 = vpop.permute.xlu0 %2437 }
 0xf1f   :  { %4047 = vmatmul.msk.bf16.vlgmr.msra.gmra.mxu3 %vm384_vm11, %v5781_v13 }
 0xf20   :  { %2480 = vmatpush.bf16.xpose.msra.mxu1 %v2462_v40 }
 0xf27   :  { %4059 = vmatmul.msk.bf16.vlgmr.msra.gmra.mxu1 %vm384_vm11, %v2434_v56  ;;  %v6718_v56 = vld [vmem:[#allocation9_spill] sm:$0xff] }
 0xf2f   :  { %4048 = vmatmul.msk.bf16.gmra.mxu3 %vm384_vm11, %v5795_v61 }
 0xf37   :  { %4060 = vmatmul.msk.bf16.gmra.mxu1 %vm384_vm11, %v2436_v43  ;;  %v6720_v43 = vld [vmem:[#allocation8_spill] sm:$0xff] }
 0xf3f   :  { %4049 = vmatmul.msk.bf16.gmra.mxu3 %vm384_vm11, %v5777_v59 }
 0xf47   :  { %4061 = vmatmul.msk.bf16.gmra.mxu1 %vm384_vm11, %v2438_v46 }
 0xf4f   :  { %4050 = vmatmul.msk.bf16.gmra.mxu3 %vm384_vm11, %v5787_v33 }
 0xf57   :  { %4062 = vmatmul.msk.bf16.gmra.mxu1 %vm384_vm11, %v2440_v24 }
 0xfa2   :  { %v2211_v39 = vpop.f32.mrf.mxu3 }
 0xfa3   :  { %v5832_v48 = vadd.f32 %v2211_v39, %v4916_v55 }
 0xfa4   :  { %v2482_v37 = vpop.f32.mrf.mxu1 }
 0xfa5   :  { %v5835_v57 = vadd.f32 %v2482_v37, %v4916_v55  ;;  %v2231_v62 = vsel %vm438_vm1, %v5832_v48, -inf }
 0xfa6   :  { %2232 = vmax.xlane.f32.xlu2 %v2231_v62 }
 0xfa7   :  { %v2502_v12 = vsel %vm438_vm1, %v5835_v57, -inf }
 0xfa8   :  { %2503 = vmax.xlane.f32.xlu1 %v2502_v12 }
 0xfaa   :  { %v2213_v25 = vpop.f32.mrf.mxu3 }
 0xfab   :  { %v5842_v16 = vadd.f32 %v2213_v25, %v4928_v4 }
 0xfac   :  { %v2484_v27 = vpop.f32.mrf.mxu1 }
 0xfad   :  { %v5845_v63 = vadd.f32 %v2484_v27, %v4928_v4  ;;  %v2234_v17 = vsel %vm438_vm1, %v5842_v16, -inf }
 0xfae   :  { %2235 = vmax.xlane.f32.xlu0 %v2234_v17 }
 0xfaf   :  { %v2505_v44 = vsel %vm438_vm1, %v5845_v63, -inf }
 0xfb0   :  { %2506 = vmax.xlane.f32.xlu2 %v2505_v44 }
 0xfb2   :  { %v2216_v14 = vpop.f32.mrf.mxu3 }
 0xfb3   :  { %v5852_v60 = vadd.f32 %v2216_v14, %v4937_v10 }
 0xfb4   :  { %v2487_v21 = vpop.f32.mrf.mxu1 }
 0xfb5   :  { %v2237_v52 = vsel %vm438_vm1, %v5852_v60, -inf  ;;  %v5883_v8 = vadd.f32 %v2487_v21, %v4937_v10 }
 0xfb6   :  { %2238 = vmax.xlane.f32.xlu0 %v2237_v52 }
 0xfb7   :  { %v2508_v32 = vsel %vm438_vm1, %v5883_v8, -inf }
 0xfba   :  { %v2218_v38 = vpop.f32.mrf.mxu3 }
 0xfbb   :  { %v5886_v3 = vadd.f32 %v2218_v38, %v4946_v20 }
 0xfbc   :  { %v2489_v15 = vpop.f32.mrf.mxu1 }
 0xfbd   :  { %v5857_v45 = vadd.f32 %v2489_v15, %v4946_v20  ;;  %v2240_v0 = vsel %vm438_vm1, %v5886_v3, -inf }
 0xfbf   :  { %v2511_v28 = vsel %vm438_vm1, %v5857_v45, -inf }
 0xfc0   :  { %2512 = vmax.xlane.f32.xlu0 %v2511_v28 }
 0xfc1   :  { %2327 = vrot.lane.b32.xlu1 %v5777_v59, %s4593_s15 }
 0xfc2   :  { %v2221_v41 = vpop.f32.mrf.mxu3 }
 0xfc3   :  { %v5896_v34 = vadd.f32 %v2221_v41, %v4958_v31 }
 0xfc4   :  { %v2492_v30 = vpop.f32.mrf.mxu1 }
 0xfc5   :  { %v5864_v54 = vadd.f32 %v2492_v30, %v4958_v31  ;;  %v2243_v40 = vsel %vm438_vm1, %v5896_v34, -inf }
 0xfc7   :  { %v2514_v18 = vsel %vm438_vm1, %v5864_v54, -inf }
 0xfc8   :  { %2515 = vmax.xlane.f32.xlu0 %v2514_v18  ;;  %2600 = vrot.lane.b32.xlu2 %v5787_v33, %s4598_s19 }
 0xfc9   :  { %2598 = vrot.lane.b32.xlu1 %v5777_v59, %s4598_s19 }
 0xfca   :  { %v2223_v29 = vpop.f32.mrf.mxu3 }
 0xfcb   :  { %v5893_v26 = vadd.f32 %v2223_v29, %v6719_v36 }
 0xfcc   :  { %v2494_v53 = vpop.f32.mrf.mxu1 }
 0xfcd   :  { %v2246_v35 = vsel %vm438_vm1, %v5893_v26, -inf  ;;  %v5906_v39 = vadd.f32 %v2494_v53, %v6719_v36 }
 0xfcf   :  { %v2517_v62 = vsel %vm438_vm1, %v5906_v39, -inf }
 0xfd2   :  { %v2226_v11 = vpop.f32.mrf.mxu3 }
 0xfd3   :  { %v5913_v12 = vadd.f32 %v2226_v11, %v6720_v43 }
 0xfd4   :  { %v2497_v1 = vpop.f32.mrf.mxu1 }
 0xfd5   :  { %v5903_v46 = vadd.f32 %v2497_v1, %v6720_v43  ;;  %v2249_v25 = vsel %vm438_vm1, %v5913_v12, -inf }
 0xfd7   :  { %v2520_v37 = vsel %vm438_vm1, %v5903_v46, -inf }
 0xfda   :  { %v2228_v24 = vpop.f32.mrf.mxu3 }
 0xfdb   :  { %v5878_v9 = vadd.f32 %v2228_v24, %v6718_v56 }
 0xfdc   :  { %v2499_v19 = vpop.f32.mrf.mxu1 }
 0xfdd   :  { %v5873_v58 = vadd.f32 %v2499_v19, %v6718_v56  ;;  %v2252_v6 = vsel %vm438_vm1, %v5878_v9, -inf }
 0xfdf   :  { %v2523_v2 = vsel %vm438_vm1, %v5873_v58, -inf }
 0xfe0   :  { %2524 = vmax.xlane.f32.xlu0 %v2523_v2 }
 0xfe8   :  { %2253 = vmax.xlane.f32.xlu0 %v2252_v6 }
 0xff1   :  { %2509 = vmax.xlane.f32.xlu2 %v2508_v32 }
 0xff3   :  { %2241 = vmax.xlane.f32.xlu1 %v2240_v0 }
 0xff9   :  { %2247 = vmax.xlane.f32.xlu2 %v2246_v35 }
 0xffb   :  { %2244 = vmax.xlane.f32.xlu1 %v2243_v40 }
0x1001   :  { %2521 = vmax.xlane.f32.xlu2 %v2520_v37 }
0x1003   :  { %2518 = vmax.xlane.f32.xlu1 %v2517_v62 }
0x1009   :  { %2250 = vmax.xlane.f32.xlu2 %v2249_v25 }
0x1019   :  { %v2233_v27 = vpop.xlane.xlu2 %2232 }
0x101a   :  { %v2255_v14 = vsub.f32 %v5832_v48, %v2233_v27 }
0x101b   :  { %v2504_v17 = vpop.xlane.xlu1 %2503 }
0x101c   :  { %v2526_v44 = vsub.f32 %v5835_v57, %v2504_v17  ;;  %2596 = vrot.lane.b32.xlu1 %v5795_v61, %s4598_s19  ;;  %v2263_v52 = vmul.f32 1.442695, %v2255_v14 }
0x101e   :  { %v2534_v21 = vmul.f32 1.442695, %v2526_v44 }
0x1020   :  { %4387 = vpow2.f32 %v2534_v21 }
0x1021   :  { %v2236_v38 = vpop.xlane.xlu0 %2235  ;;  %4389 = vpow2.f32 %v2263_v52 }
0x1022   :  { %v2256_v57 = vsub.f32 %v5842_v16, %v2236_v38 }
0x1023   :  { %v2507_v15 = vpop.xlane.xlu2 %2506 }
0x1024   :  { %v2527_v28 = vsub.f32 %v5845_v63, %v2507_v15  ;;  %2323 = vrot.lane.b32.xlu1 %v5781_v13, %s4593_s15  ;;  %v2265_v48 = vmul.f32 1.442695, %v2256_v57 }
0x1026   :  { %v5924_v41 = vpop.eup %4387  ;;  %v2536_v30 = vmul.f32 1.442695, %v2527_v28 }
0x1027   :  { %v2550_v18 = vsel %vm438_vm1, %v5924_v41, 0.0  ;;  %v5929_v53 = vpop.eup %4389 }
0x1028   :  { %4391 = vpow2.f32 %v2536_v30  ;;  %2551 = vadd.xlane.f32.xlu0 %v2550_v18  ;;  %v2279_v1 = vsel %vm438_vm1, %v5929_v53, 0.0 }
0x1029   :  { %4393 = vpow2.f32 %v2265_v48  ;;  %v2239_v6 = vpop.xlane.xlu0 %2238 }
0x102a   :  { %v2257_v35 = vsub.f32 %v5852_v60, %v2239_v6 }
0x102b   :  { %v2601_v29 = vpop.permute.xlu2 %2600 }
0x102c   :  { %2622 = vmatpush.bf16.msrb.mxu3 %v2601_v29  ;;  %2594 = vrot.lane.b32.xlu1 %v5781_v13, %s4598_s19  ;;  %v2267_v14 = vmul.f32 1.442695, %v2257_v35 }
0x102e   :  { %v5933_v63 = vpop.eup %4391 }
0x102f   :  { %v2553_v16 = vsel %vm438_vm1, %v5933_v63, 0.0  ;;  %v5939_v19 = vpop.eup %4393 }
0x1030   :  { %2554 = vadd.xlane.f32.xlu2 %v2553_v16  ;;  %2280 = vadd.xlane.f32.xlu0 %v2279_v1  ;;  %v2282_v2 = vsel %vm438_vm1, %v5939_v19, 0.0 }
0x1033   :  { %v2328_v11 = vpop.permute.xlu1 %2327  ;;  %v2513_v32 = vpop.xlane.xlu0 %2512 }
0x1034   :  { %2352 = vmatpush.bf16.msra.mxu0 %v2328_v11  ;;  %v2529_v25 = vsub.f32 %v5857_v45, %v2513_v32 }
0x1036   :  { %v2540_v52 = vmul.f32 1.442695, %v2529_v25 }
0x1038   :  { %2283 = vadd.xlane.f32.xlu0 %v2282_v2 }
0x103b   :  { %v2599_v24 = vpop.permute.xlu1 %2598  ;;  %v2516_v0 = vpop.xlane.xlu0 %2515 }
0x103c   :  { %2623 = vmatpush.bf16.msrb.mxu3 %v2599_v24  ;;  %v2530_v38 = vsub.f32 %v5864_v54, %v2516_v0 }
0x103e   :  { %v2542_v45 = vmul.f32 1.442695, %v2530_v38 }
0x104c   :  { %2325 = vrot.lane.b32.xlu0 %v5795_v61, %s4593_s15 }
0x1053   :  { %v2525_v27 = vpop.xlane.xlu0 %2524 }
0x105b   :  { %v2254_v30 = vpop.xlane.xlu0 %2253 }
0x105c   :  { %v2262_v29 = vsub.f32 %v5878_v9, %v2254_v30 }
0x105e   :  { %v2277_v2 = vmul.f32 1.442695, %v2262_v29 }
0x1064   :  { %v2510_v40 = vpop.xlane.xlu2 %2509 }
0x1065   :  { %v2528_v37 = vsub.f32 %v5883_v8, %v2510_v40 }
0x1066   :  { %v2242_v62 = vpop.xlane.xlu1 %2241 }
0x1067   :  { %v2538_v17 = vmul.f32 1.442695, %v2528_v37  ;;  %v2258_v44 = vsub.f32 %v5886_v3, %v2242_v62 }
0x1069   :  { %4395 = vpow2.f32 %v2538_v17  ;;  %v2269_v21 = vmul.f32 1.442695, %v2258_v44 }
0x106b   :  { %4397 = vpow2.f32 %v2269_v21 }
0x106c   :  { %4399 = vpow2.f32 %v2267_v14  ;;  %v2248_v15 = vpop.xlane.xlu2 %2247 }
0x106d   :  { %4401 = vpow2.f32 %v2540_v52  ;;  %v2260_v11 = vsub.f32 %v5893_v26, %v2248_v15  ;;  %v2533_v26 = vsub.f32 %v5873_v58, %v2525_v27 }
0x106e   :  { %v2245_v60 = vpop.xlane.xlu1 %2244  ;;  %4403 = vpow2.f32 %v2542_v45 }
0x106f   :  { %v5950_v28 = vpop.eup %4395  ;;  %v2259_v8 = vsub.f32 %v5896_v34, %v2245_v60  ;;  %v2273_v32 = vmul.f32 1.442695, %v2260_v11  ;;  %v2548_v14 = vmul.f32 1.442695, %v2533_v26 }
0x1070   :  { %v2556_v57 = vsel %vm438_vm1, %v5950_v28, 0.0 }
0x1071   :  { %v5955_v3 = vpop.eup %4397  ;;  %2557 = vadd.xlane.f32.xlu2 %v2556_v57  ;;  %v2271_v48 = vmul.f32 1.442695, %v2259_v8 }
0x1072   :  { %v5957_v18 = vpop.eup %4399  ;;  %v2288_v54 = vsel %vm438_vm1, %v5955_v3, 0.0 }
0x1073   :  { %2289 = vadd.xlane.f32.xlu1 %v2288_v54  ;;  %v5962_v34 = vpop.eup %4401  ;;  %v2285_v1 = vsel %vm438_vm1, %v5957_v18, 0.0  ;;  %4405 = vpow2.f32 %v2271_v48 }
0x1074   :  { %v2522_v16 = vpop.xlane.xlu2 %2521  ;;  %v2559_v24 = vsel %vm438_vm1, %v5962_v34, 0.0  ;;  %v5969_v6 = vpop.eup %4403  ;;  %4407 = vpow2.f32 %v2277_v2 }
0x1075   :  { %v2562_v37 = vsel %vm438_vm1, %v5969_v6, 0.0  ;;  %4409 = vpow2.f32 %v2273_v32 }
0x1076   :  { %2286 = vadd.xlane.f32.xlu0 %v2285_v1  ;;  %v2519_v9 = vpop.xlane.xlu1 %2518 }
0x1077   :  { %v2531_v62 = vsub.f32 %v5906_v39, %v2519_v9  ;;  %v2532_v39 = vsub.f32 %v5903_v46, %v2522_v16 }
0x1079   :  { %2560 = vadd.xlane.f32.xlu2 %v2559_v24  ;;  %v5971_v35 = vpop.eup %4405  ;;  %v2544_v21 = vmul.f32 1.442695, %v2531_v62  ;;  %v2546_v15 = vmul.f32 1.442695, %v2532_v39 }
0x107a   :  { %v2291_v17 = vsel %vm438_vm1, %v5971_v35, 0.0  ;;  %v5980_v44 = vpop.eup %4407 }
0x107b   :  { %v2300_v52 = vsel %vm438_vm1, %v5980_v44, 0.0 }
0x107c   :  { %v2251_v0 = vpop.xlane.xlu2 %2250 }
0x107d   :  { %v2261_v40 = vsub.f32 %v5913_v12, %v2251_v0  ;;  %v5982_v12 = vpop.eup %4409 }
0x107e   :  { %2563 = vadd.xlane.f32.xlu0 %v2562_v37  ;;  %v2294_v38 = vsel %vm438_vm1, %v5982_v12, 0.0 }
0x107f   :  { %v2275_v25 = vmul.f32 1.442695, %v2261_v40 }
0x1081   :  { %4411 = vpow2.f32 %v2275_v25  ;;  %2292 = vadd.xlane.f32.xlu2 %v2291_v17 }
0x1082   :  { %4413 = vpow2.f32 %v2548_v14 }
0x1083   :  { %4415 = vpow2.f32 %v2544_v21  ;;  %v2145_v21 = vld [vmem:[%s6696_s2 + $0x60] sm:$0xf] }
0x1084   :  { %4417 = vpow2.f32 %v2546_v15 }
0x1086   :  { %2301 = vadd.xlane.f32.xlu0 %v2300_v52  ;;  %v2393_v52 = vsel %vm600_vm14, %v2145_v21, 0 }
0x1087   :  { %v5986_v58 = vpop.eup %4411  ;;  %2402 = vmatpush.bf16.msrb.mxu2 %v2393_v52 }
0x1088   :  { %v2297_v27 = vsel %vm438_vm1, %v5986_v58, 0.0  ;;  %v5993_v60 = vpop.eup %4413 }
0x1089   :  { %2298 = vadd.xlane.f32.xlu1 %v2297_v27  ;;  %2295 = vadd.xlane.f32.xlu2 %v2294_v38  ;;  %v5995_v8 = vpop.eup %4415  ;;  %v2571_v46 = vsel %vm438_vm1, %v5993_v60, 0.0 }
0x108a   :  { %v2565_v57 = vsel %vm438_vm1, %v5995_v8, 0.0  ;;  %v6001_v30 = vpop.eup %4417 }
0x108b   :  { %v2568_v48 = vsel %vm438_vm1, %v6001_v30, 0.0 }
0x108e   :  { %v2597_v45 = vpop.permute.xlu1 %2596 }
0x108f   :  { %2624 = vmatpush.bf16.msrb.mxu3 %v2597_v45 }
0x1091   :  { %2572 = vadd.xlane.f32.xlu1 %v2571_v46  ;;  %2566 = vadd.xlane.f32.xlu2 %v2565_v57 }
0x1096   :  { %v2324_v54 = vpop.permute.xlu1 %2323 }
0x1099   :  { %2569 = vadd.xlane.f32.xlu2 %v2568_v48 }
0x109a   :  { %2717 = vrot.lane.b32.xlu0 %v5787_v33, %s4602_s25 }
0x109b   :  { %v2552_v16 = vpop.xlane.xlu0 %2551 }
0x109c   :  { %4419 = vrcp.f32 %v2552_v16 }
0x109e   :  { %v2595_v29 = vpop.permute.xlu1 %2594 }
0x109f   :  { %2625 = vmatpush.bf16.msrb.mxu3 %v2595_v29 }
0x10a2   :  { %2713 = vrot.lane.b32.xlu0 %v5795_v61, %s4602_s25  ;;  %v4420_v11 = vpop.eup %4419 }
0x10a3   :  { %v2555_v1 = vpop.xlane.xlu2 %2554  ;;  %v2281_v24 = vpop.xlane.xlu0 %2280  ;;  %v2582_v32 = vmul.f32 %v4420_v11, %v5924_v41 }
0x10a4   :  { %4421 = vrcp.f32 %v2555_v1 }
0x10aa   :  { %v4422_v2 = vpop.eup %4421  ;;  %2711 = vrot.lane.b32.xlu0 %v5781_v13, %s4602_s25  ;;  %2987 = vrot.lane.b32.xlu1 %v5787_v33, %s4599_s22 }
0x10ab   :  { %v2583_v9 = vmul.f32 %v4422_v2, %v5933_v63  ;;  %v2284_v40 = vpop.xlane.xlu0 %2283 }
0x10ac   :  { %4423 = vrcp.f32 %v2284_v40 }
0x10ad   :  { %v2590_v0 = vpack.c.bf16 %v2583_v9, %v2582_v32  ;;  %4425 = vrcp.f32 %v2281_v24 }
0x10af   :  { %4063 = vmatmul.msk.bf16.vlgmr.msrb.gmra.mxu3 %vm438_vm1, %v2590_v0 }
0x10b1   :  { %2715 = vrot.lane.b32.xlu2 %v5777_v59, %s4602_s25 }
0x10b2   :  { %2981 = vrot.lane.b32.xlu0 %v5781_v13, %s4599_s22  ;;  %2983 = vrot.lane.b32.xlu1 %v5795_v61, %s4599_s22  ;;  %v4424_v41 = vpop.eup %4423 }
0x10b3   :  { %v4426_v37 = vpop.eup %4425  ;;  %v2312_v26 = vmul.f32 %v4424_v41, %v5939_v19 }
0x10b4   :  { %v2311_v62 = vmul.f32 %v4426_v37, %v5929_v53 }
0x10b6   :  { %v2319_v25 = vpack.c.bf16 %v2312_v26, %v2311_v62 }
0x10b9   :  { %2985 = vrot.lane.b32.xlu2 %v5777_v59, %s4599_s22 }
0x10ba   :  { %2975 = vrot.lane.b32.xlu0 %v5795_v61, %s4601_s24  ;;  %2973 = vrot.lane.b32.xlu1 %v5781_v13, %s4601_s24 }
0x10be   :  { %v2326_v63 = vpop.permute.xlu0 %2325 }
0x10bf   :  { %2353 = vmatpush.bf16.msra.mxu0 %v2326_v63 }
0x10c1   :  { %2703 = vrot.lane.b32.xlu2 %v5781_v13, %s4600_s23 }
0x10c2   :  { %2709 = vrot.lane.b32.xlu0 %v5787_v33, %s4600_s23  ;;  %2707 = vrot.lane.b32.xlu1 %v5777_v59, %s4600_s23 }
0x10c3   :  { %2354 = vmatpush.bf16.msra.mxu0 %v2324_v54 }
0x10c6   :  { %4051 = vmatmul.msk.bf16.vlgmr.msra.gmra.mxu0 %vm438_vm1, %v2319_v25 }
0x10c9   :  { %2705 = vrot.lane.b32.xlu2 %v5795_v61, %s4600_s23 }
0x10ca   :  { %2979 = vrot.lane.b32.xlu1 %v5787_v33, %s4601_s24 }
0x10d1   :  { %2977 = vrot.lane.b32.xlu2 %v5777_v59, %s4601_s24 }
0x10d2   :  { %2870 = vrot.lane.b32.xlu1 %v5787_v33, %s4603_s30 }
0x10d9   :  { %3140 = vrot.lane.b32.xlu2 %v5787_v33, %s4604_s0 }
0x10e4   :  { %v2558_v53 = vpop.xlane.xlu2 %2557 }
0x10e6   :  { %v2290_v19 = vpop.xlane.xlu1 %2289 }
0x10e7   :  { %4427 = vrcp.f32 %v2290_v19 }
0x10e9   :  { %v2287_v17 = vpop.xlane.xlu0 %2286 }
0x10ea   :  { %4429 = vrcp.f32 %v2287_v17 }
0x10eb   :  { %4431 = vrcp.f32 %v2558_v53 }
0x10ec   :  { %v2561_v14 = vpop.xlane.xlu2 %2560 }
0x10ed   :  { %4433 = vrcp.f32 %v2561_v14  ;;  %v4428_v39 = vpop.eup %4427 }
0x10ee   :  { %v2314_v33 = vmul.f32 %v4428_v39, %v5955_v3  ;;  %v2146_v3 = vld [vmem:[%s6696_s2 + $0x64] sm:$0xf] }
0x10f0   :  { %v4430_v27 = vpop.eup %4429 }
0x10f1   :  { %v4432_v38 = vpop.eup %4431  ;;  %v2313_v15 = vmul.f32 %v4430_v27, %v5957_v18  ;;  %v2564_v16 = vpop.xlane.xlu0 %2563  ;;  %v2664_v18 = vsel %vm600_vm14, %v2146_v3, 0 }
0x10f2   :  { %v2584_v57 = vmul.f32 %v4432_v38, %v5950_v28  ;;  %2673 = vmatpush.bf16.msrb.mxu0 %v2664_v18 }
0x10f3   :  { %v4434_v45 = vpop.eup %4433  ;;  %v2320_v46 = vpack.c.bf16 %v2314_v33, %v2313_v15 }
0x10f4   :  { %v2585_v54 = vmul.f32 %v4434_v45, %v5962_v34  ;;  %v2293_v48 = vpop.xlane.xlu2 %2292 }
0x10f5   :  { %4052 = vmatmul.msk.bf16.gmra.mxu0 %vm438_vm1, %v2320_v46  ;;  %4435 = vrcp.f32 %v2293_v48 }
0x10f6   :  { %v2591_v29 = vpack.c.bf16 %v2585_v54, %v2584_v57 }
0x10f8   :  { %4064 = vmatmul.msk.bf16.gmra.mxu3 %vm438_vm1, %v2591_v29 }
0x10f9   :  { %v2302_v2 = vpop.xlane.xlu0 %2301 }
0x10fb   :  { %v4436_v28 = vpop.eup %4435 }
0x10fc   :  { %v2296_v1 = vpop.xlane.xlu2 %2295  ;;  %v2315_v34 = vmul.f32 %v4436_v28, %v5971_v35  ;;  %v2299_v9 = vpop.xlane.xlu1 %2298 }
0x10fd   :  { %4437 = vrcp.f32 %v2296_v1 }
0x10fe   :  { %4439 = vrcp.f32 %v2564_v16 }
0x1103   :  { %v4438_v11 = vpop.eup %4437 }
0x1104   :  { %v2316_v24 = vmul.f32 %v4438_v11, %v5982_v12  ;;  %v2567_v32 = vpop.xlane.xlu2 %2566  ;;  %v4440_v40 = vpop.eup %4439 }
0x1105   :  { %4441 = vrcp.f32 %v2567_v32  ;;  %v2586_v63 = vmul.f32 %v4440_v40, %v5969_v6  ;;  %v2573_v53 = vpop.xlane.xlu1 %2572 }
0x1106   :  { %v2321_v0 = vpack.c.bf16 %v2316_v24, %v2315_v34  ;;  %4443 = vrcp.f32 %v2299_v9 }
0x1107   :  { %4445 = vrcp.f32 %v2302_v2 }
0x1108   :  { %4053 = vmatmul.msk.bf16.gmra.mxu0 %vm438_vm1, %v2321_v0 }
0x110b   :  { %v4442_v41 = vpop.eup %4441 }
0x110c   :  { %v2587_v37 = vmul.f32 %v4442_v41, %v5995_v8  ;;  %v2718_v26 = vpop.permute.xlu0 %2717  ;;  %v2570_v62 = vpop.xlane.xlu2 %2569 }
0x110d   :  { %v2741_v35 = vsel %vm384_vm11, %v2718_v26, 0  ;;  %v4444_v25 = vpop.eup %4443  ;;  %4447 = vrcp.f32 %v2570_v62 }
0x110e   :  { %2747 = vmatpush.bf16.xpose.msra.mxu2 %v2741_v35  ;;  %v2592_v12 = vpack.c.bf16 %v2587_v37, %v2586_v63  ;;  %v4446_v19 = vpop.eup %4445  ;;  %v2317_v17 = vmul.f32 %v4444_v25, %v5986_v58  ;;  %4449 = vrcp.f32 %v2573_v53 }
0x110f   :  { %v2318_v14 = vmul.f32 %v4446_v19, %v5980_v44 }
0x1110   :  { %4065 = vmatmul.msk.bf16.gmra.mxu3 %vm438_vm1, %v2592_v12 }
0x1111   :  { %v2322_v21 = vpack.c.bf16 %v2318_v14, %v2317_v17 }
0x1113   :  { %v4448_v52 = vpop.eup %4447 }
0x1114   :  { %v2716_v6 = vpop.permute.xlu2 %2715  ;;  %v2714_v39 = vpop.permute.xlu0 %2713  ;;  %v2588_v38 = vmul.f32 %v4448_v52, %v6001_v30 }
0x1115   :  { %v2738_v8 = vsel %vm384_vm11, %v2716_v6, 0  ;;  %v4450_v27 = vpop.eup %4449  ;;  %v2735_v15 = vsel %vm384_vm11, %v2714_v39, 0 }
0x1116   :  { %2748 = vmatpush.bf16.xpose.msra.mxu2 %v2738_v8  ;;  %v2589_v33 = vmul.f32 %v4450_v27, %v5993_v60 }
0x1118   :  { %4054 = vmatmul.msk.bf16.gmra.mxu0 %vm438_vm1, %v2322_v21  ;;  %v2593_v44 = vpack.c.bf16 %v2589_v33, %v2588_v38 }
0x111c   :  { %v2988_v58 = vpop.permute.xlu1 %2987  ;;  %v2712_v46 = vpop.permute.xlu0 %2711 }
0x111d   :  { %v3011_v45 = vsel %vm384_vm11, %v2988_v58, 0  ;;  %v2986_v57 = vpop.permute.xlu2 %2985  ;;  %v2732_v54 = vsel %vm384_vm11, %v2712_v46, 0  ;;  %v6096_v58 = vld [vmem:[%s6697_s3 + $0xb] ss:$0 sm:$0xff] }
0x111e   :  { %2749 = vmatpush.bf16.xpose.msra.mxu2 %v2735_v15  ;;  %3017 = vmatpush.bf16.xpose.msra.mxu0 %v3011_v45  ;;  %v3008_v29 = vsel %vm384_vm11, %v2986_v57, 0 }
0x1120   :  { %4066 = vmatmul.msk.bf16.gmra.mxu3 %vm438_vm1, %v2593_v44 }
0x1124   :  { %v2984_v48 = vpop.permute.xlu1 %2983  ;;  %v2982_v3 = vpop.permute.xlu0 %2981 }
0x1125   :  { %v3005_v30 = vsel %vm384_vm11, %v2984_v48, 0  ;;  %v2704_v16 = vpop.permute.xlu2 %2703  ;;  %v3002_v28 = vsel %vm384_vm11, %v2982_v3, 0 }
0x1126   :  { %2750 = vmatpush.bf16.xpose.msra.mxu2 %v2732_v54  ;;  %3018 = vmatpush.bf16.xpose.msra.mxu0 %v3008_v29 }
0x112c   :  { %v2974_v60 = vpop.permute.xlu1 %2973  ;;  %v2976_v15 = vpop.permute.xlu0 %2975 }
0x112d   :  { %v2706_v11 = vpop.permute.xlu2 %2705 }
0x112e   :  { %3019 = vmatpush.bf16.xpose.msra.mxu0 %v3005_v30 }
0x1132   :  { %v2627_v1 = vpop.f32.mrf.mxu3 }
0x1134   :  { %v2708_v18 = vpop.permute.xlu1 %2707  ;;  %v2710_v54 = vpop.permute.xlu0 %2709 }
0x1135   :  { %v2978_v9 = vpop.permute.xlu2 %2977 }
0x1136   :  { %3020 = vmatpush.bf16.xpose.msra.mxu0 %v3002_v28 }
0x113a   :  { %v2629_v34 = vpop.f32.mrf.mxu3 }
0x113b   :  { %v2647_v2 = vpack.c.bf16 %v2629_v34, %v2627_v1 }
0x113c   :  { %v2980_v24 = vpop.permute.xlu1 %2979 }
0x113d   :  { %4067 = vmatmul.msk.bf16.vlgmr.msrb.gmra.mxu0 %vm384_vm11, %v2647_v2  ;;  %v3141_v63 = vpop.permute.xlu2 %3140 }
0x1143   :  { %v2356_v32 = vpop.f32.mrf.mxu0 }
0x1144   :  { %v2871_v0 = vpop.permute.xlu1 %2870 }
0x1145   :  { %2892 = vmatpush.bf16.msrb.mxu1 %v2871_v0 }
0x114b   :  { %v2358_v40 = vpop.f32.mrf.mxu0 }
0x114c   :  { %v2376_v41 = vpack.c.bf16 %v2358_v40, %v2356_v32 }
0x114e   :  { %4055 = vmatmul.msk.bf16.vlgmr.msrb.gmra.mxu2 %vm384_vm11, %v2376_v41 }
0x114f   :  { %3162 = vmatpush.bf16.msrb.mxu2 %v3141_v63 }
0x1172   :  { %v2361_v37 = vpop.f32.mrf.mxu0 }
0x117a   :  { %v2363_v26 = vpop.f32.mrf.mxu0 }
0x117b   :  { %v2377_v62 = vpack.c.bf16 %v2363_v26, %v2361_v37  ;;  %v2632_v35 = vpop.f32.mrf.mxu3 }
0x117d   :  { %4056 = vmatmul.msk.bf16.gmra.mxu2 %vm384_vm11, %v2377_v62 }
0x1183   :  { %v2634_v12 = vpop.f32.mrf.mxu3 }
0x1184   :  { %v2648_v25 = vpack.c.bf16 %v2634_v12, %v2632_v35 }
0x1185   :  { %v2366_v53 = vpop.f32.mrf.mxu0 }
0x1186   :  { %4068 = vmatmul.msk.bf16.gmra.mxu0 %vm384_vm11, %v2648_v25 }
0x118d   :  { %v2368_v19 = vpop.f32.mrf.mxu0 }
0x118e   :  { %v2378_v17 = vpack.c.bf16 %v2368_v19, %v2366_v53 }
0x1190   :  { %4057 = vmatmul.msk.bf16.gmra.mxu2 %vm384_vm11, %v2378_v17 }
0x1193   :  { %v2637_v14 = vpop.f32.mrf.mxu3 }
0x1195   :  { %v2371_v6 = vpop.f32.mrf.mxu0 }
0x119b   :  { %v2639_v8 = vpop.f32.mrf.mxu3 }
0x119c   :  { %v2649_v21 = vpack.c.bf16 %v2639_v8, %v2637_v14 }
0x119d   :  { %v2373_v52 = vpop.f32.mrf.mxu0 }
0x119e   :  { %v2379_v39 = vpack.c.bf16 %v2373_v52, %v2371_v6  ;;  %4069 = vmatmul.msk.bf16.gmra.mxu0 %vm384_vm11, %v2649_v21 }
0x11a0   :  { %4058 = vmatmul.msk.bf16.gmra.mxu2 %vm384_vm11, %v2379_v39 }
0x11a3   :  { %v2642_v27 = vpop.f32.mrf.mxu3 }
0x11ab   :  { %v2644_v38 = vpop.f32.mrf.mxu3 }
0x11ac   :  { %v2650_v33 = vpack.c.bf16 %v2644_v38, %v2642_v27 }
0x11ae   :  { %4070 = vmatmul.msk.bf16.gmra.mxu0 %vm384_vm11, %v2650_v33 }
0x11b0   :  { %4071 = vmatmul.msk.bf16.vlgmr.msra.gmra.mxu2 %vm384_vm11, %v2704_v16 }
0x11ba   :  { %v2675_v46 = vpop.f32.mrf.mxu0 }
0x11be   :  { %4083 = vmatmul.msk.bf16.vlgmr.msra.gmra.mxu0 %vm384_vm11, %v2974_v60 }
0x11c0   :  { %4072 = vmatmul.msk.bf16.gmra.mxu2 %vm384_vm11, %v2706_v11 }
0x11c2   :  { %v6107_v29 = vpop.f32.mrf.mxu0 }
0x11ce   :  { %4084 = vmatmul.msk.bf16.gmra.mxu0 %vm384_vm11, %v2976_v15 }
0x11d0   :  { %4073 = vmatmul.msk.bf16.gmra.mxu2 %vm384_vm11, %v2708_v18 }
0x11d1   :  { %v2404_v45 = vpop.f32.mrf.mxu2 }
0x11d2   :  { %v2425_v44 = vadd.f32 %v6096_v58, %v2404_v45 }
0x11d4   :  { %v6100_v57 = vadd.f32 %v2675_v46, %v2425_v44 }
0x11d9   :  { %v6105_v48 = vpop.f32.mrf.mxu2 }
0x11de   :  { %4085 = vmatmul.msk.bf16.gmra.mxu0 %vm384_vm11, %v2978_v9 }
0x11e0   :  { %4074 = vmatmul.msk.bf16.gmra.mxu2 %vm384_vm11, %v2710_v54 }
0x11ee   :  { %4086 = vmatmul.msk.bf16.gmra.mxu0 %vm384_vm11, %v2980_v24 }
0x1200   :  { %v2409_v60 = vpop.f32.mrf.mxu2 }
0x1201   :  { %v2427_v30 = vadd.f32 %v6096_v58, %v2409_v60 }
0x1203   :  { %v2680_v16 = vpop.f32.mrf.mxu0 }
0x1204   :  { %v6110_v1 = vadd.f32 %v2680_v16, %v2427_v30 }
0x1208   :  { %v2411_v3 = vpop.f32.mrf.mxu2 }
0x1209   :  { %v2428_v18 = vadd.f32 %v6096_v58, %v2411_v3 }
0x120b   :  { %v2682_v28 = vpop.f32.mrf.mxu0 }
0x120c   :  { %v6113_v11 = vadd.f32 %v2682_v28, %v2428_v18 }
0x1213   :  { %v2414_v34 = vpop.f32.mrf.mxu2 }
0x1214   :  { %v2429_v2 = vadd.f32 %v6096_v58, %v2414_v34 }
0x121b   :  { %v2416_v24 = vpop.f32.mrf.mxu2  ;;  %v2685_v32 = vpop.f32.mrf.mxu0 }
0x121c   :  { %v6116_v9 = vadd.f32 %v2685_v32, %v2429_v2  ;;  %v2430_v0 = vadd.f32 %v6096_v58, %v2416_v24 }
0x1223   :  { %v2419_v40 = vpop.f32.mrf.mxu2  ;;  %v2687_v41 = vpop.f32.mrf.mxu0 }
0x1224   :  { %v6119_v63 = vadd.f32 %v2687_v41, %v2430_v0  ;;  %v2431_v37 = vadd.f32 %v6096_v58, %v2419_v40 }
0x122b   :  { %v2421_v26 = vpop.f32.mrf.mxu2  ;;  %v2690_v62 = vpop.f32.mrf.mxu0 }
0x122c   :  { %v6122_v35 = vadd.f32 %v2690_v62, %v2431_v37  ;;  %v2432_v12 = vadd.f32 %v6096_v58, %v2421_v26 }
0x1233   :  { %v2692_v25 = vpop.f32.mrf.mxu0  ;;  %v2752_v53 = vpop.f32.mrf.mxu2 }
0x1234   :  { %v6125_v19 = vadd.f32 %v2692_v25, %v2432_v12  ;;  %v6128_v17 = vadd.f32 %v2752_v53, %v4916_v55 }
0x1236   :  { %v2772_v14 = vsel %vm438_vm1, %v6128_v17, -inf }
0x1237   :  { %2773 = vmax.xlane.f32.xlu2 %v2772_v14 }
0x123b   :  { %v2754_v6 = vpop.f32.mrf.mxu2  ;;  %v3022_v8 = vpop.f32.mrf.mxu0 }
0x123c   :  { %v6133_v21 = vadd.f32 %v2754_v6, %v4928_v4  ;;  %v6136_v52 = vadd.f32 %v3022_v8, %v4916_v55 }
0x123e   :  { %v2775_v39 = vsel %vm438_vm1, %v6133_v21, -inf  ;;  %v3042_v27 = vsel %vm438_vm1, %v6136_v52, -inf }
0x123f   :  { %2776 = vmax.xlane.f32.xlu0 %v2775_v39  ;;  %3043 = vmax.xlane.f32.xlu1 %v3042_v27 }
0x1243   :  { %v2757_v38 = vpop.f32.mrf.mxu2  ;;  %v3024_v33 = vpop.f32.mrf.mxu0 }
0x1244   :  { %v6143_v15 = vadd.f32 %v2757_v38, %v4937_v10  ;;  %v6146_v45 = vadd.f32 %v3024_v33, %v4928_v4 }
0x1246   :  { %v2778_v55 = vsel %vm438_vm1, %v6143_v15, -inf  ;;  %v3045_v44 = vsel %vm438_vm1, %v6146_v45, -inf }
0x1247   :  { %2779 = vmax.xlane.f32.xlu0 %v2778_v55  ;;  %3046 = vmax.xlane.f32.xlu2 %v3045_v44 }
0x124b   :  { %v2759_v46 = vpop.f32.mrf.mxu2  ;;  %v3027_v54 = vpop.f32.mrf.mxu0 }
0x124c   :  { %v6153_v60 = vadd.f32 %v2759_v46, %v4946_v20  ;;  %v6156_v30 = vadd.f32 %v3027_v54, %v4937_v10 }
0x124e   :  { %v3048_v4 = vsel %vm438_vm1, %v6156_v30, -inf  ;;  %v2781_v16 = vsel %vm438_vm1, %v6153_v60, -inf }
0x124f   :  { %3049 = vmax.xlane.f32.xlu2 %v3048_v4  ;;  %2782 = vmax.xlane.f32.xlu1 %v2781_v16 }
0x1253   :  { %v2762_v3 = vpop.f32.mrf.mxu2  ;;  %v3029_v18 = vpop.f32.mrf.mxu0 }
0x1254   :  { %v6163_v28 = vadd.f32 %v2762_v3, %v4958_v31  ;;  %v6166_v34 = vadd.f32 %v3029_v18, %v4946_v20 }
0x1256   :  { %v3051_v10 = vsel %vm438_vm1, %v6166_v34, -inf  ;;  %v2784_v2 = vsel %vm438_vm1, %v6163_v28, -inf }
0x1257   :  { %3052 = vmax.xlane.f32.xlu0 %v3051_v10  ;;  %2785 = vmax.xlane.f32.xlu1 %v2784_v2 }
0x125b   :  { %v3032_v24 = vpop.f32.mrf.mxu0 }
0x125c   :  { %v6173_v32 = vadd.f32 %v3032_v24, %v4958_v31  ;;  %v2764_v31 = vpop.f32.mrf.mxu2 }
0x125d   :  { %v6191_v26 = vadd.f32 %v2764_v31, %v6719_v36 }
0x125e   :  { %v3054_v0 = vsel %vm438_vm1, %v6173_v32, -inf }
0x125f   :  { %3055 = vmax.xlane.f32.xlu0 %v3054_v0  ;;  %v2787_v25 = vsel %vm438_vm1, %v6191_v26, -inf }
0x1263   :  { %v3034_v40 = vpop.f32.mrf.mxu0 }
0x1264   :  { %v6178_v20 = vadd.f32 %v3034_v40, %v6719_v36  ;;  %v2767_v62 = vpop.f32.mrf.mxu2 }
0x1265   :  { %v6209_v8 = vadd.f32 %v2767_v62, %v6720_v43 }
0x1266   :  { %v3057_v41 = vsel %vm438_vm1, %v6178_v20, -inf }
0x1267   :  { %3138 = vrot.lane.b32.xlu2 %v5777_v59, %s4604_s0  ;;  %3058 = vmax.xlane.f32.xlu1 %v3057_v41  ;;  %v2790_v27 = vsel %vm438_vm1, %v6209_v8, -inf }
0x126b   :  { %v3037_v37 = vpop.f32.mrf.mxu0 }
0x126c   :  { %v6199_v14 = vadd.f32 %v3037_v37, %v6720_v43 }
0x126e   :  { %v3060_v36 = vsel %vm438_vm1, %v6199_v14, -inf }
0x126f   :  { %3136 = vrot.lane.b32.xlu2 %v5795_v61, %s4604_s0 }
0x1273   :  { %2866 = vrot.lane.b32.xlu0 %v5795_v61, %s4603_s30  ;;  %v3039_v12 = vpop.f32.mrf.mxu0  ;;  %v2769_v61 = vpop.f32.mrf.mxu2 }
0x1274   :  { %v6196_v53 = vadd.f32 %v3039_v12, %v6718_v56  ;;  %v6206_v6 = vadd.f32 %v2769_v61, %v6718_v56 }
0x1276   :  { %v2793_v39 = vsel %vm438_vm1, %v6206_v6, -inf }
0x1280   :  { %2868 = vrot.lane.b32.xlu1 %v5777_v59, %s4603_s30  ;;  %v3063_v59 = vsel %vm438_vm1, %v6196_v53, -inf }
0x1298   :  { %2788 = vmax.xlane.f32.xlu2 %v2787_v25 }
0x129d   :  { %3064 = vmax.xlane.f32.xlu0 %v3063_v59 }
0x12a0   :  { %3061 = vmax.xlane.f32.xlu2 %v3060_v36 }
0x12a5   :  { %2794 = vmax.xlane.f32.xlu0 %v2793_v39 }
0x12a8   :  { %2791 = vmax.xlane.f32.xlu2 %v2790_v27 }
0x12aa   :  { %v2774_v38 = vpop.xlane.xlu2 %2773 }
0x12ab   :  { %v2796_v56 = vsub.f32 %v6128_v17, %v2774_v38 }
0x12ad   :  { %v2804_v54 = vmul.f32 1.442695, %v2796_v56 }
0x12b2   :  { %v3044_v33 = vpop.xlane.xlu1 %3043  ;;  %v2777_v46 = vpop.xlane.xlu0 %2776 }
0x12b3   :  { %v3066_v55 = vsub.f32 %v6136_v52, %v3044_v33  ;;  %v2797_v18 = vsub.f32 %v6133_v21, %v2777_v46 }
0x12b5   :  { %v3074_v44 = vmul.f32 1.442695, %v3066_v55  ;;  %v2806_v52 = vmul.f32 1.442695, %v2797_v18 }
0x12b7   :  { %4451 = vpow2.f32 %v3074_v44 }
0x12b8   :  { %4453 = vpow2.f32 %v2804_v54 }
0x12ba   :  { %v3047_v43 = vpop.xlane.xlu2 %3046  ;;  %v2780_v17 = vpop.xlane.xlu0 %2779 }
0x12bb   :  { %v3067_v4 = vsub.f32 %v6146_v45, %v3047_v43 }
0x12bd   :  { %v3076_v16 = vmul.f32 1.442695, %v3067_v4  ;;  %v6218_v3 = vpop.eup %4451 }
0x12be   :  { %v3090_v10 = vsel %vm438_vm1, %v6218_v3, 0.0  ;;  %v6226_v0 = vpop.eup %4453 }
0x12bf   :  { %4455 = vpow2.f32 %v3076_v16  ;;  %3091 = vadd.xlane.f32.xlu0 %v3090_v10  ;;  %v2820_v31 = vsel %vm438_vm1, %v6226_v0, 0.0 }
0x12c0   :  { %2864 = vrot.lane.b32.xlu2 %v5781_v13, %s4603_s30  ;;  %4457 = vpow2.f32 %v2806_v52 }
0x12c2   :  { %v3050_v2 = vpop.xlane.xlu2 %3049  ;;  %v2783_v24 = vpop.xlane.xlu1 %2782 }
0x12c3   :  { %v3068_v45 = vsub.f32 %v6156_v30, %v3050_v2 }
0x12c5   :  { %v3078_v40 = vmul.f32 1.442695, %v3068_v45  ;;  %v6228_v41 = vpop.eup %4455 }
0x12c6   :  { %v3093_v21 = vsel %vm438_vm1, %v6228_v41, 0.0  ;;  %v6235_v25 = vpop.eup %4457 }
0x12c7   :  { %4459 = vpow2.f32 %v3078_v40  ;;  %3094 = vadd.xlane.f32.xlu1 %v3093_v21  ;;  %2821 = vadd.xlane.f32.xlu0 %v2820_v31  ;;  %v2823_v27 = vsel %vm438_vm1, %v6235_v25, 0.0 }
0x12ca   :  { %v3053_v37 = vpop.xlane.xlu0 %3052  ;;  %v3139_v62 = vpop.permute.xlu2 %3138 }
0x12cb   :  { %v3069_v12 = vsub.f32 %v6166_v34, %v3053_v37  ;;  %v2786_v30 = vpop.xlane.xlu1 %2785  ;;  %3163 = vmatpush.bf16.msrb.mxu2 %v3139_v62 }
0x12cc   :  { %v2800_v36 = vsub.f32 %v6163_v28, %v2786_v30  ;;  %v2798_v28 = vsub.f32 %v6143_v15, %v2780_v17 }
0x12cd   :  { %v6237_v59 = vpop.eup %4459  ;;  %v3080_v61 = vmul.f32 1.442695, %v3069_v12 }
0x12ce   :  { %v3096_v39 = vsel %vm438_vm1, %v6237_v59, 0.0  ;;  %v2812_v38 = vmul.f32 1.442695, %v2800_v36  ;;  %v2808_v44 = vmul.f32 1.442695, %v2798_v28 }
0x12cf   :  { %4461 = vpow2.f32 %v3080_v61  ;;  %3097 = vadd.xlane.f32.xlu1 %v3096_v39  ;;  %2824 = vadd.xlane.f32.xlu0 %v2823_v27 }
0x12d0   :  { %4463 = vpow2.f32 %v2812_v38 }
0x12d1   :  { %4465 = vpow2.f32 %v2808_v44 }
0x12d2   :  { %v3137_v34 = vpop.permute.xlu2 %3136  ;;  %v3056_v46 = vpop.xlane.xlu0 %3055 }
0x12d3   :  { %3164 = vmatpush.bf16.msrb.mxu2 %v3137_v34  ;;  %v3070_v54 = vsub.f32 %v6173_v32, %v3056_v46 }
0x12d5   :  { %v6244_v33 = vpop.eup %4461  ;;  %v3082_v4 = vmul.f32 1.442695, %v3070_v54 }
0x12d6   :  { %v3099_v55 = vsel %vm438_vm1, %v6244_v33, 0.0  ;;  %v6249_v56 = vpop.eup %4463 }
0x12d7   :  { %3100 = vadd.xlane.f32.xlu1 %v3099_v55  ;;  %v2832_v43 = vsel %vm438_vm1, %v6249_v56, 0.0  ;;  %v6256_v16 = vpop.eup %4465  ;;  %4467 = vpow2.f32 %v3082_v4 }
0x12d8   :  { %v2826_v15 = vsel %vm438_vm1, %v6256_v16, 0.0 }
0x12da   :  { %v3059_v18 = vpop.xlane.xlu1 %3058 }
0x12db   :  { %v3071_v37 = vsub.f32 %v6178_v20, %v3059_v18 }
0x12dd   :  { %v6260_v10 = vpop.eup %4467  ;;  %v3084_v30 = vmul.f32 1.442695, %v3071_v37 }
0x12de   :  { %v3102_v32 = vsel %vm438_vm1, %v6260_v10, 0.0 }
0x12df   :  { %2833 = vadd.xlane.f32.xlu1 %v2832_v43 }
0x12e3   :  { %3134 = vrot.lane.b32.xlu0 %v5781_v13, %s4604_s0  ;;  %v2799_v13 = vsub.f32 %v6153_v60, %v2783_v24 }
0x12e5   :  { %v2867_v52 = vpop.permute.xlu0 %2866  ;;  %v2810_v2 = vmul.f32 1.442695, %v2799_v13 }
0x12e7   :  { %4469 = vpow2.f32 %v2810_v2 }
0x12e9   :  { %2827 = vadd.xlane.f32.xlu2 %v2826_v15 }
0x12ed   :  { %v6265_v45 = vpop.eup %4469 }
0x12ee   :  { %v2829_v31 = vsel %vm438_vm1, %v6265_v45, 0.0 }
0x12f1   :  { %3103 = vadd.xlane.f32.xlu2 %v3102_v32 }
0x12f2   :  { %v2869_v17 = vpop.permute.xlu1 %2868 }
0x12f3   :  { %2893 = vmatpush.bf16.msrb.mxu1 %v2869_v17 }
0x12f7   :  { %2894 = vmatpush.bf16.msrb.mxu1 %v2867_v52 }
0x130b   :  { %v2789_v40 = vpop.xlane.xlu2 %2788 }
0x130c   :  { %v2801_v21 = vsub.f32 %v6191_v26, %v2789_v40 }
0x130d   :  { %2830 = vadd.xlane.f32.xlu0 %v2829_v31 }
0x130e   :  { %v2814_v62 = vmul.f32 1.442695, %v2801_v21 }
0x1310   :  { %4471 = vpow2.f32 %v2814_v62  ;;  %v3065_v12 = vpop.xlane.xlu0 %3064 }
0x1311   :  { %4473 = vpow2.f32 %v3084_v30  ;;  %v3073_v28 = vsub.f32 %v6196_v53, %v3065_v12 }
0x1313   :  { %v3062_v61 = vpop.xlane.xlu2 %3061  ;;  %v3088_v46 = vmul.f32 1.442695, %v3073_v28 }
0x1314   :  { %v3072_v60 = vsub.f32 %v6199_v14, %v3062_v61 }
0x1316   :  { %v6271_v36 = vpop.eup %4471  ;;  %v3086_v27 = vmul.f32 1.442695, %v3072_v60 }
0x1317   :  { %v2835_v24 = vsel %vm438_vm1, %v6271_v36, 0.0  ;;  %v6277_v34 = vpop.eup %4473 }
0x1318   :  { %v2795_v26 = vpop.xlane.xlu0 %2794  ;;  %2836 = vadd.xlane.f32.xlu1 %v2835_v24  ;;  %v3105_v14 = vsel %vm438_vm1, %v6277_v34, 0.0 }
0x1319   :  { %v2803_v39 = vsub.f32 %v6206_v6, %v2795_v26 }
0x131b   :  { %v2818_v20 = vmul.f32 1.442695, %v2803_v39  ;;  %v2792_v38 = vpop.xlane.xlu2 %2791 }
0x131c   :  { %v2802_v55 = vsub.f32 %v6209_v8, %v2792_v38 }
0x131d   :  { %4475 = vpow2.f32 %v2818_v20 }
0x131e   :  { %4477 = vpow2.f32 %v3086_v27  ;;  %v2816_v44 = vmul.f32 1.442695, %v2802_v55 }
0x1320   :  { %4479 = vpow2.f32 %v2816_v44  ;;  %3106 = vadd.xlane.f32.xlu1 %v3105_v14 }
0x1321   :  { %4481 = vpow2.f32 %v3088_v46 }
0x1323   :  { %v6283_v54 = vpop.eup %4475  ;;  %v2865_v6 = vpop.permute.xlu2 %2864 }
0x1324   :  { %v6285_v43 = vpop.eup %4477  ;;  %2895 = vmatpush.bf16.msrb.mxu1 %v2865_v6  ;;  %v2841_v8 = vsel %vm438_vm1, %v6283_v54, 0.0 }
0x1325   :  { %2842 = vadd.xlane.f32.xlu2 %v2841_v8  ;;  %v3108_v15 = vsel %vm438_vm1, %v6285_v43, 0.0 }
0x1326   :  { %v6289_v4 = vpop.eup %4479 }
0x1327   :  { %v2838_v53 = vsel %vm438_vm1, %v6289_v4, 0.0  ;;  %v6295_v18 = vpop.eup %4481 }
0x1328   :  { %2839 = vadd.xlane.f32.xlu0 %v2838_v53  ;;  %3109 = vadd.xlane.f32.xlu1 %v3108_v15  ;;  %v3111_v32 = vsel %vm438_vm1, %v6295_v18, 0.0 }
0x1330   :  { %3112 = vadd.xlane.f32.xlu0 %v3111_v32 }
0x1332   :  { %v3092_v17 = vpop.xlane.xlu0 %3091 }
0x133a   :  { %v2822_v52 = vpop.xlane.xlu0 %2821  ;;  %v3095_v2 = vpop.xlane.xlu1 %3094 }
0x133b   :  { %4483 = vrcp.f32 %v2822_v52 }
0x1341   :  { %v4484_v40 = vpop.eup %4483 }
0x1342   :  { %v2825_v13 = vpop.xlane.xlu0 %2824  ;;  %v2852_v31 = vmul.f32 %v4484_v40, %v6226_v0  ;;  %v3098_v12 = vpop.xlane.xlu1 %3097 }
0x1343   :  { %4485 = vrcp.f32 %v2825_v13 }
0x1344   :  { %4487 = vrcp.f32 %v3095_v2 }
0x1345   :  { %4489 = vrcp.f32 %v3092_v17 }
0x1349   :  { %v4486_v21 = vpop.eup %4485 }
0x134a   :  { %v2853_v37 = vmul.f32 %v4486_v21, %v6235_v25  ;;  %v4488_v30 = vpop.eup %4487  ;;  %v3101_v27 = vpop.xlane.xlu1 %3100 }
0x134b   :  { %v4490_v61 = vpop.eup %4489  ;;  %v3123_v60 = vmul.f32 %v4488_v30, %v6228_v41  ;;  %4491 = vrcp.f32 %v3101_v27 }
0x134c   :  { %v2860_v62 = vpack.c.bf16 %v2853_v37, %v2852_v31  ;;  %v3122_v24 = vmul.f32 %v4490_v61, %v6218_v3  ;;  %4493 = vrcp.f32 %v3098_v12 }
0x134e   :  { %4075 = vmatmul.msk.bf16.vlgmr.msrb.gmra.mxu1 %vm438_vm1, %v2860_v62  ;;  %v3130_v39 = vpack.c.bf16 %v3123_v60, %v3122_v24 }
0x1351   :  { %v4492_v0 = vpop.eup %4491 }
0x1352   :  { %v4494_v25 = vpop.eup %4493  ;;  %v3125_v20 = vmul.f32 %v4492_v0, %v6244_v33  ;;  %v2834_v28 = vpop.xlane.xlu1 %2833 }
0x1353   :  { %v3124_v38 = vmul.f32 %v4494_v25, %v6237_v59 }
0x1355   :  { %v3135_v26 = vpop.permute.xlu0 %3134  ;;  %v3131_v55 = vpack.c.bf16 %v3125_v20, %v3124_v38 }
0x1356   :  { %3165 = vmatpush.bf16.msrb.mxu2 %v3135_v26 }
0x1359   :  { %4087 = vmatmul.msk.bf16.vlgmr.msrb.gmra.mxu2 %vm438_vm1, %v3130_v39  ;;  %v2147_v39 = vld [vmem:[%s6696_s2 + $0x68] sm:$0xf] }
0x135a   :  { %v2934_v0 = vsel %vm600_vm14, %v2147_v39, 0 }
0x135b   :  { %2943 = vmatpush.bf16.msra.mxu3 %v2934_v0 }
0x135c   :  { %v2828_v41 = vpop.xlane.xlu2 %2827 }
0x135d   :  { %4495 = vrcp.f32 %v2828_v41 }
0x1363   :  { %v4496_v44 = vpop.eup %4495 }
0x1364   :  { %v2854_v46 = vmul.f32 %v4496_v44, %v6256_v16  ;;  %v3104_v59 = vpop.xlane.xlu2 %3103 }
0x1369   :  { %4088 = vmatmul.msk.bf16.gmra.mxu2 %vm438_vm1, %v3131_v55 }
0x1380   :  { %v2831_v3 = vpop.xlane.xlu0 %2830 }
0x1381   :  { %4497 = vrcp.f32 %v2831_v3 }
0x1387   :  { %v4498_v14 = vpop.eup %4497 }
0x1388   :  { %v2855_v6 = vmul.f32 %v4498_v14, %v6265_v45 }
0x138a   :  { %v2861_v53 = vpack.c.bf16 %v2855_v6, %v2854_v46 }
0x138b   :  { %v2837_v8 = vpop.xlane.xlu1 %2836 }
0x138c   :  { %4076 = vmatmul.msk.bf16.gmra.mxu1 %vm438_vm1, %v2861_v53  ;;  %4499 = vrcp.f32 %v2837_v8 }
0x138d   :  { %4501 = vrcp.f32 %v2834_v28 }
0x138e   :  { %4503 = vrcp.f32 %v3104_v59 }
0x1392   :  { %v4500_v15 = vpop.eup %4499 }
0x1393   :  { %v3107_v33 = vpop.xlane.xlu1 %3106  ;;  %v4502_v32 = vpop.eup %4501  ;;  %v2857_v17 = vmul.f32 %v4500_v15, %v6271_v36 }
0x1394   :  { %4505 = vrcp.f32 %v3107_v33  ;;  %v4504_v52 = vpop.eup %4503  ;;  %v2856_v13 = vmul.f32 %v4502_v32, %v6249_v56 }
0x1395   :  { %v3126_v45 = vmul.f32 %v4504_v52, %v6260_v10 }
0x1396   :  { %v2862_v21 = vpack.c.bf16 %v2857_v17, %v2856_v13 }
0x1398   :  { %v2843_v31 = vpop.xlane.xlu2 %2842 }
0x139a   :  { %v4506_v16 = vpop.eup %4505 }
0x139b   :  { %v3127_v2 = vmul.f32 %v4506_v16, %v6277_v34  ;;  %v2840_v40 = vpop.xlane.xlu0 %2839  ;;  %v3110_v62 = vpop.xlane.xlu1 %3109 }
0x139c   :  { %4077 = vmatmul.msk.bf16.gmra.mxu1 %vm438_vm1, %v2862_v21  ;;  %4507 = vrcp.f32 %v2840_v40 }
0x139d   :  { %v3132_v37 = vpack.c.bf16 %v3127_v2, %v3126_v45  ;;  %4509 = vrcp.f32 %v2843_v31  ;;  %v2426_v31 = vadd.f32 %v6096_v58, %v6105_v48 }
0x139e   :  { %4511 = vrcp.f32 %v3110_v62 }
0x139f   :  { %4089 = vmatmul.msk.bf16.gmra.mxu2 %vm438_vm1, %v3132_v37 }
0x13a2   :  { %v4508_v12 = vpop.eup %4507 }
0x13a3   :  { %v3113_v36 = vpop.xlane.xlu0 %3112  ;;  %v4510_v56 = vpop.eup %4509  ;;  %v2858_v10 = vmul.f32 %v4508_v12, %v6289_v4  ;;  %v2696_v12 = vadd.f32 %v6107_v29, %v2426_v31 }
0x13a4   :  { %4513 = vrcp.f32 %v3113_v36  ;;  %v4512_v30 = vpop.eup %4511  ;;  %v2859_v34 = vmul.f32 %v4510_v56, %v6283_v54  ;;  %v2148_v54 = vld [vmem:[%s6696_s2 + $0x6c] sm:$0xf] }
0x13a5   :  { %v3128_v60 = vmul.f32 %v4512_v30, %v6285_v43  ;;  %v3204_v43 = vsel %vm600_vm14, %v2148_v54, 0 }
0x13a6   :  { %v2863_v26 = vpack.c.bf16 %v2859_v34, %v2858_v10  ;;  %3213 = vmatpush.bf16.msra.mxu1 %v3204_v43 }
0x13aa   :  { %v4514_v61 = vpop.eup %4513 }
0x13ab   :  { %v3129_v24 = vmul.f32 %v4514_v61, %v6295_v18 }
0x13ac   :  { %4078 = vmatmul.msk.bf16.gmra.mxu1 %vm438_vm1, %v2863_v26 }
0x13ad   :  { %v3133_v27 = vpack.c.bf16 %v3129_v24, %v3128_v60 }
0x13af   :  { %4090 = vmatmul.msk.bf16.gmra.mxu2 %vm438_vm1, %v3133_v27 }
0x13cb   :  { %v2897_v4 = vpop.f32.mrf.mxu1 }
0x13d3   :  { %v2899_v18 = vpop.f32.mrf.mxu1 }
0x13d4   :  { %v2917_v25 = vpack.c.bf16 %v2899_v18, %v2897_v4 }
0x13d6   :  { %4079 = vmatmul.msk.bf16.vlgmr.msra.gmra.mxu3 %vm384_vm11, %v2917_v25 }
0x13dc   :  { %v3167_v20 = vpop.f32.mrf.mxu2 }
0x13e4   :  { %v3169_v38 = vpop.f32.mrf.mxu2 }
0x13e5   :  { %v3187_v55 = vpack.c.bf16 %v3169_v38, %v3167_v20 }
0x13e7   :  { %4091 = vmatmul.msk.bf16.vlgmr.msra.gmra.mxu1 %vm384_vm11, %v3187_v55 }
0x13ec   :  { %v3172_v41 = vpop.f32.mrf.mxu2 }
0x13f4   :  { %v3174_v3 = vpop.f32.mrf.mxu2 }
0x13f5   :  { %v3188_v28 = vpack.c.bf16 %v3174_v3, %v3172_v41 }
0x13f7   :  { %4092 = vmatmul.msk.bf16.gmra.mxu1 %vm384_vm11, %v3188_v28 }
0x1409   :  { %v2902_v44 = vpop.f32.mrf.mxu1 }
0x1411   :  { %v2904_v14 = vpop.f32.mrf.mxu1 }
0x1412   :  { %v2918_v46 = vpack.c.bf16 %v2904_v14, %v2902_v44 }
0x1414   :  { %4080 = vmatmul.msk.bf16.gmra.mxu3 %vm384_vm11, %v2918_v46 }
0x1419   :  { %v2907_v6 = vpop.f32.mrf.mxu1 }
0x1421   :  { %v2909_v8 = vpop.f32.mrf.mxu1 }
0x1422   :  { %v3177_v53 = vpop.f32.mrf.mxu2  ;;  %v2919_v59 = vpack.c.bf16 %v2909_v8, %v2907_v6 }
0x1424   :  { %4081 = vmatmul.msk.bf16.gmra.mxu3 %vm384_vm11, %v2919_v59 }
0x1429   :  { %v2912_v33 = vpop.f32.mrf.mxu1 }
0x142a   :  { %v3179_v15 = vpop.f32.mrf.mxu2 }
0x142b   :  { %v3189_v32 = vpack.c.bf16 %v3179_v15, %v3177_v53 }
0x142d   :  { %4093 = vmatmul.msk.bf16.gmra.mxu1 %vm384_vm11, %v3189_v32 }
0x1431   :  { %v2914_v17 = vpop.f32.mrf.mxu1 }
0x1432   :  { %v3182_v52 = vpop.f32.mrf.mxu2  ;;  %v2920_v13 = vpack.c.bf16 %v2914_v17, %v2912_v33 }
0x1434   :  { %4082 = vmatmul.msk.bf16.gmra.mxu3 %vm384_vm11, %v2920_v13 }
0x143a   :  { %v3184_v16 = vpop.f32.mrf.mxu2 }
0x143b   :  { %v3190_v45 = vpack.c.bf16 %v3184_v16, %v3182_v52 }
0x143d   :  { %4094 = vmatmul.msk.bf16.gmra.mxu1 %vm384_vm11, %v3190_v45 }
0x1459   :  { %v2945_v2 = vpop.f32.mrf.mxu3 }
0x145a   :  { %v2965_v40 = vadd.f32 %v2945_v2, %v6100_v57 }
0x1461   :  { %v2947_v36 = vpop.f32.mrf.mxu3 }
0x1462   :  { %v2966_v10 = vadd.f32 %v2947_v36, %v2696_v12 }
0x1464   :  { %v3215_v21 = vpop.f32.mrf.mxu1 }
0x1465   :  { %v3235_v37 = vadd.f32 %v3215_v21, %v2965_v40 }
0x1467   :  { %v3243_v62 = vadd.f32 %v3235_v37, %v5721_v23 }
0x1469   :  { %v3253_v56 = vsel %vm78_vm0, %v3243_v62, 0.0 }
0x146a   :  { %3254 = vadd.xlane.f32.xlu2 %v3253_v56 }
0x146c   :  { %v3217_v30 = vpop.f32.mrf.mxu1 }
0x146d   :  { %v3236_v34 = vadd.f32 %v3217_v30, %v2966_v10 }
0x146f   :  { %v3244_v61 = vadd.f32 %v3236_v34, %v5724_v49 }
0x1471   :  { %v3256_v57 = vsel %vm78_vm0, %v3244_v61, 0.0 }
0x1472   :  { %3257 = vadd.xlane.f32.xlu1 %v3256_v57 }
0x1474   :  { %v3220_v60 = vpop.f32.mrf.mxu1 }
0x147c   :  { %v3222_v27 = vpop.f32.mrf.mxu1 }
0x1497   :  { %v2950_v24 = vpop.f32.mrf.mxu3 }
0x1498   :  { %v2967_v58 = vadd.f32 %v2950_v24, %v6110_v1 }
0x149a   :  { %v3237_v48 = vadd.f32 %v3220_v60, %v2967_v58 }
0x149c   :  { %v3245_v23 = vadd.f32 %v3237_v48, %v5738_v7 }
0x149e   :  { %v3259_v29 = vsel %vm78_vm0, %v3245_v23, 0.0 }
0x149f   :  { %v2952_v26 = vpop.f32.mrf.mxu3  ;;  %3260 = vadd.xlane.f32.xlu0 %v3259_v29 }
0x14a0   :  { %v2968_v39 = vadd.f32 %v2952_v26, %v6113_v11 }
0x14a2   :  { %v3238_v0 = vadd.f32 %v3222_v27, %v2968_v39  ;;  %v4149_v27 = vld [vmem:[%s6696_s2 + $0x78] sm:$0xff] }
0x14a3   :  { %3487 = vmatpush.bf16.msrb.mxu3 %v4149_v27 }
0x14a4   :  { %v3246_v49 = vadd.f32 %v3238_v0, %v5741_v42 }
0x14a6   :  { %v3262_v54 = vsel %vm78_vm0, %v3246_v49, 0.0 }
0x14a7   :  { %v2955_v43 = vpop.f32.mrf.mxu3  ;;  %3263 = vadd.xlane.f32.xlu2 %v3262_v54 }
0x14a8   :  { %v2969_v4 = vadd.f32 %v2955_v43, %v6116_v9  ;;  %v4148_v43 = vld [vmem:[%s6696_s2 + $0x70] sm:$0xff] }
0x14a9   :  { %3488 = vmatpush.bf16.msrb.mxu3 %v4148_v43 }
0x14aa   :  { %v3225_v1 = vpop.f32.mrf.mxu1 }
0x14ab   :  { %v3239_v18 = vadd.f32 %v3225_v1, %v2969_v4 }
0x14ad   :  { %v3247_v7 = vadd.f32 %v3239_v18, %v5751_v47 }
0x14af   :  { %v3265_v25 = vsel %vm78_vm0, %v3247_v7, 0.0  ;;  %v2957_v20 = vpop.f32.mrf.mxu3 }
0x14b0   :  { %3266 = vadd.xlane.f32.xlu1 %v3265_v25  ;;  %v2970_v11 = vadd.f32 %v2957_v20, %v6119_v63 }
0x14b2   :  { %v3227_v38 = vpop.f32.mrf.mxu1 }
0x14b3   :  { %v3240_v55 = vadd.f32 %v3227_v38, %v2970_v11 }
0x14b5   :  { %v3248_v42 = vadd.f32 %v3240_v55, %v5754_v51 }
0x14b7   :  { %v3268_v41 = vsel %vm78_vm0, %v3248_v42, 0.0  ;;  %v2960_v3 = vpop.f32.mrf.mxu3 }
0x14b8   :  { %3269 = vadd.xlane.f32.xlu0 %v3268_v41  ;;  %v2971_v9 = vadd.f32 %v2960_v3, %v6122_v35 }
0x14ba   :  { %v3230_v28 = vpop.f32.mrf.mxu1 }
0x14bb   :  { %v3241_v44 = vadd.f32 %v3230_v28, %v2971_v9 }
0x14bd   :  { %v3249_v47 = vadd.f32 %v3241_v44, %v5766_v5 }
0x14bf   :  { %v3271_v14 = vsel %vm78_vm0, %v3249_v47, 0.0  ;;  %v2962_v46 = vpop.f32.mrf.mxu3 }
0x14c0   :  { %3272 = vadd.xlane.f32.xlu0 %v3271_v14  ;;  %v2972_v8 = vadd.f32 %v2962_v46, %v6125_v19 }
0x14c2   :  { %v3232_v53 = vpop.f32.mrf.mxu1 }
0x14c3   :  { %v3242_v35 = vadd.f32 %v3232_v53, %v2972_v8  ;;  %v6424_v8 = vld [vmem:[%s6697_s3 + $0xc] ss:$0 sm:$0xff] }
0x14c5   :  { %v3250_v32 = vadd.f32 %v3242_v35, %v5769_v50 }
0x14c7   :  { %v3274_v52 = vsel %vm78_vm0, %v3250_v32, 0.0 }
0x14dd   :  { %v3255_v6 = vpop.xlane.xlu2 %3254 }
0x14de   :  { %v3277_v63 = vmul.f32 %v3255_v6, %v4667_v22 }
0x14e0   :  { %v6364_v51 = vsub.f32 %v3243_v62, %v3277_v63 }
0x14e2   :  { %v3293_v59 = vmul.f32 %v6364_v51, %v6364_v51 }
0x14e4   :  { %v3301_v33 = vsel %vm78_vm0, %v3293_v59, 0.0 }
0x14e5   :  { %3302 = vadd.xlane.f32.xlu2 %v3301_v33  ;;  %v3258_v5 = vpop.xlane.xlu1 %3257  ;;  %v6430_v33 = vld [vmem:[%s6697_s3 + $0xd] ss:$0 sm:$0xff] }
0x14e6   :  { %v3278_v15 = vmul.f32 %v3258_v5, %v4667_v22 }
0x14e8   :  { %v6371_v17 = vsub.f32 %v3244_v61, %v3278_v15 }
0x14ea   :  { %v3294_v19 = vmul.f32 %v6371_v17, %v6371_v17 }
0x14ec   :  { %v3304_v13 = vsel %vm78_vm0, %v3294_v19, 0.0 }
0x14ed   :  { %3275 = vadd.xlane.f32.xlu2 %v3274_v52  ;;  %3305 = vadd.xlane.f32.xlu1 %v3304_v13 }
0x1512   :  { %v3261_v16 = vpop.xlane.xlu0 %3260 }
0x1513   :  { %v3279_v45 = vmul.f32 %v3261_v16, %v4667_v22 }
0x1515   :  { %v6378_v2 = vsub.f32 %v3245_v23, %v3279_v45 }
0x1517   :  { %v3295_v40 = vmul.f32 %v6378_v2, %v6378_v2 }
0x1519   :  { %v3307_v50 = vsel %vm78_vm0, %v3295_v40, 0.0 }
0x151a   :  { %v3264_v21 = vpop.xlane.xlu2 %3263  ;;  %3308 = vadd.xlane.f32.xlu1 %v3307_v50 }
0x151b   :  { %v3280_v31 = vmul.f32 %v3264_v21, %v4667_v22 }
0x151d   :  { %v6384_v37 = vsub.f32 %v3246_v49, %v3280_v31 }
0x151f   :  { %v3296_v62 = vmul.f32 %v6384_v37, %v6384_v37 }
0x1521   :  { %v3310_v36 = vsel %vm78_vm0, %v3296_v62, 0.0 }
0x1522   :  { %3311 = vadd.xlane.f32.xlu0 %v3310_v36 }
0x1523   :  { %v3267_v12 = vpop.xlane.xlu1 %3266 }
0x1524   :  { %v3281_v56 = vmul.f32 %v3267_v12, %v4667_v22 }
0x1526   :  { %v6390_v10 = vsub.f32 %v3247_v7, %v3281_v56 }
0x1528   :  { %v3297_v30 = vmul.f32 %v6390_v10, %v6390_v10 }
0x152a   :  { %v3313_v34 = vsel %vm78_vm0, %v3297_v30, 0.0 }
0x152b   :  { %v3270_v61 = vpop.xlane.xlu0 %3269  ;;  %3314 = vadd.xlane.f32.xlu2 %v3313_v34 }
0x152c   :  { %v3282_v57 = vmul.f32 %v3270_v61, %v4667_v22 }
0x152e   :  { %v6396_v60 = vsub.f32 %v3248_v42, %v3282_v57 }
0x1530   :  { %v3298_v24 = vmul.f32 %v6396_v60, %v6396_v60 }
0x1532   :  { %v3316_v58 = vsel %vm78_vm0, %v3298_v24, 0.0 }
0x1533   :  { %v3273_v48 = vpop.xlane.xlu0 %3272  ;;  %3317 = vadd.xlane.f32.xlu1 %v3316_v58 }
0x1534   :  { %v3283_v23 = vmul.f32 %v3273_v48, %v4667_v22 }
0x1536   :  { %v6402_v29 = vsub.f32 %v3249_v47, %v3283_v23 }
0x1538   :  { %v3299_v26 = vmul.f32 %v6402_v29, %v6402_v29 }
0x153a   :  { %v3319_v39 = vsel %vm78_vm0, %v3299_v26, 0.0 }
0x153b   :  { %3320 = vadd.xlane.f32.xlu0 %v3319_v39 }
0x1558   :  { %v3303_v0 = vpop.xlane.xlu2 %3302 }
0x1559   :  { %v3325_v49 = vmul.f32 %v3303_v0, %v4667_v22 }
0x155b   :  { %v3333_v54 = vadd.f32 1e-12, %v3325_v49 }
0x155d   :  { %4515 = vrsqrt.f32 %v3333_v54  ;;  %vm3347_vm14 = vweird.f32 %v3333_v54 }
0x1560   :  { %v3276_v4 = vpop.xlane.xlu2 %3275  ;;  %v3306_v1 = vpop.xlane.xlu1 %3305 }
0x1561   :  { %v3284_v18 = vmul.f32 %v3276_v4, %v4667_v22  ;;  %v3326_v7 = vmul.f32 %v3306_v1, %v4667_v22 }
0x1563   :  { %v4516_v25 = vpop.eup %4515  ;;  %v6416_v20 = vsub.f32 %v3250_v32, %v3284_v18  ;;  %v3334_v11 = vadd.f32 1e-12, %v3326_v7 }
0x1564   :  { %v3342_v38 = vmul.f32 %v4516_v25, %v3333_v54  ;;  %vm3348_vm11 = vweird.f32 %v4516_v25 }
0x1565   :  { %4517 = vrsqrt.f32 %v3334_v11  ;;  %v3300_v55 = vmul.f32 %v6416_v20, %v6416_v20  ;;  %vm3349_vm4 = vmor %vm3347_vm14, %vm3348_vm11  ;;  %vm3357_vm6 = vweird.f32 %v3334_v11 }
0x1566   :  { %v3343_v42 = vmul.f32 %v4516_v25, %v3342_v38 }
0x1567   :  { %v3322_v41 = vsel %vm78_vm0, %v3300_v55, 0.0 }
0x1568   :  { %v3344_v3 = vmul.f32 0.5, %v3343_v42  ;;  %3323 = vadd.xlane.f32.xlu2 %v3322_v41 }
0x156a   :  { %v3345_v9 = vsub.f32 1.5, %v3344_v3 }
0x156b   :  { %v4518_v28 = vpop.eup %4517 }
0x156c   :  { %v3346_v44 = vmul.f32 %v4516_v25, %v3345_v9  ;;  %v3352_v47 = vmul.f32 %v4518_v28, %v3334_v11  ;;  %vm3358_vm5 = vweird.f32 %v4518_v28 }
0x156d   :  { %vm3359_vm7 = vmor %vm3357_vm6, %vm3358_vm5 }
0x156e   :  { %v3353_v14 = vmul.f32 %v4518_v28, %v3352_v47  ;;  %v3350_v46 = vsel %vm3349_vm4, %v4516_v25, %v3346_v44 }
0x156f   :  { %v3421_v53 = vmul.f32 %v3350_v46, %v6364_v51 }
0x1570   :  { %v3354_v6 = vmul.f32 0.5, %v3353_v14 }
0x1571   :  { %v3430_v5 = vmul.f32 %v6424_v8, %v3421_v53 }
0x1572   :  { %v3355_v63 = vsub.f32 1.5, %v3354_v6 }
0x1573   :  { %v6436_v19 = vadd.f32 %v6430_v33, %v3430_v5 }
0x1574   :  { %v3356_v59 = vmul.f32 %v4518_v28, %v3355_v63 }
0x1576   :  { %v3360_v35 = vsel %vm3359_vm7, %v4518_v28, %v3356_v59 }
0x1577   :  { %v3422_v15 = vmul.f32 %v3360_v35, %v6371_v17 }
0x1579   :  { %v3431_v32 = vmul.f32 %v6424_v8, %v3422_v15 }
0x157b   :  { %v6439_v51 = vadd.f32 %v6430_v33, %v3431_v32 }
0x157d   :  { %v3447_v52 = vpack.c.bf16 %v6439_v51, %v6436_v19 }
0x157f   :  { %4103 = vmatmul.msk.bf16.vlgmr.msrb.gmra.mxu3 %vm78_vm0, %v3447_v52 }
0x158d   :  { %v3309_v13 = vpop.xlane.xlu1 %3308 }
0x158e   :  { %v3327_v16 = vmul.f32 %v3309_v13, %v4667_v22 }
0x1590   :  { %v3335_v45 = vadd.f32 1e-12, %v3327_v16 }
0x1592   :  { %4519 = vrsqrt.f32 %v3335_v45  ;;  %vm3367_vm9 = vweird.f32 %v3335_v45 }
0x1595   :  { %v3312_v40 = vpop.xlane.xlu0 %3311 }
0x1596   :  { %v3328_v17 = vmul.f32 %v3312_v40, %v4667_v22 }
0x1598   :  { %v4520_v50 = vpop.eup %4519  ;;  %v3336_v21 = vadd.f32 1e-12, %v3328_v17 }
0x1599   :  { %v3362_v31 = vmul.f32 %v4520_v50, %v3335_v45  ;;  %vm3368_vm8 = vweird.f32 %v4520_v50 }
0x159a   :  { %4521 = vrsqrt.f32 %v3336_v21  ;;  %vm3369_vm10 = vmor %vm3367_vm9, %vm3368_vm8  ;;  %vm3377_vm13 = vweird.f32 %v3336_v21 }
0x159b   :  { %v3363_v62 = vmul.f32 %v4520_v50, %v3362_v31 }
0x159d   :  { %v3364_v36 = vmul.f32 0.5, %v3363_v62 }
0x159e   :  { %v3315_v12 = vpop.xlane.xlu2 %3314 }
0x159f   :  { %v3329_v56 = vmul.f32 %v3315_v12, %v4667_v22  ;;  %v3365_v30 = vsub.f32 1.5, %v3364_v36 }
0x15a0   :  { %v4522_v34 = vpop.eup %4521 }
0x15a1   :  { %v3337_v61 = vadd.f32 1e-12, %v3329_v56  ;;  %v3366_v57 = vmul.f32 %v4520_v50, %v3365_v30  ;;  %v3372_v24 = vmul.f32 %v4522_v34, %v3336_v21  ;;  %vm3378_vm12 = vweird.f32 %v4522_v34 }
0x15a2   :  { %vm3379_vm15 = vmor %vm3377_vm13, %vm3378_vm12 }
0x15a3   :  { %4523 = vrsqrt.f32 %v3337_v61  ;;  %v3373_v58 = vmul.f32 %v4522_v34, %v3372_v24  ;;  %v3370_v48 = vsel %vm3369_vm10, %v4520_v50, %v3366_v57  ;;  %vm3387_vm3 = vweird.f32 %v3337_v61 }
0x15a4   :  { %v3423_v49 = vmul.f32 %v3370_v48, %v6378_v2 }
0x15a5   :  { %v3374_v23 = vmul.f32 0.5, %v3373_v58 }
0x15a6   :  { %v3318_v26 = vpop.xlane.xlu1 %3317  ;;  %v3432_v25 = vmul.f32 %v6424_v8, %v3423_v49  ;;  %v4150_v49 = vld [vmem:[%s6696_s2 + $0x80] sm:$0xff] }
0x15a7   :  { %v3330_v39 = vmul.f32 %v3318_v26, %v4667_v22  ;;  %v3375_v27 = vsub.f32 1.5, %v3374_v23 }
0x15a8   :  { %v6453_v41 = vadd.f32 %v6430_v33, %v3432_v25 }
0x15a9   :  { %v4524_v0 = vpop.eup %4523  ;;  %v3338_v54 = vadd.f32 1e-12, %v3330_v39  ;;  %v3376_v43 = vmul.f32 %v4522_v34, %v3375_v27  ;;  %v4153_v39 = vld [vmem:[%s6696_s2 + $0x98] sm:$0xff] }
0x15aa   :  { %v3382_v4 = vmul.f32 %v4524_v0, %v3337_v61  ;;  %vm3388_vm2 = vweird.f32 %v4524_v0  ;;  %3636 = vmatpush.bf16.msrb.mxu0 %v4153_v39 }
0x15ab   :  { %4525 = vrsqrt.f32 %v3338_v54  ;;  %v3380_v1 = vsel %vm3379_vm15, %v4522_v34, %v3376_v43  ;;  %vm3389_vm11 = vmor %vm3387_vm3, %vm3388_vm2  ;;  %vm3397_vm4 = vweird.f32 %v3338_v54 }
0x15ac   :  { %v3383_v18 = vmul.f32 %v4524_v0, %v3382_v4  ;;  %v3424_v7 = vmul.f32 %v3380_v1, %v6384_v37 }
0x15ae   :  { %v3384_v11 = vmul.f32 0.5, %v3383_v18  ;;  %v3433_v38 = vmul.f32 %v6424_v8, %v3424_v7 }
0x15b0   :  { %v3385_v55 = vsub.f32 1.5, %v3384_v11  ;;  %v6456_v2 = vadd.f32 %v6430_v33, %v3433_v38 }
0x15b1   :  { %v4526_v42 = vpop.eup %4525 }
0x15b2   :  { %v3386_v3 = vmul.f32 %v4524_v0, %v3385_v55  ;;  %v3392_v9 = vmul.f32 %v4526_v42, %v3338_v54  ;;  %v3448_v28 = vpack.c.bf16 %v6456_v2, %v6453_v41  ;;  %vm3398_vm14 = vweird.f32 %v4526_v42 }
0x15b3   :  { %vm3399_vm5 = vmor %vm3397_vm4, %vm3398_vm14 }
0x15b4   :  { %v3393_v37 = vmul.f32 %v4526_v42, %v3392_v9  ;;  %4104 = vmatmul.msk.bf16.gmra.mxu3 %vm78_vm0, %v3448_v28  ;;  %v3390_v44 = vsel %vm3389_vm11, %v4524_v0, %v3386_v3 }
0x15b5   :  { %v3425_v46 = vmul.f32 %v3390_v44, %v6390_v10  ;;  %v3321_v10 = vpop.xlane.xlu0 %3320 }
0x15b6   :  { %v3394_v47 = vmul.f32 0.5, %v3393_v37  ;;  %v3331_v52 = vmul.f32 %v3321_v10, %v4667_v22 }
0x15b7   :  { %v3434_v59 = vmul.f32 %v6424_v8, %v3425_v46 }
0x15b8   :  { %v3395_v14 = vsub.f32 1.5, %v3394_v47  ;;  %v3339_v13 = vadd.f32 1e-12, %v3331_v52 }
0x15b9   :  { %v6466_v5 = vadd.f32 %v6430_v33, %v3434_v59 }
0x15ba   :  { %v3396_v6 = vmul.f32 %v4526_v42, %v3395_v14  ;;  %4527 = vrsqrt.f32 %v3339_v13  ;;  %vm3407_vm7 = vweird.f32 %v3339_v13 }
0x15bc   :  { %v3400_v63 = vsel %vm3399_vm5, %v4526_v42, %v3396_v6 }
0x15bd   :  { %v3426_v53 = vmul.f32 %v3400_v63, %v6396_v60 }
0x15bf   :  { %v3435_v35 = vmul.f32 %v6424_v8, %v3426_v53 }
0x15c0   :  { %v4528_v60 = vpop.eup %4527 }
0x15c1   :  { %v6469_v15 = vadd.f32 %v6430_v33, %v3435_v35  ;;  %v3402_v16 = vmul.f32 %v4528_v60, %v3339_v13  ;;  %vm3408_vm6 = vweird.f32 %v4528_v60 }
0x15c2   :  { %vm3409_vm8 = vmor %vm3407_vm7, %vm3408_vm6 }
0x15c3   :  { %v3449_v32 = vpack.c.bf16 %v6469_v15, %v6466_v5  ;;  %v3403_v45 = vmul.f32 %v4528_v60, %v3402_v16 }
0x15c5   :  { %4105 = vmatmul.msk.bf16.gmra.mxu3 %vm78_vm0, %v3449_v32  ;;  %v3404_v21 = vmul.f32 0.5, %v3403_v45 }
0x15c7   :  { %v3405_v31 = vsub.f32 1.5, %v3404_v21 }
0x15c9   :  { %v3406_v36 = vmul.f32 %v4528_v60, %v3405_v31 }
0x15cb   :  { %v3410_v30 = vsel %vm3409_vm8, %v4528_v60, %v3406_v36 }
0x15cc   :  { %v3427_v57 = vmul.f32 %v3410_v30, %v6402_v29 }
0x15ce   :  { %v3436_v23 = vmul.f32 %v6424_v8, %v3427_v57 }
0x15d0   :  { %v6484_v27 = vadd.f32 %v6430_v33, %v3436_v23 }
0x15db   :  { %v3324_v40 = vpop.xlane.xlu2 %3323 }
0x15dc   :  { %v3332_v17 = vmul.f32 %v3324_v40, %v4667_v22 }
0x15de   :  { %v3340_v50 = vadd.f32 1e-12, %v3332_v17 }
0x15e0   :  { %4529 = vrsqrt.f32 %v3340_v50  ;;  %vm3417_vm10 = vweird.f32 %v3340_v50 }
0x15e6   :  { %v4530_v62 = vpop.eup %4529 }
0x15e7   :  { %v3412_v12 = vmul.f32 %v4530_v62, %v3340_v50  ;;  %vm3418_vm9 = vweird.f32 %v4530_v62 }
0x15e8   :  { %vm3419_vm12 = vmor %vm3417_vm10, %vm3418_vm9 }
0x15e9   :  { %v3413_v56 = vmul.f32 %v4530_v62, %v3412_v12 }
0x15eb   :  { %v3414_v34 = vmul.f32 0.5, %v3413_v56 }
0x15ed   :  { %v3415_v61 = vsub.f32 1.5, %v3414_v34 }
0x15ef   :  { %v3416_v24 = vmul.f32 %v4530_v62, %v3415_v61 }
0x15f1   :  { %v3420_v58 = vsel %vm3419_vm12, %v4530_v62, %v3416_v24 }
0x15f2   :  { %v3428_v48 = vmul.f32 %v3420_v58, %v6416_v20  ;;  %v4152_v20 = vld [vmem:[%s6696_s2 + $0x90] sm:$0xff] }
0x15f3   :  { %3637 = vmatpush.bf16.msrb.mxu0 %v4152_v20 }
0x15f4   :  { %v3437_v26 = vmul.f32 %v6424_v8, %v3428_v48  ;;  %v4151_v8 = vld [vmem:[%s6696_s2 + $0x88] sm:$0xff] }
0x15f6   :  { %v6487_v0 = vadd.f32 %v6430_v33, %v3437_v26  ;;  %v6501_v33 = vld [vmem:[%s6697_s3 + $0xe] ss:$0 sm:$0xff] }
0x15f7   :  { %3638 = vmatpush.bf16.msrb.mxu0 %v4151_v8 }
0x15f8   :  { %v3450_v29 = vpack.c.bf16 %v6487_v0, %v6484_v27 }
0x15fa   :  { %4106 = vmatmul.msk.bf16.gmra.mxu3 %vm78_vm0, %v3450_v29 }
0x15fb   :  { %3639 = vmatpush.bf16.msrb.mxu0 %v4150_v49 }
0x1602   :  { %v3490_v54 = vpop.f32.mrf.mxu3 }
0x1603   :  { %v3491_v43 = vadd.f32 %v6501_v33, %v3490_v54 }
0x1605   :  { %v3518_v4 = vmul.f32 0.044715, %v3491_v43  ;;  %v3510_v14 = vmul.f32 0.5, %v3491_v43 }
0x1607   :  { %v3526_v1 = vmul.f32 %v3518_v4, %v3491_v43 }
0x1609   :  { %v3534_v18 = vmul.f32 %v3526_v1, %v3491_v43 }
0x160a   :  { %v3492_v7 = vpop.f32.mrf.mxu3 }
0x160b   :  { %v3542_v25 = vadd.f32 %v3534_v18, %v3491_v43  ;;  %v3493_v11 = vadd.f32 %v6501_v33, %v3492_v7 }
0x160d   :  { %v3519_v38 = vmul.f32 0.044715, %v3493_v11  ;;  %v3550_v55 = vmul.f32 0.7978846, %v3542_v25  ;;  %v3511_v46 = vmul.f32 0.5, %v3493_v11 }
0x160f   :  { %v3527_v42 = vmul.f32 %v3519_v38, %v3493_v11  ;;  %4531 = vtanh.f32 %v3550_v55 }
0x1611   :  { %v3535_v3 = vmul.f32 %v3527_v42, %v3493_v11 }
0x1613   :  { %v3543_v9 = vadd.f32 %v3535_v3, %v3493_v11 }
0x1615   :  { %v3551_v28 = vmul.f32 0.7978846, %v3543_v9  ;;  %v4532_v37 = vpop.eup %4531 }
0x1616   :  { %v3566_v44 = vadd.f32 1.0, %v4532_v37 }
0x1617   :  { %4533 = vtanh.f32 %v3551_v28 }
0x1618   :  { %v3574_v63 = vmul.f32 %v3566_v44, %v3510_v14 }
0x161d   :  { %v4534_v47 = vpop.eup %4533 }
0x161e   :  { %v3567_v6 = vadd.f32 1.0, %v4534_v47 }
0x1620   :  { %v3575_v53 = vmul.f32 %v3567_v6, %v3511_v46 }
0x1622   :  { %v3582_v59 = vpack.c.bf16 %v3575_v53, %v3574_v63 }
0x1624   :  { %4123 = vmatmul.msk.bf16.vlgmr.msrb.gmra.mxu0 %vm438_vm1, %v3582_v59 }
0x1637   :  { %v3495_v35 = vpop.f32.mrf.mxu3 }
0x1638   :  { %v3496_v32 = vadd.f32 %v6501_v33, %v3495_v35 }
0x163a   :  { %v3520_v10 = vmul.f32 0.044715, %v3496_v32  ;;  %v3512_v39 = vmul.f32 0.5, %v3496_v32 }
0x163c   :  { %v3528_v52 = vmul.f32 %v3520_v10, %v3496_v32 }
0x163e   :  { %v3536_v13 = vmul.f32 %v3528_v52, %v3496_v32 }
0x163f   :  { %v3497_v60 = vpop.f32.mrf.mxu3 }
0x1640   :  { %v3544_v16 = vadd.f32 %v3536_v13, %v3496_v32  ;;  %v3498_v45 = vadd.f32 %v6501_v33, %v3497_v60 }
0x1642   :  { %v3521_v40 = vmul.f32 0.044715, %v3498_v45  ;;  %v3552_v17 = vmul.f32 0.7978846, %v3544_v16  ;;  %v3513_v29 = vmul.f32 0.5, %v3498_v45 }
0x1644   :  { %v3529_v50 = vmul.f32 %v3521_v40, %v3498_v45  ;;  %4535 = vtanh.f32 %v3552_v17 }
0x1646   :  { %v3537_v21 = vmul.f32 %v3529_v50, %v3498_v45 }
0x1648   :  { %v3500_v31 = vpop.f32.mrf.mxu3  ;;  %v3545_v62 = vadd.f32 %v3537_v21, %v3498_v45 }
0x1649   :  { %v3501_v36 = vadd.f32 %v6501_v33, %v3500_v31 }
0x164a   :  { %v3553_v12 = vmul.f32 0.7978846, %v3545_v62  ;;  %v4536_v34 = vpop.eup %4535 }
0x164b   :  { %v3522_v56 = vmul.f32 0.044715, %v3501_v36  ;;  %v3568_v48 = vadd.f32 1.0, %v4536_v34  ;;  %v3514_v55 = vmul.f32 0.5, %v3501_v36  ;;  %v4189_v34 = vld [vmem:[%s6697_s3 + $0xf] ss:$0 sm:$0xff] }
0x164c   :  { %4537 = vtanh.f32 %v3553_v12 }
0x164d   :  { %v3530_v30 = vmul.f32 %v3522_v56, %v3501_v36  ;;  %v3576_v54 = vmul.f32 %v3568_v48, %v3512_v39 }
0x164f   :  { %v3538_v61 = vmul.f32 %v3530_v30, %v3501_v36 }
0x1650   :  { %v3502_v57 = vpop.f32.mrf.mxu3 }
0x1651   :  { %v3546_v24 = vadd.f32 %v3538_v61, %v3501_v36  ;;  %v3503_v58 = vadd.f32 %v6501_v33, %v3502_v57 }
0x1652   :  { %v4538_v23 = vpop.eup %4537 }
0x1653   :  { %v3523_v26 = vmul.f32 0.044715, %v3503_v58  ;;  %v3569_v20 = vadd.f32 1.0, %v4538_v23  ;;  %v3554_v8 = vmul.f32 0.7978846, %v3546_v24  ;;  %v3515_v42 = vmul.f32 0.5, %v3503_v58 }
0x1655   :  { %v3531_v49 = vmul.f32 %v3523_v26, %v3503_v58  ;;  %v3577_v43 = vmul.f32 %v3569_v20, %v3513_v29  ;;  %4539 = vtanh.f32 %v3554_v8 }
0x1657   :  { %v3539_v4 = vmul.f32 %v3531_v49, %v3503_v58  ;;  %v3583_v1 = vpack.c.bf16 %v3577_v43, %v3576_v54 }
0x1659   :  { %v3547_v18 = vadd.f32 %v3539_v4, %v3503_v58  ;;  %4124 = vmatmul.msk.bf16.gmra.mxu0 %vm438_vm1, %v3583_v1 }
0x165b   :  { %v3555_v7 = vmul.f32 0.7978846, %v3547_v18  ;;  %v4540_v25 = vpop.eup %4539 }
0x165c   :  { %v3570_v11 = vadd.f32 1.0, %v4540_v25 }
0x165d   :  { %4541 = vtanh.f32 %v3555_v7 }
0x165e   :  { %v3578_v9 = vmul.f32 %v3570_v11, %v3514_v55 }
0x1663   :  { %v4542_v38 = vpop.eup %4541 }
0x1664   :  { %v3571_v3 = vadd.f32 1.0, %v4542_v38 }
0x1666   :  { %v3579_v28 = vmul.f32 %v3571_v3, %v3515_v42 }
0x1668   :  { %v3584_v37 = vpack.c.bf16 %v3579_v28, %v3578_v9 }
0x166a   :  { %4125 = vmatmul.msk.bf16.gmra.mxu0 %vm438_vm1, %v3584_v37 }
0x167d   :  { %v3505_v44 = vpop.f32.mrf.mxu3 }
0x167e   :  { %v3506_v47 = vadd.f32 %v6501_v33, %v3505_v44 }
0x1680   :  { %v3524_v14 = vmul.f32 0.044715, %v3506_v47  ;;  %v3516_v17 = vmul.f32 0.5, %v3506_v47 }
0x1682   :  { %v3532_v46 = vmul.f32 %v3524_v14, %v3506_v47 }
0x1684   :  { %v3540_v6 = vmul.f32 %v3532_v46, %v3506_v47 }
0x1685   :  { %v3507_v63 = vpop.f32.mrf.mxu3 }
0x1686   :  { %v3548_v53 = vadd.f32 %v3540_v6, %v3506_v47  ;;  %v3508_v59 = vadd.f32 %v6501_v33, %v3507_v63 }
0x1688   :  { %v3525_v35 = vmul.f32 0.044715, %v3508_v59  ;;  %v3556_v32 = vmul.f32 0.7978846, %v3548_v53  ;;  %v3517_v50 = vmul.f32 0.5, %v3508_v59 }
0x168a   :  { %v3533_v10 = vmul.f32 %v3525_v35, %v3508_v59  ;;  %4543 = vtanh.f32 %v3556_v32 }
0x168c   :  { %v3541_v52 = vmul.f32 %v3533_v10, %v3508_v59 }
0x168e   :  { %v3549_v13 = vadd.f32 %v3541_v52, %v3508_v59 }
0x1690   :  { %v3557_v60 = vmul.f32 0.7978846, %v3549_v13  ;;  %v4544_v16 = vpop.eup %4543 }
0x1691   :  { %v3572_v45 = vadd.f32 1.0, %v4544_v16 }
0x1692   :  { %4545 = vtanh.f32 %v3557_v60 }
0x1693   :  { %v3580_v31 = vmul.f32 %v3572_v45, %v3516_v17 }
0x1698   :  { %v4546_v40 = vpop.eup %4545 }
0x1699   :  { %v3573_v21 = vadd.f32 1.0, %v4546_v40 }
0x169b   :  { %v3581_v62 = vmul.f32 %v3573_v21, %v3517_v50 }
0x169d   :  { %v3585_v36 = vpack.c.bf16 %v3581_v62, %v3580_v31 }
0x169f   :  { %4126 = vmatmul.msk.bf16.gmra.mxu0 %vm438_vm1, %v3585_v36 }
0x16a1   :  { %v3641_v33 = vpop.f32.mrf.mxu0 }
0x16a2   :  { %v3642_v18 = vadd.f32 %v4189_v34, %v3641_v33 }
0x16a9   :  { %v3643_v12 = vpop.f32.mrf.mxu0 }
0x16aa   :  { %v3644_v38 = vadd.f32 %v4189_v34, %v3643_v12 }
0x16d6   :  { %v3646_v56 = vpop.f32.mrf.mxu0 }
0x16de   :  { %v3648_v30 = vpop.f32.mrf.mxu0 }
0x16df   :  { %v3649_v58 = vadd.f32 %v4189_v34, %v3648_v30 }
0x16e1   :  { %v3664_v23 = vadd.f32 %v3649_v58, %v6456_v2  ;;  %v3647_v2 = vadd.f32 %v4189_v34, %v3646_v56 }
0x16e3   :  { %v3680_v26 = vsel %vm78_vm0, %v3664_v23, 0.0  ;;  %v3663_v11 = vadd.f32 %v3647_v2, %v6453_v41 }
0x16e5   :  { %v3677_v55 = vsel %vm78_vm0, %v3663_v11, 0.0 }
0x16e7   :  { %v3651_v61 = vpop.f32.mrf.mxu0 }
0x16e8   :  { %v3652_v57 = vadd.f32 %v4189_v34, %v3651_v61 }
0x16ea   :  { %v3665_v24 = vadd.f32 %v3652_v57, %v6466_v5 }
0x16ec   :  { %v3683_v48 = vsel %vm78_vm0, %v3665_v24, 0.0 }
0x16ed   :  { %3684 = vadd.xlane.f32.xlu2 %v3683_v48 }
0x16ef   :  { %v3653_v39 = vpop.f32.mrf.mxu0 }
0x16f0   :  { %v3654_v49 = vadd.f32 %v4189_v34, %v3653_v39 }
0x16f2   :  { %v3666_v5 = vadd.f32 %v3654_v49, %v6469_v15 }
0x16f4   :  { %v3686_v25 = vsel %vm78_vm0, %v3666_v5, 0.0 }
0x16f5   :  { %3681 = vadd.xlane.f32.xlu2 %v3680_v26 }
0x171c   :  { %v3656_v29 = vpop.f32.mrf.mxu0 }
0x171d   :  { %v3657_v20 = vadd.f32 %v4189_v34, %v3656_v29 }
0x171f   :  { %v3667_v8 = vadd.f32 %v3657_v20, %v6484_v27  ;;  %v3661_v27 = vadd.f32 %v3642_v18, %v6436_v19 }
0x1721   :  { %v3689_v54 = vsel %vm78_vm0, %v3667_v8, 0.0  ;;  %v3671_v15 = vsel %vm78_vm0, %v3661_v27, 0.0 }
0x1722   :  { %3690 = vadd.xlane.f32.xlu1 %v3689_v54 }
0x1724   :  { %v3658_v43 = vpop.f32.mrf.mxu0 }
0x1725   :  { %v3659_v4 = vadd.f32 %v4189_v34, %v3658_v43 }
0x1727   :  { %v3668_v1 = vadd.f32 %v3659_v4, %v6487_v0  ;;  %v3662_v0 = vadd.f32 %v3644_v38, %v6439_v51 }
0x1729   :  { %v3692_v7 = vsel %vm78_vm0, %v3668_v1, 0.0  ;;  %v3674_v42 = vsel %vm78_vm0, %v3662_v0, 0.0 }
0x172a   :  { %3693 = vadd.xlane.f32.xlu0 %v3692_v7  ;;  %3687 = vadd.xlane.f32.xlu1 %v3686_v25 }
0x1732   :  { %3678 = vadd.xlane.f32.xlu0 %v3677_v55  ;;  %3672 = vadd.xlane.f32.xlu1 %v3671_v15 }
0x173a   :  { %3675 = vadd.xlane.f32.xlu0 %v3674_v42 }
0x1760   :  { %v3685_v3 = vpop.xlane.xlu2 %3684 }
0x1761   :  { %v3699_v9 = vmul.f32 %v3685_v3, %v4667_v22 }
0x1763   :  { %v6538_v28 = vsub.f32 %v3665_v24, %v3699_v9 }
0x1765   :  { %v3715_v19 = vmul.f32 %v6538_v28, %v6538_v28 }
0x1767   :  { %v3731_v41 = vsel %vm78_vm0, %v3715_v19, 0.0 }
0x1768   :  { %3732 = vadd.xlane.f32.xlu0 %v3731_v41  ;;  %v3682_v37 = vpop.xlane.xlu2 %3681 }
0x1769   :  { %v3698_v44 = vmul.f32 %v3682_v37, %v4667_v22 }
0x176b   :  { %v6544_v47 = vsub.f32 %v3664_v23, %v3698_v44 }
0x176d   :  { %v3714_v51 = vmul.f32 %v6544_v47, %v6544_v47 }
0x176f   :  { %v3728_v14 = vsel %vm78_vm0, %v3714_v51, 0.0 }
0x1770   :  { %3729 = vadd.xlane.f32.xlu0 %v3728_v14 }
0x1795   :  { %v3691_v46 = vpop.xlane.xlu1 %3690 }
0x1796   :  { %v3701_v6 = vmul.f32 %v3691_v46, %v4667_v22 }
0x1798   :  { %v6550_v63 = vsub.f32 %v3667_v8, %v3701_v6 }
0x179a   :  { %v3717_v53 = vmul.f32 %v6550_v63, %v6550_v63 }
0x179c   :  { %v3737_v59 = vsel %vm78_vm0, %v3717_v53, 0.0 }
0x179d   :  { %v3694_v35 = vpop.xlane.xlu0 %3693  ;;  %v3688_v32 = vpop.xlane.xlu1 %3687  ;;  %3738 = vadd.xlane.f32.xlu2 %v3737_v59 }
0x179e   :  { %v3702_v10 = vmul.f32 %v3694_v35, %v4667_v22  ;;  %v3700_v52 = vmul.f32 %v3688_v32, %v4667_v22 }
0x17a0   :  { %v6557_v13 = vsub.f32 %v3668_v1, %v3702_v10  ;;  %v6559_v60 = vsub.f32 %v3666_v5, %v3700_v52 }
0x17a2   :  { %v3718_v16 = vmul.f32 %v6557_v13, %v6557_v13  ;;  %v3716_v45 = vmul.f32 %v6559_v60, %v6559_v60 }
0x17a4   :  { %v3740_v40 = vsel %vm78_vm0, %v3718_v16, 0.0  ;;  %v3734_v17 = vsel %vm78_vm0, %v3716_v45, 0.0 }
0x17a5   :  { %v3679_v50 = vpop.xlane.xlu0 %3678  ;;  %3741 = vadd.xlane.f32.xlu1 %v3740_v40  ;;  %v3673_v21 = vpop.xlane.xlu1 %3672  ;;  %3735 = vadd.xlane.f32.xlu2 %v3734_v17 }
0x17a6   :  { %v3697_v31 = vmul.f32 %v3679_v50, %v4667_v22  ;;  %v3695_v62 = vmul.f32 %v3673_v21, %v4667_v22 }
0x17a8   :  { %v6569_v36 = vsub.f32 %v3663_v11, %v3697_v31  ;;  %v6571_v33 = vsub.f32 %v3661_v27, %v3695_v62 }
0x17aa   :  { %v3713_v12 = vmul.f32 %v6569_v36, %v6569_v36  ;;  %v3711_v56 = vmul.f32 %v6571_v33, %v6571_v33 }
0x17ac   :  { %v3725_v30 = vsel %vm78_vm0, %v3713_v12, 0.0  ;;  %v3719_v34 = vsel %vm78_vm0, %v3711_v56, 0.0 }
0x17ad   :  { %v3676_v61 = vpop.xlane.xlu0 %3675  ;;  %3726 = vadd.xlane.f32.xlu1 %v3725_v30  ;;  %3720 = vadd.xlane.f32.xlu2 %v3719_v34 }
0x17ae   :  { %v3696_v57 = vmul.f32 %v3676_v61, %v4667_v22 }
0x17b0   :  { %v6580_v24 = vsub.f32 %v3662_v0, %v3696_v57 }
0x17b2   :  { %v3712_v58 = vmul.f32 %v6580_v24, %v6580_v24 }
0x17b4   :  { %v3722_v48 = vsel %vm78_vm0, %v3712_v58, 0.0  ;;  %v4155_v58 = vld [vmem:[%s6696_s2 + $0xa8] sm:$0xff] }
0x17b5   :  { %3723 = vadd.xlane.f32.xlu1 %v3722_v48  ;;  %3918 = vmatpush.bf16.msrb.mxu1 %v4155_v58 }
0x17db   :  { %v3733_v23 = vpop.xlane.xlu0 %3732 }
0x17dc   :  { %v3747_v26 = vmul.f32 %v3733_v23, %v4667_v22 }
0x17de   :  { %v3755_v29 = vadd.f32 1e-12, %v3747_v26 }
0x17e0   :  { %4547 = vrsqrt.f32 %v3755_v29  ;;  %vm3805_vm11 = vweird.f32 %v3755_v29 }
0x17e3   :  { %v3730_v39 = vpop.xlane.xlu0 %3729 }
0x17e4   :  { %v3746_v20 = vmul.f32 %v3730_v39, %v4667_v22 }
0x17e6   :  { %v6587_v8 = vadd.f32 1e-12, %v3746_v20  ;;  %v6590_v43 = vpop.eup %4547 }
0x17e7   :  { %v3800_v4 = vmul.f32 %v6590_v43, %v3755_v29  ;;  %vm3806_vm15 = vweird.f32 %v6590_v43 }
0x17e8   :  { %4549 = vrsqrt.f32 %v6587_v8  ;;  %vm6622_vm14 = vmor %vm3805_vm11, %vm3806_vm15  ;;  %vm3795_vm10 = vweird.f32 %v6587_v8 }
0x17e9   :  { %v3801_v27 = vmul.f32 %v6590_v43, %v3800_v4 }
0x17eb   :  { %v3802_v42 = vmul.f32 0.5, %v3801_v27 }
0x17ed   :  { %v3803_v14 = vsub.f32 1.5, %v3802_v42  ;;  %v4191_v42 = vld [vmem:[%s6697_s3 + $0x11] ss:$0 sm:$0xff] }
0x17ee   :  { %v6594_v2 = vpop.eup %4549 }
0x17ef   :  { %v3790_v15 = vmul.f32 %v6594_v2, %v6587_v8  ;;  %v3804_v45 = vmul.f32 %v6590_v43, %v3803_v14  ;;  %vm3796_vm4 = vweird.f32 %v6594_v2 }
0x17f1   :  { %v3791_v9 = vmul.f32 %v6594_v2, %v3790_v15  ;;  %v3808_v61 = vsel %vm6622_vm14, %v6590_v43, %v3804_v45 }
0x17f2   :  { %v3843_v4 = vmul.f32 %v3808_v61, %v6538_v28  ;;  %v6728_v61 = vld [vmem:[#allocation6_spill] sm:$0xff] }
0x17f3   :  { %v3792_v32 = vmul.f32 0.5, %v3791_v9 }
0x17f5   :  { %v3793_v21 = vsub.f32 1.5, %v3792_v32 }
0x17f7   :  { %v3794_v29 = vmul.f32 %v6594_v2, %v3793_v21 }
0x1810   :  { %v3739_v49 = vpop.xlane.xlu2 %3738 }
0x1811   :  { %v3749_v54 = vmul.f32 %v3739_v49, %v4667_v22 }
0x1813   :  { %v3757_v5 = vadd.f32 1e-12, %v3749_v54  ;;  %v4154_v54 = vld [vmem:[%s6696_s2 + $0xa0] sm:$0xff] }
0x1814   :  { %3919 = vmatpush.bf16.msrb.mxu1 %v4154_v54 }
0x1815   :  { %4551 = vrsqrt.f32 %v3757_v5  ;;  %vm3825_vm2 = vweird.f32 %v3757_v5 }
0x1818   :  { %v3742_v1 = vpop.xlane.xlu1 %3741  ;;  %v3736_v18 = vpop.xlane.xlu2 %3735 }
0x1819   :  { %v3750_v7 = vmul.f32 %v3742_v1, %v4667_v22  ;;  %v3748_v25 = vmul.f32 %v3736_v18, %v4667_v22 }
0x181b   :  { %v4552_v11 = vpop.eup %4551  ;;  %v3758_v38 = vadd.f32 1e-12, %v3750_v7  ;;  %v6599_v55 = vadd.f32 1e-12, %v3748_v25 }
0x181c   :  { %v3820_v0 = vmul.f32 %v4552_v11, %v3757_v5  ;;  %vm3826_vm13 = vweird.f32 %v4552_v11  ;;  %v6648_v5 = vld [vmem:[%s6697_s3 + $0x10] ss:$0 sm:$0xff] }
0x181d   :  { %4553 = vrsqrt.f32 %v3758_v38  ;;  %vm6616_vm3 = vmor %vm3825_vm2, %vm3826_vm13  ;;  %vm3835_vm7 = vweird.f32 %v3758_v38  ;;  %vm3815_vm9 = vweird.f32 %v6599_v55 }
0x181e   :  { %v3821_v3 = vmul.f32 %v4552_v11, %v3820_v0  ;;  %4555 = vrsqrt.f32 %v6599_v55  ;;  %vm6655_vm13 = vmor %vm3795_vm10, %vm3796_vm4 }
0x181f   :  { %v3798_v28 = vsel %vm6655_vm13, %v6594_v2, %v3794_v29 }
0x1820   :  { %v3822_v19 = vmul.f32 0.5, %v3821_v3  ;;  %v3727_v41 = vpop.xlane.xlu1 %3726  ;;  %v3721_v37 = vpop.xlane.xlu2 %3720  ;;  %v3852_v3 = vmul.f32 %v6648_v5, %v3843_v4  ;;  %v3842_v2 = vmul.f32 %v3798_v28, %v6544_v47 }
0x1821   :  { %v3745_v44 = vmul.f32 %v3727_v41, %v4667_v22  ;;  %v3743_v51 = vmul.f32 %v3721_v37, %v4667_v22 }
0x1822   :  { %v3823_v46 = vsub.f32 1.5, %v3822_v19  ;;  %v3861_v47 = vadd.f32 %v4191_v42, %v3852_v3 }
0x1823   :  { %v4554_v6 = vpop.eup %4553  ;;  %v6607_v53 = vadd.f32 1e-12, %v3745_v44  ;;  %v6609_v59 = vadd.f32 1e-12, %v3743_v51 }
0x1824   :  { %v4556_v35 = vpop.eup %4555  ;;  %v3824_v10 = vmul.f32 %v4552_v11, %v3823_v46  ;;  %v3830_v52 = vmul.f32 %v4554_v6, %v3758_v38  ;;  %vm3836_vm5 = vweird.f32 %v4554_v6 }
0x1825   :  { %v3810_v16 = vmul.f32 %v4556_v35, %v6599_v55  ;;  %4557 = vrsqrt.f32 %v6607_v53  ;;  %vm3816_vm6 = vweird.f32 %v4556_v35  ;;  %vm3837_vm8 = vmor %vm3835_vm7, %vm3836_vm5  ;;  %vm3785_vm2 = vweird.f32 %v6607_v53 }
0x1826   :  { %v3831_v40 = vmul.f32 %v4554_v6, %v3830_v52  ;;  %4559 = vrsqrt.f32 %v6609_v59  ;;  %v3828_v31 = vsel %vm6616_vm3, %v4552_v11, %v3824_v10  ;;  %vm3817_vm12 = vmor %vm3815_vm9, %vm3816_vm6  ;;  %vm3765_vm14 = vweird.f32 %v6609_v59 }
0x1827   :  { %v3811_v50 = vmul.f32 %v4556_v35, %v3810_v16  ;;  %v3845_v23 = vmul.f32 %v3828_v31, %v6550_v63  ;;  %v3851_v52 = vmul.f32 %v6648_v5, %v3842_v2 }
0x1828   :  { %v3832_v62 = vmul.f32 0.5, %v3831_v40  ;;  %v3724_v12 = vpop.xlane.xlu1 %3723 }
0x1829   :  { %v3812_v30 = vmul.f32 0.5, %v3811_v50  ;;  %v3744_v34 = vmul.f32 %v3724_v12, %v4667_v22  ;;  %v3854_v38 = vmul.f32 %v6648_v5, %v3845_v23 }
0x182a   :  { %v3833_v57 = vsub.f32 1.5, %v3832_v62 }
0x182b   :  { %v4558_v48 = vpop.eup %4557  ;;  %v3813_v26 = vsub.f32 1.5, %v3812_v30  ;;  %v6635_v39 = vadd.f32 1e-12, %v3744_v34 }
0x182c   :  { %v4560_v22 = vpop.eup %4559  ;;  %v3834_v20 = vmul.f32 %v4554_v6, %v3833_v57  ;;  %v3780_v49 = vmul.f32 %v4558_v48, %v6607_v53  ;;  %vm3786_vm15 = vweird.f32 %v4558_v48 }
0x182d   :  { %v3814_v43 = vmul.f32 %v4556_v35, %v3813_v26  ;;  %v3760_v63 = vmul.f32 %v4560_v22, %v6609_v59  ;;  %4561 = vrsqrt.f32 %v6635_v39  ;;  %vm3766_vm3 = vweird.f32 %v4560_v22  ;;  %vm3787_vm11 = vmor %vm3785_vm2, %vm3786_vm15 }
0x182e   :  { %v3838_v1 = vsel %vm3837_vm8, %v4554_v6, %v3834_v20  ;;  %v3781_v18 = vmul.f32 %v4558_v48, %v3780_v49  ;;  %vm3767_vm4 = vmor %vm3765_vm14, %vm3766_vm3  ;;  %v3860_v59 = vadd.f32 %v4191_v42, %v3851_v52  ;;  %vm3775_vm6 = vweird.f32 %v6635_v39  ;;  %v4192_v20 = vld [vmem:[%s6697_s3 + $0x12] ss:$0 sm:$0xff] }
0x182f   :  { %v3846_v25 = vmul.f32 %v3838_v1, %v6557_v13  ;;  %v3818_v27 = vsel %vm3817_vm12, %v4556_v35, %v3814_v43  ;;  %v3761_v11 = vmul.f32 %v4560_v22, %v3760_v63 }
0x1830   :  { %v3844_v8 = vmul.f32 %v3818_v27, %v6559_v60  ;;  %v3782_v55 = vmul.f32 0.5, %v3781_v18  ;;  %v3863_v60 = vadd.f32 %v4191_v42, %v3854_v38 }
0x1831   :  { %v3762_v15 = vmul.f32 0.5, %v3761_v11  ;;  %v3855_v0 = vmul.f32 %v6648_v5, %v3846_v25 }
0x1832   :  { %v3783_v13 = vsub.f32 1.5, %v3782_v55  ;;  %v3853_v9 = vmul.f32 %v6648_v5, %v3844_v8 }
0x1833   :  { %v4562_v19 = vpop.eup %4561  ;;  %v3763_v41 = vsub.f32 1.5, %v3762_v15  ;;  %v3864_v37 = vadd.f32 %v4191_v42, %v3855_v0 }
0x1834   :  { %v3784_v44 = vmul.f32 %v4558_v48, %v3783_v13  ;;  %v3770_v51 = vmul.f32 %v4562_v19, %v6635_v39  ;;  %v3862_v6 = vadd.f32 %v4191_v42, %v3853_v9  ;;  %vm3776_vm5 = vweird.f32 %v4562_v19 }
0x1835   :  { %v3764_v14 = vmul.f32 %v4560_v22, %v3763_v41  ;;  %v3873_v46 = vpack.c.bf16 %v3864_v37, %v3863_v60  ;;  %vm3777_vm7 = vmor %vm3775_vm6, %vm3776_vm5 }
0x1836   :  { %v3788_v35 = vsel %vm3787_vm11, %v4558_v48, %v3784_v44  ;;  %v3771_v32 = vmul.f32 %v4562_v19, %v3770_v51  ;;  %v3872_v45 = vpack.c.bf16 %v3862_v6, %v3861_v47  ;;  %v4605_v48 = vmov 0.0  }
0x1837   :  { %v3841_v10 = vmul.f32 %v3788_v35, %v6569_v36  ;;  %3881 = vmatpush.bf16.msra.mxu2 %v3873_v46  ;;  %v3768_v16 = vsel %vm3767_vm4, %v4560_v22, %v3764_v14  ;;  %v6727_v36 = vld [vmem:[#allocation5_spill] sm:$0xff] }
0x1838   :  { %v3772_v53 = vmul.f32 0.5, %v3771_v32  ;;  %v3839_v50 = vmul.f32 %v3768_v16, %v6571_v33  ;;  %v3865_v62 = vmul.u32 8, %v6727_v36 }
0x1839   :  { %v3850_v40 = vmul.f32 %v6648_v5, %v3841_v10 }
0x183a   :  { %v3773_v17 = vsub.f32 1.5, %v3772_v53  ;;  %v3848_v34 = vmul.f32 %v6648_v5, %v3839_v50  ;;  %vm3866_vm8 = vcmp.eq.s32.totalorder %v6728_v61, %v3865_v62 }
0x183b   :  { %3882 = vmatpush.bf16.msra.mxu2 %v3872_v45  ;;  %v3859_v21 = vadd.f32 %v4191_v42, %v3850_v40  ;;  %v4127_v23 = vsel %vm3866_vm8, 1.0, %v4605_v48 }
0x183c   :  { %v3774_v31 = vmul.f32 %v4562_v19, %v3773_v17  ;;  %v3857_v57 = vadd.f32 %v4191_v42, %v3848_v34  ;;  %v3869_v39 = vpack.c.bf16 %v4127_v23, %v4127_v23 }
0x183d   :  { %v3871_v12 = vpack.c.bf16 %v3860_v59, %v3859_v21 }
0x183e   :  { %v3778_v56 = vsel %vm3777_vm7, %v4562_v19, %v3774_v31 }
0x183f   :  { %v3840_v30 = vmul.f32 %v3778_v56, %v6580_v24  ;;  %3883 = vmatpush.bf16.msra.mxu2 %v3871_v12 }
0x1841   :  { %v3849_v33 = vmul.f32 %v6648_v5, %v3840_v30 }
0x1843   :  { %v3858_v58 = vadd.f32 %v4191_v42, %v3849_v33 }
0x1845   :  { %v3870_v26 = vpack.c.bf16 %v3858_v58, %v3857_v57 }
0x1847   :  { %3884 = vmatpush.bf16.msra.mxu2 %v3870_v26 }
0x184a   :  { %4128 = vmatmul.msk.bf16.vlgmr.msra.gmra.mxu2 %vm438_vm1, %v3869_v39 }
0x18cd   :  { %v3886_v22 = vpop.f32.mrf.mxu2 }
0x18ce   :  { %v3890_v29 = vpack.c.bf16 %v3886_v22, %v3886_v22 }
0x18d0   :  { %4137 = vmatmul.msk.bf16.vlgmr.msrb.gmra.mxu1 %vm78_vm0, %v3890_v29 }
0x18d5   :  { %v3888_v24 = vpop.f32.mrf.mxu2 }
0x194d   :  { %v3921_v49 = vpop.f32.mrf.mxu1 }
0x194e   :  { %v3922_v54 = vadd.f32 %v4192_v20, %v3921_v49 }
0x1950   :  { %4563 = vtanh.f32 %v3922_v54 }
0x1955   :  { %v3923_v43 = vpop.f32.mrf.mxu1 }
0x1956   :  { %v4564_v63 = vpop.eup %4563 }
0x1957   :  { %3926 = vst.msk [vmem:[#allocation2] sm:$0xff] %vm78_vm0, %v4564_v63 }
0x1958   :  { %3937 = dma.vmem_to_hbm [thread:$0]  %s3933_s6, 128, %s3935_s9, [#allocation3]  }
0x1959   :  { %4589 = dma.done.wait [#allocation3], 128  }
0x195a   :  { %4590 = vsyncadd [#allocation3], 4294967168 }
0x195b   :  { %3942 = vsyncpa [#allocation3], 1 }

</bundles_post_ra>
